<compile_context>
chip_gen: v7x
topology: tpu7x:2x2x1
jax: 0.10.0
libtpu: 0.0.40
codegen_flags: <defaults>
</compile_context>

<pallas_src>
import functools
import math

import jax
import jax.numpy as jnp
from jax.experimental import pallas as pl
from jax.experimental.pallas import tpu as pltpu

BN_EPS = 1e-5
_TM_CAP = 1024  # rows per grid step for big-M layers (512->85%, 1024->86% of
                # HBM roofline per the tiling sweep; 1024 halves step count).


def _round_up(x, m):
    return ((x + m - 1) // m) * m


def _cin_pad(k, cin):
    """Smallest cin' >= cin such that k*k*cin' is a multiple of 128 (lane-aligned
    im2col K).  3 -> 8 for the first k=4 layer; identity for every other layer."""
    if (k * k * cin) % 128 == 0:
        return cin
    step = 128 // math.gcd(k * k, 128)
    return _round_up(cin, step)


def _pick_tm(M, cap=_TM_CAP):
    """Largest divisor of M that is <= cap and a multiple of 8; M itself if M is
    already small.  Keeps each (tm, K) panel VMEM-friendly while minimizing the
    number of grid steps."""
    if M <= cap:
        return M
    for tm in range(cap - cap % 8, 7, -8):
        if M % tm == 0:
            return tm
    return M  # fallback: single block (never hit for this model's shapes)


# ----------------------------- Pallas kernels -------------------------------

def _conv_bias_act_kernel(p_ref, w_ref, b_ref, o_ref, *, act):
    # (tm, K) @ (K, C) on the MXU (bf16 operands, f32 accumulate), fused bias
    # + activation, stored in the output dtype.
    z = jnp.dot(p_ref[...], w_ref[...], preferred_element_type=jnp.float32)
    z = z + b_ref[...]
    if act == "relu":
        z = jnp.maximum(z, 0.0)
    elif act == "sigmoid":
        z = jax.nn.sigmoid(z)
    o_ref[...] = z.astype(o_ref.dtype)


def _conv_bn_relu_kernel(p_ref, w_ref, g_ref, b_ref, o_ref):
    # Fully fused Conv-as-matmul + training-mode BatchNorm2d (biased batch
    # statistics over all N*H*W rows, which are exactly the M rows of z) + ReLU.
    # The conv bias is intentionally omitted: BN's mean subtraction cancels a
    # per-channel constant exactly.
    z = jnp.dot(p_ref[...], w_ref[...], preferred_element_type=jnp.float32)
    inv_m = 1.0 / z.shape[0]
    mean = jnp.sum(z, axis=0, keepdims=True) * inv_m
    zc = z - mean
    var = jnp.sum(zc * zc, axis=0, keepdims=True) * inv_m
    scale = g_ref[...] * jax.lax.rsqrt(var + BN_EPS)
    y = zc * scale + b_ref[...]
    o_ref[...] = jnp.maximum(y, 0.0).astype(o_ref.dtype)


# ------------------------------ kernel wrappers ------------------------------

def pallas_conv_bias_act(patches, w, b, act, out_dtype):
    M, K = patches.shape
    C = w.shape[1]
    tm = _pick_tm(M)
    return pl.pallas_call(
        functools.partial(_conv_bias_act_kernel, act=act),
        out_shape=jax.ShapeDtypeStruct((M, C), out_dtype),
        grid=(M // tm,),
        in_specs=[
            pl.BlockSpec((tm, K), lambda i: (i, 0)),
            pl.BlockSpec((K, C), lambda i: (0, 0)),
            pl.BlockSpec((1, C), lambda i: (0, 0)),
        ],
        out_specs=pl.BlockSpec((tm, C), lambda i: (i, 0)),
        compiler_params=pltpu.CompilerParams(dimension_semantics=("parallel",)),
    )(patches, w, b)


def pallas_conv_bn_relu(patches, w, gamma, beta, out_dtype):
    M, K = patches.shape
    C = w.shape[1]
    # Every BN layer of this model fits comfortably in VMEM (<= ~1 MiB of
    # operands), so the whole layer is one fused grid step: matmul + batch
    # statistics + affine + ReLU with zero extra HBM passes over z.
    return pl.pallas_call(
        _conv_bn_relu_kernel,
        out_shape=jax.ShapeDtypeStruct((M, C), out_dtype),
        grid=(1,),
        in_specs=[
            pl.BlockSpec((M, K), lambda i: (0, 0)),
            pl.BlockSpec((K, C), lambda i: (0, 0)),
            pl.BlockSpec((1, C), lambda i: (0, 0)),
            pl.BlockSpec((1, C), lambda i: (0, 0)),
        ],
        out_specs=pl.BlockSpec((M, C), lambda i: (0, 0)),
        compiler_params=pltpu.CompilerParams(dimension_semantics=("arbitrary",)),
    )(patches, w, gamma, beta)


# --------------------------------- glue --------------------------------------

def im2col(x_nhwc, k, stride, pad):
    """Extract conv patches (plain-JAX strided slicing, bf16).  Feature ordering
    is (kh, kw, cin), matching the weight flattening in prepare_params."""
    N, H, W, C = x_nhwc.shape
    Hout = (H + 2 * pad - k) // stride + 1
    Wout = (W + 2 * pad - k) // stride + 1
    xp = jnp.pad(x_nhwc, ((0, 0), (pad, pad), (pad, pad), (0, 0)))
    cols = []
    for di in range(k):
        for dj in range(k):
            cols.append(xp[:, di:di + Hout * stride:stride,
                           dj:dj + Wout * stride:stride, :])
    patches = jnp.concatenate(cols, axis=-1)  # (N, Hout, Wout, k*k*C)
    return patches.reshape(N * Hout * Wout, k * k * C), (N, Hout, Wout)


def conv_br_layer(x_nhwc, p, k, stride, pad, bn, act, out_dtype):
    Kp, Cp = p["w"].shape
    cin_pad = Kp // (k * k)
    if cin_pad > x_nhwc.shape[-1]:
        # Zero-pad input channels once (3 -> 8 for conv1) so im2col's K is a
        # multiple of 128; matches the zero-padded weight rows, numerically exact.
        x_nhwc = jnp.pad(
            x_nhwc, ((0, 0), (0, 0), (0, 0), (0, cin_pad - x_nhwc.shape[-1])))
    patches, (N, Hout, Wout) = im2col(x_nhwc, k, stride, pad)
    if bn:
        z = pallas_conv_bn_relu(patches, p["w"], p["gamma"], p["beta"], out_dtype)
    else:
        z = pallas_conv_bias_act(patches, p["w"], p["b"], act, out_dtype)
    return z.reshape(N, Hout, Wout, Cp)


# (kernel, stride, pad, batchnorm, activation) for each layer of the module
_LAYER_CFG = [
    (4, 2, 1, False, "relu"),     # conv1 (bn=False)
    (4, 2, 1, True,  "relu"),     # conv2
    (4, 2, 1, True,  "relu"),     # conv3
    (4, 2, 1, True,  "relu"),     # conv4
    (5, 1, 1, False, "sigmoid"),  # feature: Conv2d(...,1,k=5,s=1,p=1) + Sigmoid
]


def prepare_params(params):
    """One-time (outside the jitted forward) weight preparation:
    (Cout,Cin,kh,kw) -> (kh,kw,Cin,Cout), pad Cin/Cout for lane alignment,
    flatten to (K, Cout) and cast to bf16.  Conv bias of BN layers is dropped
    (exactly cancelled by training-mode BN); gamma/beta/bias stay f32."""
    prepared = []
    for p, (k, s, pad, bn, act) in zip(params, _LAYER_CFG):
        cout, cin = p["w"].shape[0], p["w"].shape[1]
        cinp = _cin_pad(k, cin)
        coutp = cout if cout >= 8 else 128   # pad the 1-channel head to a full lane tile
        w = jnp.transpose(p["w"], (2, 3, 1, 0))                    # (kh, kw, cin, cout)
        w = jnp.pad(w, ((0, 0), (0, 0), (0, cinp - cin), (0, coutp - cout)))
        w = w.reshape(k * k * cinp, coutp).astype(jnp.bfloat16)
        entry = {"w": w}
        if bn:
            entry["gamma"] = p["gamma"].reshape(1, cout).astype(jnp.float32)
            entry["beta"] = p["beta"].reshape(1, cout).astype(jnp.float32)
        else:
            b = jnp.pad(p["b"], (0, coutp - cout)).astype(jnp.float32)
            entry["b"] = b.reshape(1, coutp)
        prepared.append(entry)
    return prepared


def patch_discriminator_t2s(x_nchw, prepared):
    # NCHW -> NHWC; intermediate activations are carried in bf16 (halves HBM
    # traffic), every matmul accumulates in f32, BN stats in f32; output is f32.
    x = jnp.transpose(x_nchw, (0, 2, 3, 1)).astype(jnp.bfloat16)
    n_layers = len(_LAYER_CFG)
    for li, (p, (k, s, pad, bn, act)) in enumerate(zip(prepared, _LAYER_CFG)):
        out_dtype = jnp.float32 if li == n_layers - 1 else jnp.bfloat16
        x = conv_br_layer(x, p, k, s, pad, bn, act, out_dtype)
    # The feature head's Cout was padded 1 -> 128 for MXU/lane alignment; keep
    # only the real channel (module spec: out_channels=1) and return NCHW.
    x = x[..., :1]
    return jnp.transpose(x, (0, 3, 1, 2))


# --------------------------- pure-JAX reference -------------------------------

def reference_forward(x_nchw, params):
    """Same math with lax.conv + training-mode BatchNorm, for validation only."""
    x = jnp.transpose(x_nchw, (0, 2, 3, 1)).astype(jnp.bfloat16)
    for li, (p, (k, s, pad, bn, act)) in enumerate(zip(params, _LAYER_CFG)):
        w = jnp.transpose(p["w"], (2, 3, 1, 0)).astype(jnp.bfloat16)   # HWIO
        z = jax.lax.conv_general_dilated(
            x, w, (s, s), [(pad, pad), (pad, pad)],
            dimension_numbers=("NHWC", "HWIO", "NHWC"),
            preferred_element_type=jnp.float32)
        z = z + p["b"].astype(jnp.float32)
        if bn:
            mean = jnp.mean(z, axis=(0, 1, 2), keepdims=True)
            var = jnp.mean((z - mean) ** 2, axis=(0, 1, 2), keepdims=True)
            z = (z - mean) * jax.lax.rsqrt(var + BN_EPS) * p["gamma"] + p["beta"]
        if act == "relu":
            z = jnp.maximum(z, 0.0)
        else:
            z = jax.nn.sigmoid(z)
        x = z if li == len(_LAYER_CFG) - 1 else z.astype(jnp.bfloat16)
    return jnp.transpose(x, (0, 3, 1, 2))


def init_params(key, input_nc=3, ndf=16):
    """Deterministic PyTorch-default-style init (uniform +/- 1/sqrt(fan_in);
    BN gamma=1, beta=0).  Conv bias is created for every layer for parameter
    parity with the nn.Module; BN-layer biases are unused in the fused forward
    because training-mode BN cancels them exactly."""
    shapes = [
        (input_nc, ndf, 4, False),
        (ndf, ndf * 2, 4, True),
        (ndf * 2, ndf * 4, 4, True),
        (ndf * 4, ndf * 8, 4, True),
        (ndf * 8, 1, 5, False),
    ]
    keys = jax.random.split(key, 2 * len(shapes))
    params = []
    for i, (cin, cout, k, bn) in enumerate(shapes):
        bound = 1.0 / (cin * k * k) ** 0.5
        w = jax.random.uniform(keys[2 * i], (cout, cin, k, k), jnp.float32,
                               -bound, bound)
        b = jax.random.uniform(keys[2 * i + 1], (cout,), jnp.float32,
                               -bound, bound)
        layer = {"w": w, "b": b}
        if bn:
            layer["gamma"] = jnp.ones((cout,), jnp.float32)
            layer["beta"] = jnp.zeros((cout,), jnp.float32)
        params.append(layer)
    return params


if __name__ == "__main__":
    key = jax.random.PRNGKey(0)
    kx, kp = jax.random.split(key)
    # small shapes: batch=2, input_nc=3, spatial=64, ndf=16
    x = jax.random.normal(kx, (2, 3, 64, 64), jnp.float32)
    params = init_params(kp, input_nc=3, ndf=16)
    prepared = prepare_params(params)          # hoisted, one-time weight prep

    fwd = jax.jit(patch_discriminator_t2s)
    out = jax.block_until_ready(fwd(x, prepared))

    # 64 -> 32 -> 16 -> 8 -> 4 -(k5,p1,s1)-> 2 spatial, 1 channel
    assert out.shape == (2, 1, 2, 2), out.shape
    assert bool(jnp.all(jnp.isfinite(out)))
    assert bool(jnp.all((out >= 0.0) & (out <= 1.0)))  # post-sigmoid range

    # pure-JAX reference check (same bf16 activations / f32 accumulation path)
    ref = jax.block_until_ready(jax.jit(reference_forward)(x, params))
    assert bool(jnp.max(jnp.abs(out - ref)) < 3e-2), float(jnp.max(jnp.abs(out - ref)))

    print("KERNEL_OK")
</pallas_src>

<mosaic_0001>
module attributes {stable_mosaic.version = 11 : i64} {
  func.func @_conv_bias_act_kernel(%arg0: i32, %arg1: memref<1024x128xbf16, #tpu.memory_space<vmem>>, %arg2: memref<128x16xbf16, #tpu.memory_space<vmem>>, %arg3: memref<1x16xf32, #tpu.memory_space<vmem>>, %arg4: memref<1024x16xbf16, #tpu.memory_space<vmem>>) attributes {dimension_semantics = [#tpu.dimension_semantics<parallel>], iteration_bounds = array<i64: 2>, scalar_prefetch = 0 : i64, scratch_operands = 0 : i64, tpu.core_type = #tpu.core_type<tc>, window_params = [{transform_indices = @transform_0, window_bounds = array<i64: 1024, 128>}, {pipeline_mode = #tpu.pipeline_mode<synchronous>, transform_indices = @transform_1, window_bounds = array<i64: 128, 16>}, {pipeline_mode = #tpu.pipeline_mode<synchronous>, transform_indices = @transform_2, window_bounds = array<i64: 1, 16>}, {transform_indices = @transform_3, window_bounds = array<i64: 1024, 16>}]} {
    %c0 = arith.constant 0 : index
    %c0_0 = arith.constant 0 : index
    %0 = vector.load %arg1[%c0, %c0_0] : memref<1024x128xbf16, #tpu.memory_space<vmem>>, vector<1024x128xbf16>
    %c0_1 = arith.constant 0 : index
    %c0_2 = arith.constant 0 : index
    %1 = vector.load %arg2[%c0_1, %c0_2] : memref<128x16xbf16, #tpu.memory_space<vmem>>, vector<128x16xbf16>
    %cst = arith.constant dense<0.000000e+00> : vector<1024x16xf32>
    %2 = tpu.matmul %0, %1, %cst {dimension_numbers = #tpu.dot_dimension_numbers<[1], [0], [0], [1], [0, 0, 1, 1], [], []>} : vector<1024x128xbf16>, vector<128x16xbf16>, vector<1024x16xf32> -> vector<1024x16xf32>
    %c0_3 = arith.constant 0 : index
    %c0_4 = arith.constant 0 : index
    %3 = vector.load %arg3[%c0_3, %c0_4] : memref<1x16xf32, #tpu.memory_space<vmem>>, vector<1x16xf32>
    %4 = vector.broadcast %3 : vector<1x16xf32> to vector<1024x16xf32>
    %5 = arith.addf %2, %4 : vector<1024x16xf32>
    %cst_5 = arith.constant 0.000000e+00 : f32
    %6 = vector.broadcast %cst_5 : f32 to vector<1024x16xf32>
    %7 = arith.maximumf %5, %6 : vector<1024x16xf32>
    %8 = arith.truncf %7 : vector<1024x16xf32> to vector<1024x16xbf16>
    %c0_6 = arith.constant 0 : index
    %c0_7 = arith.constant 0 : index
    %9 = vector.load %arg4[%c0_6, %c0_7] : memref<1024x16xbf16, #tpu.memory_space<vmem>>, vector<1024x16xbf16>
    tpu.vector_store %arg4[%c0_6, %c0_7], %8 {strides = array<i32>} : memref<1024x16xbf16, #tpu.memory_space<vmem>>, vector<1024x16xbf16>,
    return
  }
  func.func @transform_0(%arg0: i32) -> (i32, i32) {
    %c0_i32 = arith.constant 0 : i32
    %c0_i32_0 = arith.constant 0 : i32
    return %arg0, %c0_i32 : i32, i32
  }
  func.func @transform_1(%arg0: i32) -> (i32, i32) {
    %c0_i32 = arith.constant 0 : i32
    %c0_i32_0 = arith.constant 0 : i32
    %c0_i32_1 = arith.constant 0 : i32
    return %c0_i32, %c0_i32_0 : i32, i32
  }
  func.func @transform_2(%arg0: i32) -> (i32, i32) {
    %c0_i32 = arith.constant 0 : i32
    %c0_i32_0 = arith.constant 0 : i32
    %c0_i32_1 = arith.constant 0 : i32
    return %c0_i32, %c0_i32_0 : i32, i32
  }
  func.func @transform_3(%arg0: i32) -> (i32, i32) {
    %c0_i32 = arith.constant 0 : i32
    %c0_i32_0 = arith.constant 0 : i32
    return %arg0, %c0_i32 : i32, i32
  }
}

module attributes {stable_mosaic.version = 11 : i64} {
  func.func @_conv_bn_relu_kernel(%arg0: i32, %arg1: memref<512x256xbf16, #tpu.memory_space<vmem>>, %arg2: memref<256x32xbf16, #tpu.memory_space<vmem>>, %arg3: memref<1x32xf32, #tpu.memory_space<vmem>>, %arg4: memref<1x32xf32, #tpu.memory_space<vmem>>, %arg5: memref<512x32xbf16, #tpu.memory_space<vmem>>) attributes {dimension_semantics = [#tpu.dimension_semantics<arbitrary>], iteration_bounds = array<i64: 1>, scalar_prefetch = 0 : i64, scratch_operands = 0 : i64, tpu.core_type = #tpu.core_type<tc>, window_params = [{pipeline_mode = #tpu.pipeline_mode<synchronous>, transform_indices = @transform_0, window_bounds = array<i64: 512, 256>}, {pipeline_mode = #tpu.pipeline_mode<synchronous>, transform_indices = @transform_1, window_bounds = array<i64: 256, 32>}, {pipeline_mode = #tpu.pipeline_mode<synchronous>, transform_indices = @transform_2, window_bounds = array<i64: 1, 32>}, {pipeline_mode = #tpu.pipeline_mode<synchronous>, transform_indices = @transform_3, window_bounds = array<i64: 1, 32>}, {pipeline_mode = #tpu.pipeline_mode<synchronous>, transform_indices = @transform_4, window_bounds = array<i64: 512, 32>}]} {
    %c0 = arith.constant 0 : index
    %c0_0 = arith.constant 0 : index
    %0 = vector.load %arg1[%c0, %c0_0] : memref<512x256xbf16, #tpu.memory_space<vmem>>, vector<512x256xbf16>
    %c0_1 = arith.constant 0 : index
    %c0_2 = arith.constant 0 : index
    %1 = vector.load %arg2[%c0_1, %c0_2] : memref<256x32xbf16, #tpu.memory_space<vmem>>, vector<256x32xbf16>
    %cst = arith.constant dense<0.000000e+00> : vector<512x32xf32>
    %2 = tpu.matmul %0, %1, %cst {dimension_numbers = #tpu.dot_dimension_numbers<[1], [0], [0], [1], [0, 0, 1, 1], [], []>} : vector<512x256xbf16>, vector<256x32xbf16>, vector<512x32xf32> -> vector<512x32xf32>
    %cst_3 = arith.constant dense<0.000000e+00> : vector<32xf32>
    %3 = vector.multi_reduction <add>, %2, %cst_3 [0] : vector<512x32xf32> to vector<32xf32>
    %4 = vector.shape_cast %3 : vector<32xf32> to vector<1x32xf32>
    %cst_4 = arith.constant 0.001953125 : f32
    %5 = vector.broadcast %cst_4 : f32 to vector<1x32xf32>
    %6 = arith.mulf %4, %5 : vector<1x32xf32>
    %7 = vector.broadcast %6 : vector<1x32xf32> to vector<512x32xf32>
    %8 = arith.subf %2, %7 : vector<512x32xf32>
    %9 = arith.mulf %8, %8 : vector<512x32xf32>
    %cst_5 = arith.constant dense<0.000000e+00> : vector<32xf32>
    %10 = vector.multi_reduction <add>, %9, %cst_5 [0] : vector<512x32xf32> to vector<32xf32>
    %11 = vector.shape_cast %10 : vector<32xf32> to vector<1x32xf32>
    %cst_6 = arith.constant 0.001953125 : f32
    %12 = vector.broadcast %cst_6 : f32 to vector<1x32xf32>
    %13 = arith.mulf %11, %12 : vector<1x32xf32>
    %c0_7 = arith.constant 0 : index
    %c0_8 = arith.constant 0 : index
    %14 = vector.load %arg3[%c0_7, %c0_8] : memref<1x32xf32, #tpu.memory_space<vmem>>, vector<1x32xf32>
    %cst_9 = arith.constant 9.99999974E-6 : f32
    %15 = vector.broadcast %cst_9 : f32 to vector<1x32xf32>
    %16 = arith.addf %13, %15 : vector<1x32xf32>
    %17 = math.rsqrt %16 : vector<1x32xf32>
    %18 = arith.mulf %14, %17 : vector<1x32xf32>
    %19 = vector.broadcast %18 : vector<1x32xf32> to vector<512x32xf32>
    %20 = arith.mulf %8, %19 : vector<512x32xf32>
    %c0_10 = arith.constant 0 : index
    %c0_11 = arith.constant 0 : index
    %21 = vector.load %arg4[%c0_10, %c0_11] : memref<1x32xf32, #tpu.memory_space<vmem>>, vector<1x32xf32>
    %22 = vector.broadcast %21 : vector<1x32xf32> to vector<512x32xf32>
    %23 = arith.addf %20, %22 : vector<512x32xf32>
    %cst_12 = arith.constant 0.000000e+00 : f32
    %24 = vector.broadcast %cst_12 : f32 to vector<512x32xf32>
    %25 = arith.maximumf %23, %24 : vector<512x32xf32>
    %26 = arith.truncf %25 : vector<512x32xf32> to vector<512x32xbf16>
    %c0_13 = arith.constant 0 : index
    %c0_14 = arith.constant 0 : index
    %27 = vector.load %arg5[%c0_13, %c0_14] : memref<512x32xbf16, #tpu.memory_space<vmem>>, vector<512x32xbf16>
    tpu.vector_store %arg5[%c0_13, %c0_14], %26 {strides = array<i32>} : memref<512x32xbf16, #tpu.memory_space<vmem>>, vector<512x32xbf16>,
    return
  }
  func.func @transform_0(%arg0: i32) -> (i32, i32) {
    %c0_i32 = arith.constant 0 : i32
    %c0_i32_0 = arith.constant 0 : i32
    %c0_i32_1 = arith.constant 0 : i32
    return %c0_i32, %c0_i32_0 : i32, i32
  }
  func.func @transform_1(%arg0: i32) -> (i32, i32) {
    %c0_i32 = arith.constant 0 : i32
    %c0_i32_0 = arith.constant 0 : i32
    %c0_i32_1 = arith.constant 0 : i32
    return %c0_i32, %c0_i32_0 : i32, i32
  }
  func.func @transform_2(%arg0: i32) -> (i32, i32) {
    %c0_i32 = arith.constant 0 : i32
    %c0_i32_0 = arith.constant 0 : i32
    %c0_i32_1 = arith.constant 0 : i32
    return %c0_i32, %c0_i32_0 : i32, i32
  }
  func.func @transform_3(%arg0: i32) -> (i32, i32) {
    %c0_i32 = arith.constant 0 : i32
    %c0_i32_0 = arith.constant 0 : i32
    %c0_i32_1 = arith.constant 0 : i32
    return %c0_i32, %c0_i32_0 : i32, i32
  }
  func.func @transform_4(%arg0: i32) -> (i32, i32) {
    %c0_i32 = arith.constant 0 : i32
    %c0_i32_0 = arith.constant 0 : i32
    %c0_i32_1 = arith.constant 0 : i32
    return %c0_i32, %c0_i32_0 : i32, i32
  }
}

module attributes {stable_mosaic.version = 11 : i64} {
  func.func @_conv_bn_relu_kernel(%arg0: i32, %arg1: memref<128x512xbf16, #tpu.memory_space<vmem>>, %arg2: memref<512x64xbf16, #tpu.memory_space<vmem>>, %arg3: memref<1x64xf32, #tpu.memory_space<vmem>>, %arg4: memref<1x64xf32, #tpu.memory_space<vmem>>, %arg5: memref<128x64xbf16, #tpu.memory_space<vmem>>) attributes {dimension_semantics = [#tpu.dimension_semantics<arbitrary>], iteration_bounds = array<i64: 1>, scalar_prefetch = 0 : i64, scratch_operands = 0 : i64, tpu.core_type = #tpu.core_type<tc>, window_params = [{pipeline_mode = #tpu.pipeline_mode<synchronous>, transform_indices = @transform_0, window_bounds = array<i64: 128, 512>}, {pipeline_mode = #tpu.pipeline_mode<synchronous>, transform_indices = @transform_1, window_bounds = array<i64: 512, 64>}, {pipeline_mode = #tpu.pipeline_mode<synchronous>, transform_indices = @transform_2, window_bounds = array<i64: 1, 64>}, {pipeline_mode = #tpu.pipeline_mode<synchronous>, transform_indices = @transform_3, window_bounds = array<i64: 1, 64>}, {pipeline_mode = #tpu.pipeline_mode<synchronous>, transform_indices = @transform_4, window_bounds = array<i64: 128, 64>}]} {
    %c0 = arith.constant 0 : index
    %c0_0 = arith.constant 0 : index
    %0 = vector.load %arg1[%c0, %c0_0] : memref<128x512xbf16, #tpu.memory_space<vmem>>, vector<128x512xbf16>
    %c0_1 = arith.constant 0 : index
    %c0_2 = arith.constant 0 : index
    %1 = vector.load %arg2[%c0_1, %c0_2] : memref<512x64xbf16, #tpu.memory_space<vmem>>, vector<512x64xbf16>
    %cst = arith.constant dense<0.000000e+00> : vector<128x64xf32>
    %2 = tpu.matmul %0, %1, %cst {dimension_numbers = #tpu.dot_dimension_numbers<[1], [0], [0], [1], [0, 0, 1, 1], [], []>} : vector<128x512xbf16>, vector<512x64xbf16>, vector<128x64xf32> -> vector<128x64xf32>
    %cst_3 = arith.constant dense<0.000000e+00> : vector<64xf32>
    %3 = vector.multi_reduction <add>, %2, %cst_3 [0] : vector<128x64xf32> to vector<64xf32>
    %4 = vector.shape_cast %3 : vector<64xf32> to vector<1x64xf32>
    %cst_4 = arith.constant 7.812500e-03 : f32
    %5 = vector.broadcast %cst_4 : f32 to vector<1x64xf32>
    %6 = arith.mulf %4, %5 : vector<1x64xf32>
    %7 = vector.broadcast %6 : vector<1x64xf32> to vector<128x64xf32>
    %8 = arith.subf %2, %7 : vector<128x64xf32>
    %9 = arith.mulf %8, %8 : vector<128x64xf32>
    %cst_5 = arith.constant dense<0.000000e+00> : vector<64xf32>
    %10 = vector.multi_reduction <add>, %9, %cst_5 [0] : vector<128x64xf32> to vector<64xf32>
    %11 = vector.shape_cast %10 : vector<64xf32> to vector<1x64xf32>
    %cst_6 = arith.constant 7.812500e-03 : f32
    %12 = vector.broadcast %cst_6 : f32 to vector<1x64xf32>
    %13 = arith.mulf %11, %12 : vector<1x64xf32>
    %c0_7 = arith.constant 0 : index
    %c0_8 = arith.constant 0 : index
    %14 = vector.load %arg3[%c0_7, %c0_8] : memref<1x64xf32, #tpu.memory_space<vmem>>, vector<1x64xf32>
    %cst_9 = arith.constant 9.99999974E-6 : f32
    %15 = vector.broadcast %cst_9 : f32 to vector<1x64xf32>
    %16 = arith.addf %13, %15 : vector<1x64xf32>
    %17 = math.rsqrt %16 : vector<1x64xf32>
    %18 = arith.mulf %14, %17 : vector<1x64xf32>
    %19 = vector.broadcast %18 : vector<1x64xf32> to vector<128x64xf32>
    %20 = arith.mulf %8, %19 : vector<128x64xf32>
    %c0_10 = arith.constant 0 : index
    %c0_11 = arith.constant 0 : index
    %21 = vector.load %arg4[%c0_10, %c0_11] : memref<1x64xf32, #tpu.memory_space<vmem>>, vector<1x64xf32>
    %22 = vector.broadcast %21 : vector<1x64xf32> to vector<128x64xf32>
    %23 = arith.addf %20, %22 : vector<128x64xf32>
    %cst_12 = arith.constant 0.000000e+00 : f32
    %24 = vector.broadcast %cst_12 : f32 to vector<128x64xf32>
    %25 = arith.maximumf %23, %24 : vector<128x64xf32>
    %26 = arith.truncf %25 : vector<128x64xf32> to vector<128x64xbf16>
    %c0_13 = arith.constant 0 : index
    %c0_14 = arith.constant 0 : index
    %27 = vector.load %arg5[%c0_13, %c0_14] : memref<128x64xbf16, #tpu.memory_space<vmem>>, vector<128x64xbf16>
    tpu.vector_store %arg5[%c0_13, %c0_14], %26 {strides = array<i32>} : memref<128x64xbf16, #tpu.memory_space<vmem>>, vector<128x64xbf16>,
    return
  }
  func.func @transform_0(%arg0: i32) -> (i32, i32) {
    %c0_i32 = arith.constant 0 : i32
    %c0_i32_0 = arith.constant 0 : i32
    %c0_i32_1 = arith.constant 0 : i32
    return %c0_i32, %c0_i32_0 : i32, i32
  }
  func.func @transform_1(%arg0: i32) -> (i32, i32) {
    %c0_i32 = arith.constant 0 : i32
    %c0_i32_0 = arith.constant 0 : i32
    %c0_i32_1 = arith.constant 0 : i32
    return %c0_i32, %c0_i32_0 : i32, i32
  }
  func.func @transform_2(%arg0: i32) -> (i32, i32) {
    %c0_i32 = arith.constant 0 : i32
    %c0_i32_0 = arith.constant 0 : i32
    %c0_i32_1 = arith.constant 0 : i32
    return %c0_i32, %c0_i32_0 : i32, i32
  }
  func.func @transform_3(%arg0: i32) -> (i32, i32) {
    %c0_i32 = arith.constant 0 : i32
    %c0_i32_0 = arith.constant 0 : i32
    %c0_i32_1 = arith.constant 0 : i32
    return %c0_i32, %c0_i32_0 : i32, i32
  }
  func.func @transform_4(%arg0: i32) -> (i32, i32) {
    %c0_i32 = arith.constant 0 : i32
    %c0_i32_0 = arith.constant 0 : i32
    %c0_i32_1 = arith.constant 0 : i32
    return %c0_i32, %c0_i32_0 : i32, i32
  }
}

module attributes {stable_mosaic.version = 11 : i64} {
  func.func @_conv_bn_relu_kernel(%arg0: i32, %arg1: memref<32x1024xbf16, #tpu.memory_space<vmem>>, %arg2: memref<1024x128xbf16, #tpu.memory_space<vmem>>, %arg3: memref<1x128xf32, #tpu.memory_space<vmem>>, %arg4: memref<1x128xf32, #tpu.memory_space<vmem>>, %arg5: memref<32x128xbf16, #tpu.memory_space<vmem>>) attributes {dimension_semantics = [#tpu.dimension_semantics<arbitrary>], iteration_bounds = array<i64: 1>, scalar_prefetch = 0 : i64, scratch_operands = 0 : i64, tpu.core_type = #tpu.core_type<tc>, window_params = [{pipeline_mode = #tpu.pipeline_mode<synchronous>, transform_indices = @transform_0, window_bounds = array<i64: 32, 1024>}, {pipeline_mode = #tpu.pipeline_mode<synchronous>, transform_indices = @transform_1, window_bounds = array<i64: 1024, 128>}, {pipeline_mode = #tpu.pipeline_mode<synchronous>, transform_indices = @transform_2, window_bounds = array<i64: 1, 128>}, {pipeline_mode = #tpu.pipeline_mode<synchronous>, transform_indices = @transform_3, window_bounds = array<i64: 1, 128>}, {pipeline_mode = #tpu.pipeline_mode<synchronous>, transform_indices = @transform_4, window_bounds = array<i64: 32, 128>}]} {
    %c0 = arith.constant 0 : index
    %c0_0 = arith.constant 0 : index
    %0 = vector.load %arg1[%c0, %c0_0] : memref<32x1024xbf16, #tpu.memory_space<vmem>>, vector<32x1024xbf16>
    %c0_1 = arith.constant 0 : index
    %c0_2 = arith.constant 0 : index
    %1 = vector.load %arg2[%c0_1, %c0_2] : memref<1024x128xbf16, #tpu.memory_space<vmem>>, vector<1024x128xbf16>
    %cst = arith.constant dense<0.000000e+00> : vector<32x128xf32>
    %2 = tpu.matmul %0, %1, %cst {dimension_numbers = #tpu.dot_dimension_numbers<[1], [0], [0], [1], [0, 0, 1, 1], [], []>} : vector<32x1024xbf16>, vector<1024x128xbf16>, vector<32x128xf32> -> vector<32x128xf32>
    %cst_3 = arith.constant dense<0.000000e+00> : vector<128xf32>
    %3 = vector.multi_reduction <add>, %2, %cst_3 [0] : vector<32x128xf32> to vector<128xf32>
    %4 = vector.shape_cast %3 : vector<128xf32> to vector<1x128xf32>
    %cst_4 = arith.constant 3.125000e-02 : f32
    %5 = vector.broadcast %cst_4 : f32 to vector<1x128xf32>
    %6 = arith.mulf %4, %5 : vector<1x128xf32>
    %7 = vector.broadcast %6 : vector<1x128xf32> to vector<32x128xf32>
    %8 = arith.subf %2, %7 : vector<32x128xf32>
    %9 = arith.mulf %8, %8 : vector<32x128xf32>
    %cst_5 = arith.constant dense<0.000000e+00> : vector<128xf32>
    %10 = vector.multi_reduction <add>, %9, %cst_5 [0] : vector<32x128xf32> to vector<128xf32>
    %11 = vector.shape_cast %10 : vector<128xf32> to vector<1x128xf32>
    %cst_6 = arith.constant 3.125000e-02 : f32
    %12 = vector.broadcast %cst_6 : f32 to vector<1x128xf32>
    %13 = arith.mulf %11, %12 : vector<1x128xf32>
    %c0_7 = arith.constant 0 : index
    %c0_8 = arith.constant 0 : index
    %14 = vector.load %arg3[%c0_7, %c0_8] : memref<1x128xf32, #tpu.memory_space<vmem>>, vector<1x128xf32>
    %cst_9 = arith.constant 9.99999974E-6 : f32
    %15 = vector.broadcast %cst_9 : f32 to vector<1x128xf32>
    %16 = arith.addf %13, %15 : vector<1x128xf32>
    %17 = math.rsqrt %16 : vector<1x128xf32>
    %18 = arith.mulf %14, %17 : vector<1x128xf32>
    %19 = vector.broadcast %18 : vector<1x128xf32> to vector<32x128xf32>
    %20 = arith.mulf %8, %19 : vector<32x128xf32>
    %c0_10 = arith.constant 0 : index
    %c0_11 = arith.constant 0 : index
    %21 = vector.load %arg4[%c0_10, %c0_11] : memref<1x128xf32, #tpu.memory_space<vmem>>, vector<1x128xf32>
    %22 = vector.broadcast %21 : vector<1x128xf32> to vector<32x128xf32>
    %23 = arith.addf %20, %22 : vector<32x128xf32>
    %cst_12 = arith.constant 0.000000e+00 : f32
    %24 = vector.broadcast %cst_12 : f32 to vector<32x128xf32>
    %25 = arith.maximumf %23, %24 : vector<32x128xf32>
    %26 = arith.truncf %25 : vector<32x128xf32> to vector<32x128xbf16>
    %c0_13 = arith.constant 0 : index
    %c0_14 = arith.constant 0 : index
    %27 = vector.load %arg5[%c0_13, %c0_14] : memref<32x128xbf16, #tpu.memory_space<vmem>>, vector<32x128xbf16>
    tpu.vector_store %arg5[%c0_13, %c0_14], %26 {strides = array<i32>} : memref<32x128xbf16, #tpu.memory_space<vmem>>, vector<32x128xbf16>,
    return
  }
  func.func @transform_0(%arg0: i32) -> (i32, i32) {
    %c0_i32 = arith.constant 0 : i32
    %c0_i32_0 = arith.constant 0 : i32
    %c0_i32_1 = arith.constant 0 : i32
    return %c0_i32, %c0_i32_0 : i32, i32
  }
  func.func @transform_1(%arg0: i32) -> (i32, i32) {
    %c0_i32 = arith.constant 0 : i32
    %c0_i32_0 = arith.constant 0 : i32
    %c0_i32_1 = arith.constant 0 : i32
    return %c0_i32, %c0_i32_0 : i32, i32
  }
  func.func @transform_2(%arg0: i32) -> (i32, i32) {
    %c0_i32 = arith.constant 0 : i32
    %c0_i32_0 = arith.constant 0 : i32
    %c0_i32_1 = arith.constant 0 : i32
    return %c0_i32, %c0_i32_0 : i32, i32
  }
  func.func @transform_3(%arg0: i32) -> (i32, i32) {
    %c0_i32 = arith.constant 0 : i32
    %c0_i32_0 = arith.constant 0 : i32
    %c0_i32_1 = arith.constant 0 : i32
    return %c0_i32, %c0_i32_0 : i32, i32
  }
  func.func @transform_4(%arg0: i32) -> (i32, i32) {
    %c0_i32 = arith.constant 0 : i32
    %c0_i32_0 = arith.constant 0 : i32
    %c0_i32_1 = arith.constant 0 : i32
    return %c0_i32, %c0_i32_0 : i32, i32
  }
}

module attributes {stable_mosaic.version = 11 : i64} {
  func.func @_conv_bias_act_kernel(%arg0: i32, %arg1: memref<8x3200xbf16, #tpu.memory_space<vmem>>, %arg2: memref<3200x128xbf16, #tpu.memory_space<vmem>>, %arg3: memref<1x128xf32, #tpu.memory_space<vmem>>, %arg4: memref<8x128xf32, #tpu.memory_space<vmem>>) attributes {dimension_semantics = [#tpu.dimension_semantics<parallel>], iteration_bounds = array<i64: 1>, scalar_prefetch = 0 : i64, scratch_operands = 0 : i64, tpu.core_type = #tpu.core_type<tc>, window_params = [{transform_indices = @transform_0, window_bounds = array<i64: 8, 3200>}, {pipeline_mode = #tpu.pipeline_mode<synchronous>, transform_indices = @transform_1, window_bounds = array<i64: 3200, 128>}, {pipeline_mode = #tpu.pipeline_mode<synchronous>, transform_indices = @transform_2, window_bounds = array<i64: 1, 128>}, {transform_indices = @transform_3, window_bounds = array<i64: 8, 128>}]} {
    %c0 = arith.constant 0 : index
    %c0_0 = arith.constant 0 : index
    %0 = vector.load %arg1[%c0, %c0_0] : memref<8x3200xbf16, #tpu.memory_space<vmem>>, vector<8x3200xbf16>
    %c0_1 = arith.constant 0 : index
    %c0_2 = arith.constant 0 : index
    %1 = vector.load %arg2[%c0_1, %c0_2] : memref<3200x128xbf16, #tpu.memory_space<vmem>>, vector<3200x128xbf16>
    %cst = arith.constant dense<0.000000e+00> : vector<8x128xf32>
    %2 = tpu.matmul %0, %1, %cst {dimension_numbers = #tpu.dot_dimension_numbers<[1], [0], [0], [1], [0, 0, 1, 1], [], []>} : vector<8x3200xbf16>, vector<3200x128xbf16>, vector<8x128xf32> -> vector<8x128xf32>
    %c0_3 = arith.constant 0 : index
    %c0_4 = arith.constant 0 : index
    %3 = vector.load %arg3[%c0_3, %c0_4] : memref<1x128xf32, #tpu.memory_space<vmem>>, vector<1x128xf32>
    %4 = vector.broadcast %3 : vector<1x128xf32> to vector<8x128xf32>
    %5 = arith.addf %2, %4 : vector<8x128xf32>
    %6 = arith.negf %5 : vector<8x128xf32>
    %7 = math.exp %6 : vector<8x128xf32>
    %cst_5 = arith.constant 1.000000e+00 : f32
    %8 = vector.broadcast %cst_5 : f32 to vector<8x128xf32>
    %9 = arith.addf %8, %7 : vector<8x128xf32>
    %10 = arith.divf %8, %9 : vector<8x128xf32>
    %c0_6 = arith.constant 0 : index
    %c0_7 = arith.constant 0 : index
    %11 = vector.load %arg4[%c0_6, %c0_7] : memref<8x128xf32, #tpu.memory_space<vmem>>, vector<8x128xf32>
    tpu.vector_store %arg4[%c0_6, %c0_7], %10 {strides = array<i32>} : memref<8x128xf32, #tpu.memory_space<vmem>>, vector<8x128xf32>,
    return
  }
  func.func @transform_0(%arg0: i32) -> (i32, i32) {
    %c0_i32 = arith.constant 0 : i32
    %c0_i32_0 = arith.constant 0 : i32
    return %arg0, %c0_i32 : i32, i32
  }
  func.func @transform_1(%arg0: i32) -> (i32, i32) {
    %c0_i32 = arith.constant 0 : i32
    %c0_i32_0 = arith.constant 0 : i32
    %c0_i32_1 = arith.constant 0 : i32
    return %c0_i32, %c0_i32_0 : i32, i32
  }
  func.func @transform_2(%arg0: i32) -> (i32, i32) {
    %c0_i32 = arith.constant 0 : i32
    %c0_i32_0 = arith.constant 0 : i32
    %c0_i32_1 = arith.constant 0 : i32
    return %c0_i32, %c0_i32_0 : i32, i32
  }
  func.func @transform_3(%arg0: i32) -> (i32, i32) {
    %c0_i32 = arith.constant 0 : i32
    %c0_i32_0 = arith.constant 0 : i32
    return %arg0, %c0_i32 : i32, i32
  }
}

</mosaic_0001>

<bundles_post_ra>
// kernel: patch_discriminator_t2s.5
= control target key start
LH: loop header
LB: loop body
LE: loop exit
PB: predicated region body
PF: predicated region fallthrough
CT: control target
= control target key end

     0   :  { %s2809_s12 = smov 0   ;;  %s3319_s0 = inlined_call_operand.vmem [shape: bf16[2048,128], index: 0, kind: input, shape index: {}]   ;;  %s3320_s1 = inlined_call_operand.vmem [shape: bf16[128,16], index: 1, kind: input, shape index: {}]   ;;  %s3321_s2 = inlined_call_operand.vmem [shape: f32[1,16], index: 2, kind: input, shape index: {}]   ;;  %s3322_s3 = inlined_call_operand.vmem [shape: bf16[2048,16], index: 3, kind: output, shape index: {}]  }
   0x1 LB: > { %s2128_s13 = sadd.s32 4294967295, %s2787_s12   ;;  %p2132_p0 = scmp.ge.s32.totalorder %s2787_s12, 1  ;;  %s2787_s12 = sphi %s2809_s12, %s13_s12  }
   0x2   : > { %p138_p1 = scmp.lt.s32.totalorder %s2787_s12, 3 }
   0x4   : > { %p139_p2 = pnand %p2132_p0, %p138_p1 }
   0x5   : > { %v2708_v0 = vld [vmem:[%s3320_s1] sm:$0xff] (!%p139_p2)   ;;  %s2133_s16 = sshll.u32 (!%p139_p2), %s2128_s13, 7  ;;  %v2709_v1 = vld [vmem:[%s3320_s1 + $0x8] sm:$0xff] (!%p139_p2)   ;;  %v2710_v2 = vld [vmem:[%s3320_s1 + $0x10] sm:$0xff] (!%p139_p2)   ;;  %vm1943_vm0 = vcmask (!%p139_p2), 125952  }
   0x6   : > { %142 = sbr.rel (%p139_p2) target bundleno = 380 (0x17c), region = 32  ;;  %p163_p3 = scmp.lt.s32.totalorder (!%p139_p2), %s2133_s16, 255  ;;  %2540 = vmatprep.subr.bf16.mxu0 (!%p139_p2), %v2708_v0  ;;  %2684 = vmatprep.subr.bf16.mxu1 (!%p139_p2), %v2708_v0  ;;  %v2711_v3 = vld [vmem:[%s3320_s1 + $0x18] sm:$0xff] (!%p139_p2)   ;;  %v2712_v6 = vld [vmem:[%s3320_s1 + $0x20] sm:$0xff] (!%p139_p2)   ;;  %v2713_v7 = vld [vmem:[%s3320_s1 + $0x28] sm:$0xff] (!%p139_p2)  }
   0x7   : > { %2541 = vmatpush3.bf16.msra.mxu0 (!%p139_p2), %v2708_v0  ;;  %2692 = vmatpush3.bf16.msra.mxu1 (!%p139_p2), %v2708_v0  ;;  %v2714_v8 = vld [vmem:[%s3320_s1 + $0x30] sm:$0xff] (!%p139_p2)   ;;  %v2715_v9 = vld [vmem:[%s3320_s1 + $0x38] sm:$0xff] (!%p139_p2)  }
   0x8   : > { %2542 = vmatprep.subr.bf16.mxu0 (!%p139_p2), %v2709_v1  ;;  %2685 = vmatprep.subr.bf16.mxu1 (!%p139_p2), %v2709_v1 }
   0xb   : > { %2543 = vmatpush3.bf16.msra.mxu0 (!%p139_p2), %v2709_v1  ;;  %2693 = vmatpush3.bf16.msra.mxu1 (!%p139_p2), %v2709_v1 }
   0xc   : > { %2544 = vmatprep.subr.bf16.mxu0 (!%p139_p2), %v2710_v2  ;;  %2686 = vmatprep.subr.bf16.mxu1 (!%p139_p2), %v2710_v2 }
   0xd   : > { %s3324_s16 = smov (!%p163_p3, %s2133_s16), 255 }
   0xe   : > { %s2134_s21 = sshll.u32 %s3324_s16, 2 }
   0xf   : > { %s2834_s24 = scalar_lea.vmem %s3319_s0, %s2134_s21  ;;  %2545 = vmatpush3.bf16.msra.mxu0 %v2710_v2  ;;  %2694 = vmatpush3.bf16.msra.mxu1 %v2710_v2  ;;  %s2931_s13 = scalar_lea.vmem %s3322_s3, %s2134_s21 }
  0x10   : > { %v2716_v4 = vld [vmem:[%s2834_s24] sm:$0xff]   ;;  %2546 = vmatprep.subr.bf16.mxu0 %v2711_v3  ;;  %2687 = vmatprep.subr.bf16.mxu1 %v2711_v3  ;;  %v2718_v10 = vld [vmem:[%s2834_s24 + $0x8] sm:$0xff]   ;;  %v2720_v12 = vld [vmem:[%s2834_s24 + $0x10] sm:$0xff]  }
  0x11   : > { %v2717_v5 = vld [vmem:[%s2834_s24 + $0x100] sm:$0xff]   ;;  %2556 = vmatprep.mubr.bf16.mxu0 %v2716_v4  ;;  %v2719_v11 = vld [vmem:[%s2834_s24 + $0x108] sm:$0xff]   ;;  %v2721_v13 = vld [vmem:[%s2834_s24 + $0x110] sm:$0xff]  }
  0x12   : > { %2620 = vmatprep.mubr.bf16.mxu1 %v2717_v5  ;;  %v2722_v14 = vld [vmem:[%s2834_s24 + $0x18] sm:$0xff]   ;;  %v2724_v16 = vld [vmem:[%s2834_s24 + $0x20] sm:$0xff]   ;;  %v2726_v18 = vld [vmem:[%s2834_s24 + $0x28] sm:$0xff]  }
  0x13   : > { %2547 = vmatpush3.bf16.msra.mxu0 %v2711_v3  ;;  %2695 = vmatpush3.bf16.msra.mxu1 %v2711_v3  ;;  %v2723_v15 = vld [vmem:[%s2834_s24 + $0x118] sm:$0xff]   ;;  %v2725_v17 = vld [vmem:[%s2834_s24 + $0x120] sm:$0xff]   ;;  %v2727_v19 = vld [vmem:[%s2834_s24 + $0x128] sm:$0xff]  }
  0x14   : > { %2548 = vmatprep.subr.bf16.mxu0 %v2712_v6  ;;  %2688 = vmatprep.subr.bf16.mxu1 %v2712_v6  ;;  %v2728_v20 = vld [vmem:[%s2834_s24 + $0x30] sm:$0xff]   ;;  %v2730_v22 = vld [vmem:[%s2834_s24 + $0x38] sm:$0xff]   ;;  %v2732_v24 = vld [vmem:[%s2834_s24 + $0x40] sm:$0xff]  }
  0x15   : > { %v2729_v21 = vld [vmem:[%s2834_s24 + $0x130] sm:$0xff]   ;;  %v2731_v23 = vld [vmem:[%s2834_s24 + $0x138] sm:$0xff]   ;;  %v2733_v25 = vld [vmem:[%s2834_s24 + $0x140] sm:$0xff]  }
  0x16   : > { %v2734_v26 = vld [vmem:[%s2834_s24 + $0x48] sm:$0xff]   ;;  %v2736_v28 = vld [vmem:[%s2834_s24 + $0x50] sm:$0xff]   ;;  %v2738_v30 = vld [vmem:[%s2834_s24 + $0x58] sm:$0xff]  }
  0x17   : > { %2549 = vmatpush3.bf16.msra.mxu0 %v2712_v6  ;;  %2696 = vmatpush3.bf16.msra.mxu1 %v2712_v6  ;;  %v2735_v27 = vld [vmem:[%s2834_s24 + $0x148] sm:$0xff]   ;;  %v2737_v29 = vld [vmem:[%s2834_s24 + $0x150] sm:$0xff]   ;;  %v2739_v31 = vld [vmem:[%s2834_s24 + $0x158] sm:$0xff]  }
  0x18   : > { %2550 = vmatprep.subr.bf16.mxu0 %v2713_v7  ;;  %2689 = vmatprep.subr.bf16.mxu1 %v2713_v7  ;;  %v2740_v32 = vld [vmem:[%s2834_s24 + $0x60] sm:$0xff]   ;;  %v2742_v34 = vld [vmem:[%s2834_s24 + $0x68] sm:$0xff]   ;;  %v2744_v36 = vld [vmem:[%s2834_s24 + $0x70] sm:$0xff]  }
  0x19   : > { %v2741_v33 = vld [vmem:[%s2834_s24 + $0x160] sm:$0xff]   ;;  %v2743_v35 = vld [vmem:[%s2834_s24 + $0x168] sm:$0xff]   ;;  %v2745_v37 = vld [vmem:[%s2834_s24 + $0x170] sm:$0xff]  }
  0x1a   : > { %v2746_v38 = vld [vmem:[%s2834_s24 + $0x78] sm:$0xff]   ;;  %v2748_v40 = vld [vmem:[%s2834_s24 + $0x80] sm:$0xff]   ;;  %v2750_v42 = vld [vmem:[%s2834_s24 + $0x88] sm:$0xff]  }
  0x1b   : > { %2551 = vmatpush3.bf16.msra.mxu0 %v2713_v7  ;;  %2697 = vmatpush3.bf16.msra.mxu1 %v2713_v7  ;;  %v2747_v39 = vld [vmem:[%s2834_s24 + $0x178] sm:$0xff]   ;;  %v2749_v41 = vld [vmem:[%s2834_s24 + $0x180] sm:$0xff]   ;;  %v2751_v43 = vld [vmem:[%s2834_s24 + $0x188] sm:$0xff]  }
  0x1c   : > { %2552 = vmatprep.subr.bf16.mxu0 %v2714_v8  ;;  %2690 = vmatprep.subr.bf16.mxu1 %v2714_v8  ;;  %v2752_v44 = vld [vmem:[%s2834_s24 + $0x90] sm:$0xff]   ;;  %v2754_v46 = vld [vmem:[%s2834_s24 + $0x98] sm:$0xff]   ;;  %v2756_v48 = vld [vmem:[%s2834_s24 + $0xa0] sm:$0xff]  }
  0x1d   : > { %v2753_v45 = vld [vmem:[%s2834_s24 + $0x190] sm:$0xff]   ;;  %v2755_v47 = vld [vmem:[%s2834_s24 + $0x198] sm:$0xff]   ;;  %v2757_v49 = vld [vmem:[%s2834_s24 + $0x1a0] sm:$0xff]  }
  0x1e   : > { %v2758_v50 = vld [vmem:[%s2834_s24 + $0xa8] sm:$0xff]   ;;  %v2760_v52 = vld [vmem:[%s2834_s24 + $0xb0] sm:$0xff]   ;;  %v2762_v54 = vld [vmem:[%s2834_s24 + $0xb8] sm:$0xff]  }
  0x1f   : > { %2553 = vmatpush3.bf16.msra.mxu0 %v2714_v8  ;;  %2698 = vmatpush3.bf16.msra.mxu1 %v2714_v8  ;;  %v2759_v51 = vld [vmem:[%s2834_s24 + $0x1a8] sm:$0xff]   ;;  %v2761_v53 = vld [vmem:[%s2834_s24 + $0x1b0] sm:$0xff]   ;;  %v2763_v55 = vld [vmem:[%s2834_s24 + $0x1b8] sm:$0xff]  }
  0x20   : > { %2554 = vmatprep.subr.bf16.mxu0 %v2715_v9  ;;  %2691 = vmatprep.subr.bf16.mxu1 %v2715_v9  ;;  %v2764_v56 = vld [vmem:[%s2834_s24 + $0xc0] sm:$0xff]   ;;  %v2766_v58 = vld [vmem:[%s2834_s24 + $0xc8] sm:$0xff]   ;;  %v2768_v60 = vld [vmem:[%s2834_s24 + $0xd0] sm:$0xff]  }
  0x21   : > { %v2765_v57 = vld [vmem:[%s2834_s24 + $0x1c0] sm:$0xff]   ;;  %v2767_v59 = vld [vmem:[%s2834_s24 + $0x1c8] sm:$0xff]   ;;  %v2769_v61 = vld [vmem:[%s2834_s24 + $0x1d0] sm:$0xff]  }
  0x22   : > { %v2770_v62 = vld [vmem:[%s2834_s24 + $0xd8] sm:$0xff]   ;;  %v2772_v0 = vld [vmem:[%s2834_s24 + $0xe0] sm:$0xff]   ;;  %v2774_v2 = vld [vmem:[%s2834_s24 + $0xe8] sm:$0xff]  }
  0x23   : > { %2555 = vmatpush3.bf16.msra.mxu0 %v2715_v9  ;;  %2699 = vmatpush3.bf16.msra.mxu1 %v2715_v9  ;;  %v2771_v63 = vld [vmem:[%s2834_s24 + $0x1d8] sm:$0xff]   ;;  %v2773_v1 = vld [vmem:[%s2834_s24 + $0x1e0] sm:$0xff]   ;;  %v2775_v3 = vld [vmem:[%s2834_s24 + $0x1e8] sm:$0xff]  }
  0x24   : > { %v2776_v4 = vld [vmem:[%s2834_s24 + $0xf0] sm:$0xff]   ;;  %v2778_v6 = vld [vmem:[%s2834_s24 + $0xf8] sm:$0xff]   ;;  %v2918_v8 = vld [vmem:[%s3321_s2] ss:$0 sm:$0xff] }
  0x25   : > { %v2777_v5 = vld [vmem:[%s2834_s24 + $0x1f0] sm:$0xff]   ;;  %v2779_v7 = vld [vmem:[%s2834_s24 + $0x1f8] sm:$0xff]  }
  0x26   : > { %2557 = vmatmul.mubr.bf16.vlgmr.msra.gmra.mrb[0].mxu0 %v2718_v10  ;;  %2621 = vmatmul.mubr.bf16.vlgmr.msra.gmra.mrb[0].mxu1 %v2719_v11 }
  0x27   : > { %2560 = vmatprep.mubr.bf16.mxu0 %v2720_v12  ;;  %2624 = vmatprep.mubr.bf16.mxu1 %v2721_v13 }
  0x2e   : > { %2561 = vmatmul.mubr.bf16.gmra.mrb[4].mxu0 %v2722_v14  ;;  %2625 = vmatmul.mubr.bf16.gmra.mrb[4].mxu1 %v2723_v15 }
  0x2f   : > { %2564 = vmatprep.mubr.bf16.mxu0 %v2724_v16  ;;  %2628 = vmatprep.mubr.bf16.mxu1 %v2725_v17 }
  0x36   : > { %2565 = vmatmul.mubr.bf16.gmra.mrb[8].mxu0 %v2726_v18  ;;  %2629 = vmatmul.mubr.bf16.gmra.mrb[8].mxu1 %v2727_v19 }
  0x37   : > { %2568 = vmatprep.mubr.bf16.mxu0 %v2728_v20  ;;  %2632 = vmatprep.mubr.bf16.mxu1 %v2729_v21 }
  0x3e   : > { %2569 = vmatmul.mubr.bf16.gmra.mrb[12].mxu0 %v2730_v22  ;;  %2633 = vmatmul.mubr.bf16.gmra.mrb[12].mxu1 %v2731_v23 }
  0x3f   : > { %2572 = vmatprep.mubr.bf16.mxu0 %v2732_v24  ;;  %2636 = vmatprep.mubr.bf16.mxu1 %v2733_v25 }
  0x46   : > { %2573 = vmatmul.mubr.bf16.gmra.mrb[16].mxu0 %v2734_v26  ;;  %2637 = vmatmul.mubr.bf16.gmra.mrb[16].mxu1 %v2735_v27 }
  0x47   : > { %2576 = vmatprep.mubr.bf16.mxu0 %v2736_v28  ;;  %2640 = vmatprep.mubr.bf16.mxu1 %v2737_v29 }
  0x4e   : > { %2577 = vmatmul.mubr.bf16.gmra.mrb[20].mxu0 %v2738_v30  ;;  %2641 = vmatmul.mubr.bf16.gmra.mrb[20].mxu1 %v2739_v31 }
  0x4f   : > { %2580 = vmatprep.mubr.bf16.mxu0 %v2740_v32  ;;  %2644 = vmatprep.mubr.bf16.mxu1 %v2741_v33 }
  0x56   : > { %2581 = vmatmul.mubr.bf16.gmra.mrb[24].mxu0 %v2742_v34  ;;  %2645 = vmatmul.mubr.bf16.gmra.mrb[24].mxu1 %v2743_v35 }
  0x57   : > { %2584 = vmatprep.mubr.bf16.mxu0 %v2744_v36  ;;  %2648 = vmatprep.mubr.bf16.mxu1 %v2745_v37 }
  0x5e   : > { %2585 = vmatmul.mubr.bf16.gmra.mrb[28].mxu0 %v2746_v38  ;;  %2649 = vmatmul.mubr.bf16.gmra.mrb[28].mxu1 %v2747_v39 }
  0x5f   : > { %2588 = vmatprep.mubr.bf16.mxu0 %v2748_v40  ;;  %2652 = vmatprep.mubr.bf16.mxu1 %v2749_v41 }
  0x66   : > { %2589 = vmatmul.mubr.bf16.gmra.mrb[32].mxu0 %v2750_v42  ;;  %2653 = vmatmul.mubr.bf16.gmra.mrb[32].mxu1 %v2751_v43 }
  0x67   : > { %2592 = vmatprep.mubr.bf16.mxu0 %v2752_v44  ;;  %2656 = vmatprep.mubr.bf16.mxu1 %v2753_v45 }
  0x6e   : > { %2593 = vmatmul.mubr.bf16.gmra.mrb[36].mxu0 %v2754_v46  ;;  %2657 = vmatmul.mubr.bf16.gmra.mrb[36].mxu1 %v2755_v47 }
  0x6f   : > { %2596 = vmatprep.mubr.bf16.mxu0 %v2756_v48  ;;  %2660 = vmatprep.mubr.bf16.mxu1 %v2757_v49 }
  0x76   : > { %2597 = vmatmul.mubr.bf16.gmra.mrb[40].mxu0 %v2758_v50  ;;  %2661 = vmatmul.mubr.bf16.gmra.mrb[40].mxu1 %v2759_v51 }
  0x77   : > { %2600 = vmatprep.mubr.bf16.mxu0 %v2760_v52  ;;  %2664 = vmatprep.mubr.bf16.mxu1 %v2761_v53 }
  0x7e   : > { %2601 = vmatmul.mubr.bf16.gmra.mrb[44].mxu0 %v2762_v54  ;;  %2665 = vmatmul.mubr.bf16.gmra.mrb[44].mxu1 %v2763_v55 }
  0x7f   : > { %2604 = vmatprep.mubr.bf16.mxu0 %v2764_v56  ;;  %2668 = vmatprep.mubr.bf16.mxu1 %v2765_v57 }
  0x86   : > { %2605 = vmatmul.mubr.bf16.gmra.mrb[48].mxu0 %v2766_v58  ;;  %2669 = vmatmul.mubr.bf16.gmra.mrb[48].mxu1 %v2767_v59 }
  0x87   : > { %2608 = vmatprep.mubr.bf16.mxu0 %v2768_v60  ;;  %2672 = vmatprep.mubr.bf16.mxu1 %v2769_v61 }
  0x8e   : > { %2609 = vmatmul.mubr.bf16.gmra.mrb[52].mxu0 %v2770_v62  ;;  %2673 = vmatmul.mubr.bf16.gmra.mrb[52].mxu1 %v2771_v63 }
  0x8f   : > { %2612 = vmatprep.mubr.bf16.mxu0 %v2772_v0  ;;  %2676 = vmatprep.mubr.bf16.mxu1 %v2773_v1 }
  0x96   : > { %2613 = vmatmul.mubr.bf16.gmra.mrb[56].mxu0 %v2774_v2  ;;  %2677 = vmatmul.mubr.bf16.gmra.mrb[56].mxu1 %v2775_v3 }
  0x97   : > { %2616 = vmatprep.mubr.bf16.mxu0 %v2776_v4  ;;  %2680 = vmatprep.mubr.bf16.mxu1 %v2777_v5 }
  0x9e   : > { %2617 = vmatmul.mubr.bf16.gmra.mrb[60].mxu0 %v2778_v6  ;;  %2681 = vmatmul.mubr.bf16.gmra.mrb[60].mxu1 %v2779_v7 }
  0xf9   : > { %v2558_v9 = vpop.f32.mrb[0].mxu0  ;;  %v2622_v10 = vpop.f32.mrb[0].mxu1 }
  0xfa   : > { %v801_v11 = vadd.f32 %v2558_v9, %v2918_v8  ;;  %v1057_v12 = vadd.f32 %v2622_v10, %v2918_v8  ;;  %v792_v13 = vpop.f32.mrb[1].mxu0  ;;  %v1048_v14 = vpop.f32.mrb[1].mxu1 }
  0xfb   : > { %v793_v15 = vadd.f32 %v2918_v8, %v792_v13  ;;  %v1049_v16 = vadd.f32 %v2918_v8, %v1048_v14  ;;  %v2559_v17 = vpop.f32.mrb[2].mxu0  ;;  %v2623_v18 = vpop.f32.mrb[2].mxu1 }
  0xfc   : > { %v1305_v19 = vmax.f32 %v801_v11, 0.0  ;;  %v1369_v20 = vmax.f32 %v1057_v12, 0.0  ;;  %v804_v21 = vadd.f32 %v2559_v17, %v2918_v8  ;;  %v1060_v22 = vadd.f32 %v2623_v18, %v2918_v8  ;;  %v795_v23 = vpop.f32.mrb[3].mxu0  ;;  %v1051_v24 = vpop.f32.mrb[3].mxu1 }
  0xfd   : > { %v1303_v25 = vmax.f32 %v793_v15, 0.0  ;;  %v1367_v26 = vmax.f32 %v1049_v16, 0.0  ;;  %v796_v27 = vadd.f32 %v2918_v8, %v795_v23  ;;  %v1052_v28 = vadd.f32 %v2918_v8, %v1051_v24 }
  0xfe   : > { %v2342_v29 = vpack.c.bf16 %v1305_v19, %v1305_v19  ;;  %v2406_v30 = vpack.c.bf16 %v1369_v20, %v1369_v20  ;;  %v1306_v31 = vmax.f32 %v804_v21, 0.0  ;;  %v1370_v32 = vmax.f32 %v1060_v22, 0.0 }
  0xff   : > { %v2340_v33 = vpack.c.bf16 %v1303_v25, %v1303_v25  ;;  %v2404_v34 = vpack.c.bf16 %v1367_v26, %v1367_v26  ;;  %v1304_v35 = vmax.f32 %v796_v27, 0.0  ;;  %v1368_v36 = vmax.f32 %v1052_v28, 0.0 }
 0x100   : > { %1946 = vst.msk [vmem:[%s2931_s13 + $0x8] sm:$0xf] %vm1943_vm0, %v2342_v29  ;;  %2010 = vst.msk [vmem:[%s2931_s13 + $0x108] sm:$0xf] %vm1943_vm0, %v2406_v30  ;;  %v2343_v37 = vpack.c.bf16 %v1306_v31, %v1306_v31  ;;  %v2407_v38 = vpack.c.bf16 %v1370_v32, %v1370_v32 }
 0x101   : > { %1944 = vst.msk [vmem:[%s2931_s13] sm:$0xf] %vm1943_vm0, %v2340_v33  ;;  %2008 = vst.msk [vmem:[%s2931_s13 + $0x100] sm:$0xf] %vm1943_vm0, %v2404_v34  ;;  %v2341_v39 = vpack.c.bf16 %v1304_v35, %v1304_v35  ;;  %v2405_v40 = vpack.c.bf16 %v1368_v36, %v1368_v36  ;;  %v2562_v41 = vpop.f32.mrb[4].mxu0  ;;  %v2626_v42 = vpop.f32.mrb[4].mxu1 }
 0x102   : > { %1947 = vst.msk [vmem:[%s2931_s13 + $0xc] sm:$0xf] %vm1943_vm0, %v2343_v37  ;;  %2011 = vst.msk [vmem:[%s2931_s13 + $0x10c] sm:$0xf] %vm1943_vm0, %v2407_v38  ;;  %v817_v43 = vadd.f32 %v2562_v41, %v2918_v8  ;;  %v1073_v44 = vadd.f32 %v2626_v42, %v2918_v8  ;;  %v808_v45 = vpop.f32.mrb[5].mxu0  ;;  %v1064_v46 = vpop.f32.mrb[5].mxu1 }
 0x103   : > { %1945 = vst.msk [vmem:[%s2931_s13 + $0x4] sm:$0xf] %vm1943_vm0, %v2341_v39  ;;  %2009 = vst.msk [vmem:[%s2931_s13 + $0x104] sm:$0xf] %vm1943_vm0, %v2405_v40  ;;  %v809_v47 = vadd.f32 %v2918_v8, %v808_v45  ;;  %v1065_v48 = vadd.f32 %v2918_v8, %v1064_v46  ;;  %v2563_v49 = vpop.f32.mrb[6].mxu0  ;;  %v2627_v50 = vpop.f32.mrb[6].mxu1 }
 0x104   : > { %v1309_v51 = vmax.f32 %v817_v43, 0.0  ;;  %v1373_v52 = vmax.f32 %v1073_v44, 0.0  ;;  %v820_v53 = vadd.f32 %v2563_v49, %v2918_v8  ;;  %v1076_v54 = vadd.f32 %v2627_v50, %v2918_v8  ;;  %v811_v55 = vpop.f32.mrb[7].mxu0  ;;  %v1067_v56 = vpop.f32.mrb[7].mxu1 }
 0x105   : > { %v1307_v57 = vmax.f32 %v809_v47, 0.0  ;;  %v1371_v58 = vmax.f32 %v1065_v48, 0.0  ;;  %v812_v59 = vadd.f32 %v2918_v8, %v811_v55  ;;  %v1068_v60 = vadd.f32 %v2918_v8, %v1067_v56 }
 0x106   : > { %v2346_v61 = vpack.c.bf16 %v1309_v51, %v1309_v51  ;;  %v2410_v62 = vpack.c.bf16 %v1373_v52, %v1373_v52  ;;  %v1310_v63 = vmax.f32 %v820_v53, 0.0  ;;  %v1374_v0 = vmax.f32 %v1076_v54, 0.0 }
 0x107   : > { %v2344_v1 = vpack.c.bf16 %v1307_v57, %v1307_v57  ;;  %v2408_v2 = vpack.c.bf16 %v1371_v58, %v1371_v58  ;;  %v1308_v3 = vmax.f32 %v812_v59, 0.0  ;;  %v1372_v4 = vmax.f32 %v1068_v60, 0.0 }
 0x108   : > { %1950 = vst.msk [vmem:[%s2931_s13 + $0x18] sm:$0xf] %vm1943_vm0, %v2346_v61  ;;  %2014 = vst.msk [vmem:[%s2931_s13 + $0x118] sm:$0xf] %vm1943_vm0, %v2410_v62  ;;  %v2347_v5 = vpack.c.bf16 %v1310_v63, %v1310_v63  ;;  %v2411_v6 = vpack.c.bf16 %v1374_v0, %v1374_v0 }
 0x109   : > { %1948 = vst.msk [vmem:[%s2931_s13 + $0x10] sm:$0xf] %vm1943_vm0, %v2344_v1  ;;  %2012 = vst.msk [vmem:[%s2931_s13 + $0x110] sm:$0xf] %vm1943_vm0, %v2408_v2  ;;  %v2345_v7 = vpack.c.bf16 %v1308_v3, %v1308_v3  ;;  %v2409_v9 = vpack.c.bf16 %v1372_v4, %v1372_v4  ;;  %v2566_v10 = vpop.f32.mrb[8].mxu0  ;;  %v2630_v11 = vpop.f32.mrb[8].mxu1 }
 0x10a   : > { %1951 = vst.msk [vmem:[%s2931_s13 + $0x1c] sm:$0xf] %vm1943_vm0, %v2347_v5  ;;  %2015 = vst.msk [vmem:[%s2931_s13 + $0x11c] sm:$0xf] %vm1943_vm0, %v2411_v6  ;;  %v833_v12 = vadd.f32 %v2566_v10, %v2918_v8  ;;  %v1089_v13 = vadd.f32 %v2630_v11, %v2918_v8  ;;  %v824_v14 = vpop.f32.mrb[9].mxu0  ;;  %v1080_v15 = vpop.f32.mrb[9].mxu1 }
 0x10b   : > { %1949 = vst.msk [vmem:[%s2931_s13 + $0x14] sm:$0xf] %vm1943_vm0, %v2345_v7  ;;  %2013 = vst.msk [vmem:[%s2931_s13 + $0x114] sm:$0xf] %vm1943_vm0, %v2409_v9  ;;  %v825_v16 = vadd.f32 %v2918_v8, %v824_v14  ;;  %v1081_v17 = vadd.f32 %v2918_v8, %v1080_v15  ;;  %v2567_v18 = vpop.f32.mrb[10].mxu0  ;;  %v2631_v19 = vpop.f32.mrb[10].mxu1 }
 0x10c   : > { %v1313_v20 = vmax.f32 %v833_v12, 0.0  ;;  %v1377_v21 = vmax.f32 %v1089_v13, 0.0  ;;  %v836_v22 = vadd.f32 %v2567_v18, %v2918_v8  ;;  %v1092_v23 = vadd.f32 %v2631_v19, %v2918_v8  ;;  %v827_v24 = vpop.f32.mrb[11].mxu0  ;;  %v1083_v25 = vpop.f32.mrb[11].mxu1 }
 0x10d   : > { %v1311_v26 = vmax.f32 %v825_v16, 0.0  ;;  %v1375_v27 = vmax.f32 %v1081_v17, 0.0  ;;  %v828_v28 = vadd.f32 %v2918_v8, %v827_v24  ;;  %v1084_v29 = vadd.f32 %v2918_v8, %v1083_v25 }
 0x10e   : > { %v2350_v30 = vpack.c.bf16 %v1313_v20, %v1313_v20  ;;  %v2414_v31 = vpack.c.bf16 %v1377_v21, %v1377_v21  ;;  %v1314_v32 = vmax.f32 %v836_v22, 0.0  ;;  %v1378_v33 = vmax.f32 %v1092_v23, 0.0 }
 0x10f   : > { %v2348_v34 = vpack.c.bf16 %v1311_v26, %v1311_v26  ;;  %v2412_v35 = vpack.c.bf16 %v1375_v27, %v1375_v27  ;;  %v1312_v36 = vmax.f32 %v828_v28, 0.0  ;;  %v1376_v37 = vmax.f32 %v1084_v29, 0.0 }
 0x110   : > { %1954 = vst.msk [vmem:[%s2931_s13 + $0x28] sm:$0xf] %vm1943_vm0, %v2350_v30  ;;  %2018 = vst.msk [vmem:[%s2931_s13 + $0x128] sm:$0xf] %vm1943_vm0, %v2414_v31  ;;  %v2351_v38 = vpack.c.bf16 %v1314_v32, %v1314_v32  ;;  %v2415_v39 = vpack.c.bf16 %v1378_v33, %v1378_v33 }
 0x111   : > { %1952 = vst.msk [vmem:[%s2931_s13 + $0x20] sm:$0xf] %vm1943_vm0, %v2348_v34  ;;  %2016 = vst.msk [vmem:[%s2931_s13 + $0x120] sm:$0xf] %vm1943_vm0, %v2412_v35  ;;  %v2349_v40 = vpack.c.bf16 %v1312_v36, %v1312_v36  ;;  %v2413_v41 = vpack.c.bf16 %v1376_v37, %v1376_v37  ;;  %v2570_v42 = vpop.f32.mrb[12].mxu0  ;;  %v2634_v43 = vpop.f32.mrb[12].mxu1 }
 0x112   : > { %1955 = vst.msk [vmem:[%s2931_s13 + $0x2c] sm:$0xf] %vm1943_vm0, %v2351_v38  ;;  %2019 = vst.msk [vmem:[%s2931_s13 + $0x12c] sm:$0xf] %vm1943_vm0, %v2415_v39  ;;  %v849_v44 = vadd.f32 %v2570_v42, %v2918_v8  ;;  %v1105_v45 = vadd.f32 %v2634_v43, %v2918_v8  ;;  %v840_v46 = vpop.f32.mrb[13].mxu0  ;;  %v1096_v47 = vpop.f32.mrb[13].mxu1 }
 0x113   : > { %1953 = vst.msk [vmem:[%s2931_s13 + $0x24] sm:$0xf] %vm1943_vm0, %v2349_v40  ;;  %2017 = vst.msk [vmem:[%s2931_s13 + $0x124] sm:$0xf] %vm1943_vm0, %v2413_v41  ;;  %v841_v48 = vadd.f32 %v2918_v8, %v840_v46  ;;  %v1097_v49 = vadd.f32 %v2918_v8, %v1096_v47  ;;  %v2571_v50 = vpop.f32.mrb[14].mxu0  ;;  %v2635_v51 = vpop.f32.mrb[14].mxu1 }
 0x114   : > { %v1317_v52 = vmax.f32 %v849_v44, 0.0  ;;  %v1381_v53 = vmax.f32 %v1105_v45, 0.0  ;;  %v852_v54 = vadd.f32 %v2571_v50, %v2918_v8  ;;  %v1108_v55 = vadd.f32 %v2635_v51, %v2918_v8  ;;  %v843_v56 = vpop.f32.mrb[15].mxu0  ;;  %v1099_v57 = vpop.f32.mrb[15].mxu1 }
 0x115   : > { %v1315_v58 = vmax.f32 %v841_v48, 0.0  ;;  %v1379_v59 = vmax.f32 %v1097_v49, 0.0  ;;  %v844_v60 = vadd.f32 %v2918_v8, %v843_v56  ;;  %v1100_v61 = vadd.f32 %v2918_v8, %v1099_v57 }
 0x116   : > { %v2354_v62 = vpack.c.bf16 %v1317_v52, %v1317_v52  ;;  %v2418_v63 = vpack.c.bf16 %v1381_v53, %v1381_v53  ;;  %v1318_v0 = vmax.f32 %v852_v54, 0.0  ;;  %v1382_v1 = vmax.f32 %v1108_v55, 0.0 }
 0x117   : > { %v2352_v2 = vpack.c.bf16 %v1315_v58, %v1315_v58  ;;  %v2416_v3 = vpack.c.bf16 %v1379_v59, %v1379_v59  ;;  %v1316_v4 = vmax.f32 %v844_v60, 0.0  ;;  %v1380_v5 = vmax.f32 %v1100_v61, 0.0 }
 0x118   : > { %1958 = vst.msk [vmem:[%s2931_s13 + $0x38] sm:$0xf] %vm1943_vm0, %v2354_v62  ;;  %2022 = vst.msk [vmem:[%s2931_s13 + $0x138] sm:$0xf] %vm1943_vm0, %v2418_v63  ;;  %v2355_v6 = vpack.c.bf16 %v1318_v0, %v1318_v0  ;;  %v2419_v7 = vpack.c.bf16 %v1382_v1, %v1382_v1 }
 0x119   : > { %1956 = vst.msk [vmem:[%s2931_s13 + $0x30] sm:$0xf] %vm1943_vm0, %v2352_v2  ;;  %2020 = vst.msk [vmem:[%s2931_s13 + $0x130] sm:$0xf] %vm1943_vm0, %v2416_v3  ;;  %v2353_v9 = vpack.c.bf16 %v1316_v4, %v1316_v4  ;;  %v2417_v10 = vpack.c.bf16 %v1380_v5, %v1380_v5  ;;  %v2574_v11 = vpop.f32.mrb[16].mxu0  ;;  %v2638_v12 = vpop.f32.mrb[16].mxu1 }
 0x11a   : > { %1959 = vst.msk [vmem:[%s2931_s13 + $0x3c] sm:$0xf] %vm1943_vm0, %v2355_v6  ;;  %2023 = vst.msk [vmem:[%s2931_s13 + $0x13c] sm:$0xf] %vm1943_vm0, %v2419_v7  ;;  %v865_v13 = vadd.f32 %v2574_v11, %v2918_v8  ;;  %v1121_v14 = vadd.f32 %v2638_v12, %v2918_v8  ;;  %v856_v15 = vpop.f32.mrb[17].mxu0  ;;  %v1112_v16 = vpop.f32.mrb[17].mxu1 }
 0x11b   : > { %1957 = vst.msk [vmem:[%s2931_s13 + $0x34] sm:$0xf] %vm1943_vm0, %v2353_v9  ;;  %2021 = vst.msk [vmem:[%s2931_s13 + $0x134] sm:$0xf] %vm1943_vm0, %v2417_v10  ;;  %v857_v17 = vadd.f32 %v2918_v8, %v856_v15  ;;  %v1113_v18 = vadd.f32 %v2918_v8, %v1112_v16  ;;  %v2575_v19 = vpop.f32.mrb[18].mxu0  ;;  %v2639_v20 = vpop.f32.mrb[18].mxu1 }
 0x11c   : > { %v1321_v21 = vmax.f32 %v865_v13, 0.0  ;;  %v1385_v22 = vmax.f32 %v1121_v14, 0.0  ;;  %v868_v23 = vadd.f32 %v2575_v19, %v2918_v8  ;;  %v1124_v24 = vadd.f32 %v2639_v20, %v2918_v8  ;;  %v859_v25 = vpop.f32.mrb[19].mxu0  ;;  %v1115_v26 = vpop.f32.mrb[19].mxu1 }
 0x11d   : > { %v1319_v27 = vmax.f32 %v857_v17, 0.0  ;;  %v1383_v28 = vmax.f32 %v1113_v18, 0.0  ;;  %v860_v29 = vadd.f32 %v2918_v8, %v859_v25  ;;  %v1116_v30 = vadd.f32 %v2918_v8, %v1115_v26 }
 0x11e   : > { %v2358_v31 = vpack.c.bf16 %v1321_v21, %v1321_v21  ;;  %v2422_v32 = vpack.c.bf16 %v1385_v22, %v1385_v22  ;;  %v1322_v33 = vmax.f32 %v868_v23, 0.0  ;;  %v1386_v34 = vmax.f32 %v1124_v24, 0.0 }
 0x11f   : > { %v2356_v35 = vpack.c.bf16 %v1319_v27, %v1319_v27  ;;  %v2420_v36 = vpack.c.bf16 %v1383_v28, %v1383_v28  ;;  %v1320_v37 = vmax.f32 %v860_v29, 0.0  ;;  %v1384_v38 = vmax.f32 %v1116_v30, 0.0 }
 0x120   : > { %1962 = vst.msk [vmem:[%s2931_s13 + $0x48] sm:$0xf] %vm1943_vm0, %v2358_v31  ;;  %2026 = vst.msk [vmem:[%s2931_s13 + $0x148] sm:$0xf] %vm1943_vm0, %v2422_v32  ;;  %v2359_v39 = vpack.c.bf16 %v1322_v33, %v1322_v33  ;;  %v2423_v40 = vpack.c.bf16 %v1386_v34, %v1386_v34 }
 0x121   : > { %1960 = vst.msk [vmem:[%s2931_s13 + $0x40] sm:$0xf] %vm1943_vm0, %v2356_v35  ;;  %2024 = vst.msk [vmem:[%s2931_s13 + $0x140] sm:$0xf] %vm1943_vm0, %v2420_v36  ;;  %v2357_v41 = vpack.c.bf16 %v1320_v37, %v1320_v37  ;;  %v2421_v42 = vpack.c.bf16 %v1384_v38, %v1384_v38  ;;  %v2578_v43 = vpop.f32.mrb[20].mxu0  ;;  %v2642_v44 = vpop.f32.mrb[20].mxu1 }
 0x122   : > { %1963 = vst.msk [vmem:[%s2931_s13 + $0x4c] sm:$0xf] %vm1943_vm0, %v2359_v39  ;;  %2027 = vst.msk [vmem:[%s2931_s13 + $0x14c] sm:$0xf] %vm1943_vm0, %v2423_v40  ;;  %v881_v45 = vadd.f32 %v2578_v43, %v2918_v8  ;;  %v1137_v46 = vadd.f32 %v2642_v44, %v2918_v8  ;;  %v872_v47 = vpop.f32.mrb[21].mxu0  ;;  %v1128_v48 = vpop.f32.mrb[21].mxu1 }
 0x123   : > { %1961 = vst.msk [vmem:[%s2931_s13 + $0x44] sm:$0xf] %vm1943_vm0, %v2357_v41  ;;  %2025 = vst.msk [vmem:[%s2931_s13 + $0x144] sm:$0xf] %vm1943_vm0, %v2421_v42  ;;  %v873_v49 = vadd.f32 %v2918_v8, %v872_v47  ;;  %v1129_v50 = vadd.f32 %v2918_v8, %v1128_v48  ;;  %v2579_v51 = vpop.f32.mrb[22].mxu0  ;;  %v2643_v52 = vpop.f32.mrb[22].mxu1 }
 0x124   : > { %v1325_v53 = vmax.f32 %v881_v45, 0.0  ;;  %v1389_v54 = vmax.f32 %v1137_v46, 0.0  ;;  %v884_v55 = vadd.f32 %v2579_v51, %v2918_v8  ;;  %v1140_v56 = vadd.f32 %v2643_v52, %v2918_v8  ;;  %v875_v57 = vpop.f32.mrb[23].mxu0  ;;  %v1131_v58 = vpop.f32.mrb[23].mxu1 }
 0x125   : > { %v1323_v59 = vmax.f32 %v873_v49, 0.0  ;;  %v1387_v60 = vmax.f32 %v1129_v50, 0.0  ;;  %v876_v61 = vadd.f32 %v2918_v8, %v875_v57  ;;  %v1132_v62 = vadd.f32 %v2918_v8, %v1131_v58 }
 0x126   : > { %v2362_v63 = vpack.c.bf16 %v1325_v53, %v1325_v53  ;;  %v2426_v0 = vpack.c.bf16 %v1389_v54, %v1389_v54  ;;  %v1326_v1 = vmax.f32 %v884_v55, 0.0  ;;  %v1390_v2 = vmax.f32 %v1140_v56, 0.0 }
 0x127   : > { %v2360_v3 = vpack.c.bf16 %v1323_v59, %v1323_v59  ;;  %v2424_v4 = vpack.c.bf16 %v1387_v60, %v1387_v60  ;;  %v1324_v5 = vmax.f32 %v876_v61, 0.0  ;;  %v1388_v6 = vmax.f32 %v1132_v62, 0.0 }
 0x128   : > { %1966 = vst.msk [vmem:[%s2931_s13 + $0x58] sm:$0xf] %vm1943_vm0, %v2362_v63  ;;  %2030 = vst.msk [vmem:[%s2931_s13 + $0x158] sm:$0xf] %vm1943_vm0, %v2426_v0  ;;  %v2363_v7 = vpack.c.bf16 %v1326_v1, %v1326_v1  ;;  %v2427_v9 = vpack.c.bf16 %v1390_v2, %v1390_v2 }
 0x129   : > { %1964 = vst.msk [vmem:[%s2931_s13 + $0x50] sm:$0xf] %vm1943_vm0, %v2360_v3  ;;  %2028 = vst.msk [vmem:[%s2931_s13 + $0x150] sm:$0xf] %vm1943_vm0, %v2424_v4  ;;  %v2361_v10 = vpack.c.bf16 %v1324_v5, %v1324_v5  ;;  %v2425_v11 = vpack.c.bf16 %v1388_v6, %v1388_v6  ;;  %v2582_v12 = vpop.f32.mrb[24].mxu0  ;;  %v2646_v13 = vpop.f32.mrb[24].mxu1 }
 0x12a   : > { %1967 = vst.msk [vmem:[%s2931_s13 + $0x5c] sm:$0xf] %vm1943_vm0, %v2363_v7  ;;  %2031 = vst.msk [vmem:[%s2931_s13 + $0x15c] sm:$0xf] %vm1943_vm0, %v2427_v9  ;;  %v897_v14 = vadd.f32 %v2582_v12, %v2918_v8  ;;  %v1153_v15 = vadd.f32 %v2646_v13, %v2918_v8  ;;  %v888_v16 = vpop.f32.mrb[25].mxu0  ;;  %v1144_v17 = vpop.f32.mrb[25].mxu1 }
 0x12b   : > { %1965 = vst.msk [vmem:[%s2931_s13 + $0x54] sm:$0xf] %vm1943_vm0, %v2361_v10  ;;  %2029 = vst.msk [vmem:[%s2931_s13 + $0x154] sm:$0xf] %vm1943_vm0, %v2425_v11  ;;  %v889_v18 = vadd.f32 %v2918_v8, %v888_v16  ;;  %v1145_v19 = vadd.f32 %v2918_v8, %v1144_v17  ;;  %v2583_v20 = vpop.f32.mrb[26].mxu0  ;;  %v2647_v21 = vpop.f32.mrb[26].mxu1 }
 0x12c   : > { %v1329_v22 = vmax.f32 %v897_v14, 0.0  ;;  %v1393_v23 = vmax.f32 %v1153_v15, 0.0  ;;  %v900_v24 = vadd.f32 %v2583_v20, %v2918_v8  ;;  %v1156_v25 = vadd.f32 %v2647_v21, %v2918_v8  ;;  %v891_v26 = vpop.f32.mrb[27].mxu0  ;;  %v1147_v27 = vpop.f32.mrb[27].mxu1 }
 0x12d   : > { %v1327_v28 = vmax.f32 %v889_v18, 0.0  ;;  %v1391_v29 = vmax.f32 %v1145_v19, 0.0  ;;  %v892_v30 = vadd.f32 %v2918_v8, %v891_v26  ;;  %v1148_v31 = vadd.f32 %v2918_v8, %v1147_v27 }
 0x12e   : > { %v2366_v32 = vpack.c.bf16 %v1329_v22, %v1329_v22  ;;  %v2430_v33 = vpack.c.bf16 %v1393_v23, %v1393_v23  ;;  %v1330_v34 = vmax.f32 %v900_v24, 0.0  ;;  %v1394_v35 = vmax.f32 %v1156_v25, 0.0 }
 0x12f   : > { %v2364_v36 = vpack.c.bf16 %v1327_v28, %v1327_v28  ;;  %v2428_v37 = vpack.c.bf16 %v1391_v29, %v1391_v29  ;;  %v1328_v38 = vmax.f32 %v892_v30, 0.0  ;;  %v1392_v39 = vmax.f32 %v1148_v31, 0.0 }
 0x130   : > { %1970 = vst.msk [vmem:[%s2931_s13 + $0x68] sm:$0xf] %vm1943_vm0, %v2366_v32  ;;  %2034 = vst.msk [vmem:[%s2931_s13 + $0x168] sm:$0xf] %vm1943_vm0, %v2430_v33  ;;  %v2367_v40 = vpack.c.bf16 %v1330_v34, %v1330_v34  ;;  %v2431_v41 = vpack.c.bf16 %v1394_v35, %v1394_v35 }
 0x131   : > { %1968 = vst.msk [vmem:[%s2931_s13 + $0x60] sm:$0xf] %vm1943_vm0, %v2364_v36  ;;  %2032 = vst.msk [vmem:[%s2931_s13 + $0x160] sm:$0xf] %vm1943_vm0, %v2428_v37  ;;  %v2365_v42 = vpack.c.bf16 %v1328_v38, %v1328_v38  ;;  %v2429_v43 = vpack.c.bf16 %v1392_v39, %v1392_v39  ;;  %v2586_v44 = vpop.f32.mrb[28].mxu0  ;;  %v2650_v45 = vpop.f32.mrb[28].mxu1 }
 0x132   : > { %1971 = vst.msk [vmem:[%s2931_s13 + $0x6c] sm:$0xf] %vm1943_vm0, %v2367_v40  ;;  %2035 = vst.msk [vmem:[%s2931_s13 + $0x16c] sm:$0xf] %vm1943_vm0, %v2431_v41  ;;  %v913_v46 = vadd.f32 %v2586_v44, %v2918_v8  ;;  %v1169_v47 = vadd.f32 %v2650_v45, %v2918_v8  ;;  %v904_v48 = vpop.f32.mrb[29].mxu0  ;;  %v1160_v49 = vpop.f32.mrb[29].mxu1 }
 0x133   : > { %1969 = vst.msk [vmem:[%s2931_s13 + $0x64] sm:$0xf] %vm1943_vm0, %v2365_v42  ;;  %2033 = vst.msk [vmem:[%s2931_s13 + $0x164] sm:$0xf] %vm1943_vm0, %v2429_v43  ;;  %v905_v50 = vadd.f32 %v2918_v8, %v904_v48  ;;  %v1161_v51 = vadd.f32 %v2918_v8, %v1160_v49  ;;  %v2587_v52 = vpop.f32.mrb[30].mxu0  ;;  %v2651_v53 = vpop.f32.mrb[30].mxu1 }
 0x134   : > { %v1333_v54 = vmax.f32 %v913_v46, 0.0  ;;  %v1397_v55 = vmax.f32 %v1169_v47, 0.0  ;;  %v916_v56 = vadd.f32 %v2587_v52, %v2918_v8  ;;  %v1172_v57 = vadd.f32 %v2651_v53, %v2918_v8  ;;  %v907_v58 = vpop.f32.mrb[31].mxu0  ;;  %v1163_v59 = vpop.f32.mrb[31].mxu1 }
 0x135   : > { %v1331_v60 = vmax.f32 %v905_v50, 0.0  ;;  %v1395_v61 = vmax.f32 %v1161_v51, 0.0  ;;  %v908_v62 = vadd.f32 %v2918_v8, %v907_v58  ;;  %v1164_v63 = vadd.f32 %v2918_v8, %v1163_v59 }
 0x136   : > { %v2370_v0 = vpack.c.bf16 %v1333_v54, %v1333_v54  ;;  %v2434_v1 = vpack.c.bf16 %v1397_v55, %v1397_v55  ;;  %v1334_v2 = vmax.f32 %v916_v56, 0.0  ;;  %v1398_v3 = vmax.f32 %v1172_v57, 0.0 }
 0x137   : > { %v2368_v4 = vpack.c.bf16 %v1331_v60, %v1331_v60  ;;  %v2432_v5 = vpack.c.bf16 %v1395_v61, %v1395_v61  ;;  %v1332_v6 = vmax.f32 %v908_v62, 0.0  ;;  %v1396_v7 = vmax.f32 %v1164_v63, 0.0 }
 0x138   : > { %1974 = vst.msk [vmem:[%s2931_s13 + $0x78] sm:$0xf] %vm1943_vm0, %v2370_v0  ;;  %2038 = vst.msk [vmem:[%s2931_s13 + $0x178] sm:$0xf] %vm1943_vm0, %v2434_v1  ;;  %v2371_v9 = vpack.c.bf16 %v1334_v2, %v1334_v2  ;;  %v2435_v10 = vpack.c.bf16 %v1398_v3, %v1398_v3 }
 0x139   : > { %1972 = vst.msk [vmem:[%s2931_s13 + $0x70] sm:$0xf] %vm1943_vm0, %v2368_v4  ;;  %2036 = vst.msk [vmem:[%s2931_s13 + $0x170] sm:$0xf] %vm1943_vm0, %v2432_v5  ;;  %v2369_v11 = vpack.c.bf16 %v1332_v6, %v1332_v6  ;;  %v2433_v12 = vpack.c.bf16 %v1396_v7, %v1396_v7  ;;  %v2590_v13 = vpop.f32.mrb[32].mxu0  ;;  %v2654_v14 = vpop.f32.mrb[32].mxu1 }
 0x13a   : > { %1975 = vst.msk [vmem:[%s2931_s13 + $0x7c] sm:$0xf] %vm1943_vm0, %v2371_v9  ;;  %2039 = vst.msk [vmem:[%s2931_s13 + $0x17c] sm:$0xf] %vm1943_vm0, %v2435_v10  ;;  %v929_v15 = vadd.f32 %v2590_v13, %v2918_v8  ;;  %v1185_v16 = vadd.f32 %v2654_v14, %v2918_v8  ;;  %v920_v17 = vpop.f32.mrb[33].mxu0  ;;  %v1176_v18 = vpop.f32.mrb[33].mxu1 }
 0x13b   : > { %1973 = vst.msk [vmem:[%s2931_s13 + $0x74] sm:$0xf] %vm1943_vm0, %v2369_v11  ;;  %2037 = vst.msk [vmem:[%s2931_s13 + $0x174] sm:$0xf] %vm1943_vm0, %v2433_v12  ;;  %v921_v19 = vadd.f32 %v2918_v8, %v920_v17  ;;  %v1177_v20 = vadd.f32 %v2918_v8, %v1176_v18  ;;  %v2591_v21 = vpop.f32.mrb[34].mxu0  ;;  %v2655_v22 = vpop.f32.mrb[34].mxu1 }
 0x13c   : > { %v1337_v23 = vmax.f32 %v929_v15, 0.0  ;;  %v1401_v24 = vmax.f32 %v1185_v16, 0.0  ;;  %v932_v25 = vadd.f32 %v2591_v21, %v2918_v8  ;;  %v1188_v26 = vadd.f32 %v2655_v22, %v2918_v8  ;;  %v923_v27 = vpop.f32.mrb[35].mxu0  ;;  %v1179_v28 = vpop.f32.mrb[35].mxu1 }
 0x13d   : > { %v1335_v29 = vmax.f32 %v921_v19, 0.0  ;;  %v1399_v30 = vmax.f32 %v1177_v20, 0.0  ;;  %v924_v31 = vadd.f32 %v2918_v8, %v923_v27  ;;  %v1180_v32 = vadd.f32 %v2918_v8, %v1179_v28 }
 0x13e   : > { %v2374_v33 = vpack.c.bf16 %v1337_v23, %v1337_v23  ;;  %v2438_v34 = vpack.c.bf16 %v1401_v24, %v1401_v24  ;;  %v1338_v35 = vmax.f32 %v932_v25, 0.0  ;;  %v1402_v36 = vmax.f32 %v1188_v26, 0.0 }
 0x13f   : > { %v2372_v37 = vpack.c.bf16 %v1335_v29, %v1335_v29  ;;  %v2436_v38 = vpack.c.bf16 %v1399_v30, %v1399_v30  ;;  %v1336_v39 = vmax.f32 %v924_v31, 0.0  ;;  %v1400_v40 = vmax.f32 %v1180_v32, 0.0 }
 0x140   : > { %1978 = vst.msk [vmem:[%s2931_s13 + $0x88] sm:$0xf] %vm1943_vm0, %v2374_v33  ;;  %2042 = vst.msk [vmem:[%s2931_s13 + $0x188] sm:$0xf] %vm1943_vm0, %v2438_v34  ;;  %v2375_v41 = vpack.c.bf16 %v1338_v35, %v1338_v35  ;;  %v2439_v42 = vpack.c.bf16 %v1402_v36, %v1402_v36 }
 0x141   : > { %1976 = vst.msk [vmem:[%s2931_s13 + $0x80] sm:$0xf] %vm1943_vm0, %v2372_v37  ;;  %2040 = vst.msk [vmem:[%s2931_s13 + $0x180] sm:$0xf] %vm1943_vm0, %v2436_v38  ;;  %v2373_v43 = vpack.c.bf16 %v1336_v39, %v1336_v39  ;;  %v2437_v44 = vpack.c.bf16 %v1400_v40, %v1400_v40  ;;  %v2594_v45 = vpop.f32.mrb[36].mxu0  ;;  %v2658_v46 = vpop.f32.mrb[36].mxu1 }
 0x142   : > { %1979 = vst.msk [vmem:[%s2931_s13 + $0x8c] sm:$0xf] %vm1943_vm0, %v2375_v41  ;;  %2043 = vst.msk [vmem:[%s2931_s13 + $0x18c] sm:$0xf] %vm1943_vm0, %v2439_v42  ;;  %v945_v47 = vadd.f32 %v2594_v45, %v2918_v8  ;;  %v1201_v48 = vadd.f32 %v2658_v46, %v2918_v8  ;;  %v936_v49 = vpop.f32.mrb[37].mxu0  ;;  %v1192_v50 = vpop.f32.mrb[37].mxu1 }
 0x143   : > { %1977 = vst.msk [vmem:[%s2931_s13 + $0x84] sm:$0xf] %vm1943_vm0, %v2373_v43  ;;  %2041 = vst.msk [vmem:[%s2931_s13 + $0x184] sm:$0xf] %vm1943_vm0, %v2437_v44  ;;  %v937_v51 = vadd.f32 %v2918_v8, %v936_v49  ;;  %v1193_v52 = vadd.f32 %v2918_v8, %v1192_v50  ;;  %v2595_v53 = vpop.f32.mrb[38].mxu0  ;;  %v2659_v54 = vpop.f32.mrb[38].mxu1 }
 0x144   : > { %v1341_v55 = vmax.f32 %v945_v47, 0.0  ;;  %v1405_v56 = vmax.f32 %v1201_v48, 0.0  ;;  %v948_v57 = vadd.f32 %v2595_v53, %v2918_v8  ;;  %v1204_v58 = vadd.f32 %v2659_v54, %v2918_v8  ;;  %v939_v59 = vpop.f32.mrb[39].mxu0  ;;  %v1195_v60 = vpop.f32.mrb[39].mxu1 }
 0x145   : > { %v1339_v61 = vmax.f32 %v937_v51, 0.0  ;;  %v1403_v62 = vmax.f32 %v1193_v52, 0.0  ;;  %v940_v63 = vadd.f32 %v2918_v8, %v939_v59  ;;  %v1196_v0 = vadd.f32 %v2918_v8, %v1195_v60 }
 0x146   : > { %v2378_v1 = vpack.c.bf16 %v1341_v55, %v1341_v55  ;;  %v2442_v2 = vpack.c.bf16 %v1405_v56, %v1405_v56  ;;  %v1342_v3 = vmax.f32 %v948_v57, 0.0  ;;  %v1406_v4 = vmax.f32 %v1204_v58, 0.0 }
 0x147   : > { %v2376_v5 = vpack.c.bf16 %v1339_v61, %v1339_v61  ;;  %v2440_v6 = vpack.c.bf16 %v1403_v62, %v1403_v62  ;;  %v1340_v7 = vmax.f32 %v940_v63, 0.0  ;;  %v1404_v9 = vmax.f32 %v1196_v0, 0.0 }
 0x148   : > { %1982 = vst.msk [vmem:[%s2931_s13 + $0x98] sm:$0xf] %vm1943_vm0, %v2378_v1  ;;  %2046 = vst.msk [vmem:[%s2931_s13 + $0x198] sm:$0xf] %vm1943_vm0, %v2442_v2  ;;  %v2379_v10 = vpack.c.bf16 %v1342_v3, %v1342_v3  ;;  %v2443_v11 = vpack.c.bf16 %v1406_v4, %v1406_v4 }
 0x149   : > { %1980 = vst.msk [vmem:[%s2931_s13 + $0x90] sm:$0xf] %vm1943_vm0, %v2376_v5  ;;  %2044 = vst.msk [vmem:[%s2931_s13 + $0x190] sm:$0xf] %vm1943_vm0, %v2440_v6  ;;  %v2377_v12 = vpack.c.bf16 %v1340_v7, %v1340_v7  ;;  %v2441_v13 = vpack.c.bf16 %v1404_v9, %v1404_v9  ;;  %v2598_v14 = vpop.f32.mrb[40].mxu0  ;;  %v2662_v15 = vpop.f32.mrb[40].mxu1 }
 0x14a   : > { %1983 = vst.msk [vmem:[%s2931_s13 + $0x9c] sm:$0xf] %vm1943_vm0, %v2379_v10  ;;  %2047 = vst.msk [vmem:[%s2931_s13 + $0x19c] sm:$0xf] %vm1943_vm0, %v2443_v11  ;;  %v961_v16 = vadd.f32 %v2598_v14, %v2918_v8  ;;  %v1217_v17 = vadd.f32 %v2662_v15, %v2918_v8  ;;  %v952_v18 = vpop.f32.mrb[41].mxu0  ;;  %v1208_v19 = vpop.f32.mrb[41].mxu1 }
 0x14b   : > { %1981 = vst.msk [vmem:[%s2931_s13 + $0x94] sm:$0xf] %vm1943_vm0, %v2377_v12  ;;  %2045 = vst.msk [vmem:[%s2931_s13 + $0x194] sm:$0xf] %vm1943_vm0, %v2441_v13  ;;  %v953_v20 = vadd.f32 %v2918_v8, %v952_v18  ;;  %v1209_v21 = vadd.f32 %v2918_v8, %v1208_v19  ;;  %v2599_v22 = vpop.f32.mrb[42].mxu0  ;;  %v2663_v23 = vpop.f32.mrb[42].mxu1 }
 0x14c   : > { %v1345_v24 = vmax.f32 %v961_v16, 0.0  ;;  %v1409_v25 = vmax.f32 %v1217_v17, 0.0  ;;  %v964_v26 = vadd.f32 %v2599_v22, %v2918_v8  ;;  %v1220_v27 = vadd.f32 %v2663_v23, %v2918_v8  ;;  %v955_v28 = vpop.f32.mrb[43].mxu0  ;;  %v1211_v29 = vpop.f32.mrb[43].mxu1 }
 0x14d   : > { %v1343_v30 = vmax.f32 %v953_v20, 0.0  ;;  %v1407_v31 = vmax.f32 %v1209_v21, 0.0  ;;  %v956_v32 = vadd.f32 %v2918_v8, %v955_v28  ;;  %v1212_v33 = vadd.f32 %v2918_v8, %v1211_v29 }
 0x14e   : > { %v2382_v34 = vpack.c.bf16 %v1345_v24, %v1345_v24  ;;  %v2446_v35 = vpack.c.bf16 %v1409_v25, %v1409_v25  ;;  %v1346_v36 = vmax.f32 %v964_v26, 0.0  ;;  %v1410_v37 = vmax.f32 %v1220_v27, 0.0 }
 0x14f   : > { %v2380_v38 = vpack.c.bf16 %v1343_v30, %v1343_v30  ;;  %v2444_v39 = vpack.c.bf16 %v1407_v31, %v1407_v31  ;;  %v1344_v40 = vmax.f32 %v956_v32, 0.0  ;;  %v1408_v41 = vmax.f32 %v1212_v33, 0.0 }
 0x150   : > { %1986 = vst.msk [vmem:[%s2931_s13 + $0xa8] sm:$0xf] %vm1943_vm0, %v2382_v34  ;;  %2050 = vst.msk [vmem:[%s2931_s13 + $0x1a8] sm:$0xf] %vm1943_vm0, %v2446_v35  ;;  %v2383_v42 = vpack.c.bf16 %v1346_v36, %v1346_v36  ;;  %v2447_v43 = vpack.c.bf16 %v1410_v37, %v1410_v37 }
 0x151   : > { %1984 = vst.msk [vmem:[%s2931_s13 + $0xa0] sm:$0xf] %vm1943_vm0, %v2380_v38  ;;  %2048 = vst.msk [vmem:[%s2931_s13 + $0x1a0] sm:$0xf] %vm1943_vm0, %v2444_v39  ;;  %v2381_v44 = vpack.c.bf16 %v1344_v40, %v1344_v40  ;;  %v2445_v45 = vpack.c.bf16 %v1408_v41, %v1408_v41  ;;  %v2602_v46 = vpop.f32.mrb[44].mxu0  ;;  %v2666_v47 = vpop.f32.mrb[44].mxu1 }
 0x152   : > { %1987 = vst.msk [vmem:[%s2931_s13 + $0xac] sm:$0xf] %vm1943_vm0, %v2383_v42  ;;  %2051 = vst.msk [vmem:[%s2931_s13 + $0x1ac] sm:$0xf] %vm1943_vm0, %v2447_v43  ;;  %v977_v48 = vadd.f32 %v2602_v46, %v2918_v8  ;;  %v1233_v49 = vadd.f32 %v2666_v47, %v2918_v8  ;;  %v968_v50 = vpop.f32.mrb[45].mxu0  ;;  %v1224_v51 = vpop.f32.mrb[45].mxu1 }
 0x153   : > { %1985 = vst.msk [vmem:[%s2931_s13 + $0xa4] sm:$0xf] %vm1943_vm0, %v2381_v44  ;;  %2049 = vst.msk [vmem:[%s2931_s13 + $0x1a4] sm:$0xf] %vm1943_vm0, %v2445_v45  ;;  %v969_v52 = vadd.f32 %v2918_v8, %v968_v50  ;;  %v1225_v53 = vadd.f32 %v2918_v8, %v1224_v51  ;;  %v2603_v54 = vpop.f32.mrb[46].mxu0  ;;  %v2667_v55 = vpop.f32.mrb[46].mxu1 }
 0x154   : > { %v1349_v56 = vmax.f32 %v977_v48, 0.0  ;;  %v1413_v57 = vmax.f32 %v1233_v49, 0.0  ;;  %v980_v58 = vadd.f32 %v2603_v54, %v2918_v8  ;;  %v1236_v59 = vadd.f32 %v2667_v55, %v2918_v8  ;;  %v971_v60 = vpop.f32.mrb[47].mxu0  ;;  %v1227_v61 = vpop.f32.mrb[47].mxu1  ;;  %v3238_v48 = vld [vmem:[%s3321_s2] ss:$0 sm:$0xff] }
 0x155   : > { %v1347_v62 = vmax.f32 %v969_v52, 0.0  ;;  %v1411_v63 = vmax.f32 %v1225_v53, 0.0  ;;  %v972_v0 = vadd.f32 %v2918_v8, %v971_v60  ;;  %v1228_v1 = vadd.f32 %v2918_v8, %v1227_v61 }
 0x156   : > { %v2386_v2 = vpack.c.bf16 %v1349_v56, %v1349_v56  ;;  %v2450_v3 = vpack.c.bf16 %v1413_v57, %v1413_v57  ;;  %v1350_v4 = vmax.f32 %v980_v58, 0.0  ;;  %v1414_v5 = vmax.f32 %v1236_v59, 0.0 }
 0x157   : > { %v2384_v6 = vpack.c.bf16 %v1347_v62, %v1347_v62  ;;  %v2448_v7 = vpack.c.bf16 %v1411_v63, %v1411_v63  ;;  %v1348_v9 = vmax.f32 %v972_v0, 0.0  ;;  %v1412_v10 = vmax.f32 %v1228_v1, 0.0 }
 0x158   : > { %1990 = vst.msk [vmem:[%s2931_s13 + $0xb8] sm:$0xf] %vm1943_vm0, %v2386_v2  ;;  %2054 = vst.msk [vmem:[%s2931_s13 + $0x1b8] sm:$0xf] %vm1943_vm0, %v2450_v3  ;;  %v2387_v11 = vpack.c.bf16 %v1350_v4, %v1350_v4  ;;  %v2451_v12 = vpack.c.bf16 %v1414_v5, %v1414_v5 }
 0x159   : > { %1988 = vst.msk [vmem:[%s2931_s13 + $0xb0] sm:$0xf] %vm1943_vm0, %v2384_v6  ;;  %2052 = vst.msk [vmem:[%s2931_s13 + $0x1b0] sm:$0xf] %vm1943_vm0, %v2448_v7  ;;  %v2385_v13 = vpack.c.bf16 %v1348_v9, %v1348_v9  ;;  %v2449_v14 = vpack.c.bf16 %v1412_v10, %v1412_v10  ;;  %v2606_v15 = vpop.f32.mrb[48].mxu0  ;;  %v2670_v16 = vpop.f32.mrb[48].mxu1 }
 0x15a   : > { %1991 = vst.msk [vmem:[%s2931_s13 + $0xbc] sm:$0xf] %vm1943_vm0, %v2387_v11  ;;  %2055 = vst.msk [vmem:[%s2931_s13 + $0x1bc] sm:$0xf] %vm1943_vm0, %v2451_v12  ;;  %v993_v17 = vadd.f32 %v2606_v15, %v2918_v8  ;;  %v1249_v18 = vadd.f32 %v2670_v16, %v2918_v8  ;;  %v984_v19 = vpop.f32.mrb[49].mxu0  ;;  %v1240_v20 = vpop.f32.mrb[49].mxu1 }
 0x15b   : > { %1989 = vst.msk [vmem:[%s2931_s13 + $0xb4] sm:$0xf] %vm1943_vm0, %v2385_v13  ;;  %2053 = vst.msk [vmem:[%s2931_s13 + $0x1b4] sm:$0xf] %vm1943_vm0, %v2449_v14  ;;  %v985_v21 = vadd.f32 %v2918_v8, %v984_v19  ;;  %v1241_v22 = vadd.f32 %v2918_v8, %v1240_v20  ;;  %v2607_v23 = vpop.f32.mrb[50].mxu0  ;;  %v2671_v24 = vpop.f32.mrb[50].mxu1 }
 0x15c   : > { %v1353_v25 = vmax.f32 %v993_v17, 0.0  ;;  %v1417_v26 = vmax.f32 %v1249_v18, 0.0  ;;  %v996_v27 = vadd.f32 %v2607_v23, %v2918_v8  ;;  %v1252_v28 = vadd.f32 %v2671_v24, %v2918_v8  ;;  %v987_v29 = vpop.f32.mrb[51].mxu0  ;;  %v1243_v30 = vpop.f32.mrb[51].mxu1 }
 0x15d   : > { %v1351_v31 = vmax.f32 %v985_v21, 0.0  ;;  %v1415_v32 = vmax.f32 %v1241_v22, 0.0  ;;  %v988_v33 = vadd.f32 %v2918_v8, %v987_v29  ;;  %v1244_v34 = vadd.f32 %v2918_v8, %v1243_v30 }
 0x15e   : > { %v2390_v35 = vpack.c.bf16 %v1353_v25, %v1353_v25  ;;  %v2454_v36 = vpack.c.bf16 %v1417_v26, %v1417_v26  ;;  %v1354_v37 = vmax.f32 %v996_v27, 0.0  ;;  %v1418_v38 = vmax.f32 %v1252_v28, 0.0 }
 0x15f   : > { %v2388_v39 = vpack.c.bf16 %v1351_v31, %v1351_v31  ;;  %v2452_v40 = vpack.c.bf16 %v1415_v32, %v1415_v32  ;;  %v1352_v41 = vmax.f32 %v988_v33, 0.0  ;;  %v1416_v42 = vmax.f32 %v1244_v34, 0.0 }
 0x160   : > { %1994 = vst.msk [vmem:[%s2931_s13 + $0xc8] sm:$0xf] %vm1943_vm0, %v2390_v35  ;;  %2058 = vst.msk [vmem:[%s2931_s13 + $0x1c8] sm:$0xf] %vm1943_vm0, %v2454_v36  ;;  %v2391_v43 = vpack.c.bf16 %v1354_v37, %v1354_v37  ;;  %v2455_v44 = vpack.c.bf16 %v1418_v38, %v1418_v38 }
 0x161   : > { %1992 = vst.msk [vmem:[%s2931_s13 + $0xc0] sm:$0xf] %vm1943_vm0, %v2388_v39  ;;  %2056 = vst.msk [vmem:[%s2931_s13 + $0x1c0] sm:$0xf] %vm1943_vm0, %v2452_v40  ;;  %v2389_v8 = vpack.c.bf16 %v1352_v41, %v1352_v41  ;;  %v2453_v45 = vpack.c.bf16 %v1416_v42, %v1416_v42  ;;  %v2610_v46 = vpop.f32.mrb[52].mxu0  ;;  %v2674_v47 = vpop.f32.mrb[52].mxu1 }
 0x162   : > { %1995 = vst.msk [vmem:[%s2931_s13 + $0xcc] sm:$0xf] %vm1943_vm0, %v2391_v43  ;;  %2059 = vst.msk [vmem:[%s2931_s13 + $0x1cc] sm:$0xf] %vm1943_vm0, %v2455_v44  ;;  %v1009_v49 = vadd.f32 %v3238_v48, %v2610_v46  ;;  %v1265_v50 = vadd.f32 %v3238_v48, %v2674_v47  ;;  %v1000_v51 = vpop.f32.mrb[53].mxu0  ;;  %v1256_v52 = vpop.f32.mrb[53].mxu1 }
 0x163   : > { %1993 = vst.msk [vmem:[%s2931_s13 + $0xc4] sm:$0xf] %vm1943_vm0, %v2389_v8  ;;  %2057 = vst.msk [vmem:[%s2931_s13 + $0x1c4] sm:$0xf] %vm1943_vm0, %v2453_v45  ;;  %v1001_v53 = vadd.f32 %v3238_v48, %v1000_v51  ;;  %v1257_v54 = vadd.f32 %v3238_v48, %v1256_v52  ;;  %v2611_v55 = vpop.f32.mrb[54].mxu0  ;;  %v2675_v56 = vpop.f32.mrb[54].mxu1 }
 0x164   : > { %v1357_v57 = vmax.f32 %v1009_v49, 0.0  ;;  %v1421_v58 = vmax.f32 %v1265_v50, 0.0  ;;  %v1012_v59 = vadd.f32 %v3238_v48, %v2611_v55  ;;  %v1268_v60 = vadd.f32 %v3238_v48, %v2675_v56  ;;  %v1003_v61 = vpop.f32.mrb[55].mxu0  ;;  %v1259_v62 = vpop.f32.mrb[55].mxu1 }
 0x165   : > { %v1355_v63 = vmax.f32 %v1001_v53, 0.0  ;;  %v1419_v0 = vmax.f32 %v1257_v54, 0.0  ;;  %v1004_v1 = vadd.f32 %v3238_v48, %v1003_v61  ;;  %v1260_v2 = vadd.f32 %v3238_v48, %v1259_v62 }
 0x166   : > { %v2394_v3 = vpack.c.bf16 %v1357_v57, %v1357_v57  ;;  %v2458_v4 = vpack.c.bf16 %v1421_v58, %v1421_v58  ;;  %v1358_v5 = vmax.f32 %v1012_v59, 0.0  ;;  %v1422_v6 = vmax.f32 %v1268_v60, 0.0 }
 0x167   : > { %v2392_v7 = vpack.c.bf16 %v1355_v63, %v1355_v63  ;;  %v2456_v9 = vpack.c.bf16 %v1419_v0, %v1419_v0  ;;  %v1356_v10 = vmax.f32 %v1004_v1, 0.0  ;;  %v1420_v11 = vmax.f32 %v1260_v2, 0.0 }
 0x168   : > { %1998 = vst.msk [vmem:[%s2931_s13 + $0xd8] sm:$0xf] %vm1943_vm0, %v2394_v3  ;;  %2062 = vst.msk [vmem:[%s2931_s13 + $0x1d8] sm:$0xf] %vm1943_vm0, %v2458_v4  ;;  %v2395_v12 = vpack.c.bf16 %v1358_v5, %v1358_v5  ;;  %v2459_v13 = vpack.c.bf16 %v1422_v6, %v1422_v6 }
 0x169   : > { %1996 = vst.msk [vmem:[%s2931_s13 + $0xd0] sm:$0xf] %vm1943_vm0, %v2392_v7  ;;  %2060 = vst.msk [vmem:[%s2931_s13 + $0x1d0] sm:$0xf] %vm1943_vm0, %v2456_v9  ;;  %v2393_v14 = vpack.c.bf16 %v1356_v10, %v1356_v10  ;;  %v2457_v15 = vpack.c.bf16 %v1420_v11, %v1420_v11  ;;  %v2614_v16 = vpop.f32.mrb[56].mxu0  ;;  %v2678_v17 = vpop.f32.mrb[56].mxu1 }
 0x16a   : > { %1999 = vst.msk [vmem:[%s2931_s13 + $0xdc] sm:$0xf] %vm1943_vm0, %v2395_v12  ;;  %2063 = vst.msk [vmem:[%s2931_s13 + $0x1dc] sm:$0xf] %vm1943_vm0, %v2459_v13  ;;  %v1025_v18 = vadd.f32 %v3238_v48, %v2614_v16  ;;  %v1281_v19 = vadd.f32 %v3238_v48, %v2678_v17  ;;  %v1016_v20 = vpop.f32.mrb[57].mxu0  ;;  %v1272_v21 = vpop.f32.mrb[57].mxu1 }
 0x16b   : > { %1997 = vst.msk [vmem:[%s2931_s13 + $0xd4] sm:$0xf] %vm1943_vm0, %v2393_v14  ;;  %2061 = vst.msk [vmem:[%s2931_s13 + $0x1d4] sm:$0xf] %vm1943_vm0, %v2457_v15  ;;  %v1017_v22 = vadd.f32 %v3238_v48, %v1016_v20  ;;  %v1273_v23 = vadd.f32 %v3238_v48, %v1272_v21  ;;  %v2615_v24 = vpop.f32.mrb[58].mxu0  ;;  %v2679_v25 = vpop.f32.mrb[58].mxu1 }
 0x16c   : > { %v1361_v26 = vmax.f32 %v1025_v18, 0.0  ;;  %v1425_v27 = vmax.f32 %v1281_v19, 0.0  ;;  %v1028_v28 = vadd.f32 %v3238_v48, %v2615_v24  ;;  %v1284_v29 = vadd.f32 %v3238_v48, %v2679_v25  ;;  %v1019_v30 = vpop.f32.mrb[59].mxu0  ;;  %v1275_v31 = vpop.f32.mrb[59].mxu1 }
 0x16d   : > { %v1359_v32 = vmax.f32 %v1017_v22, 0.0  ;;  %v1423_v33 = vmax.f32 %v1273_v23, 0.0  ;;  %v1020_v34 = vadd.f32 %v3238_v48, %v1019_v30  ;;  %v1276_v35 = vadd.f32 %v3238_v48, %v1275_v31 }
 0x16e   : > { %v2398_v36 = vpack.c.bf16 %v1361_v26, %v1361_v26  ;;  %v2462_v37 = vpack.c.bf16 %v1425_v27, %v1425_v27  ;;  %v1362_v38 = vmax.f32 %v1028_v28, 0.0  ;;  %v1426_v39 = vmax.f32 %v1284_v29, 0.0 }
 0x16f   : > { %v2396_v40 = vpack.c.bf16 %v1359_v32, %v1359_v32  ;;  %v2460_v41 = vpack.c.bf16 %v1423_v33, %v1423_v33  ;;  %v1360_v42 = vmax.f32 %v1020_v34, 0.0  ;;  %v1424_v43 = vmax.f32 %v1276_v35, 0.0 }
 0x170   : > { %2002 = vst.msk [vmem:[%s2931_s13 + $0xe8] sm:$0xf] %vm1943_vm0, %v2398_v36  ;;  %2066 = vst.msk [vmem:[%s2931_s13 + $0x1e8] sm:$0xf] %vm1943_vm0, %v2462_v37  ;;  %v2399_v44 = vpack.c.bf16 %v1362_v38, %v1362_v38  ;;  %v2463_v8 = vpack.c.bf16 %v1426_v39, %v1426_v39 }
 0x171   : > { %2000 = vst.msk [vmem:[%s2931_s13 + $0xe0] sm:$0xf] %vm1943_vm0, %v2396_v40  ;;  %2064 = vst.msk [vmem:[%s2931_s13 + $0x1e0] sm:$0xf] %vm1943_vm0, %v2460_v41  ;;  %v2397_v45 = vpack.c.bf16 %v1360_v42, %v1360_v42  ;;  %v2461_v46 = vpack.c.bf16 %v1424_v43, %v1424_v43  ;;  %v2618_v47 = vpop.f32.mrb[60].mxu0  ;;  %v2682_v49 = vpop.f32.mrb[60].mxu1 }
 0x172   : > { %2003 = vst.msk [vmem:[%s2931_s13 + $0xec] sm:$0xf] %vm1943_vm0, %v2399_v44  ;;  %2067 = vst.msk [vmem:[%s2931_s13 + $0x1ec] sm:$0xf] %vm1943_vm0, %v2463_v8  ;;  %v1041_v50 = vadd.f32 %v3238_v48, %v2618_v47  ;;  %v1297_v51 = vadd.f32 %v3238_v48, %v2682_v49  ;;  %v1032_v52 = vpop.f32.mrb[61].mxu0  ;;  %v1288_v53 = vpop.f32.mrb[61].mxu1 }
 0x173   : > { %2001 = vst.msk [vmem:[%s2931_s13 + $0xe4] sm:$0xf] %vm1943_vm0, %v2397_v45  ;;  %2065 = vst.msk [vmem:[%s2931_s13 + $0x1e4] sm:$0xf] %vm1943_vm0, %v2461_v46  ;;  %v1033_v54 = vadd.f32 %v3238_v48, %v1032_v52  ;;  %v1289_v55 = vadd.f32 %v3238_v48, %v1288_v53  ;;  %v2619_v56 = vpop.f32.mrb[62].mxu0  ;;  %v2683_v57 = vpop.f32.mrb[62].mxu1 }
 0x174   : > { %v1365_v58 = vmax.f32 %v1041_v50, 0.0  ;;  %v1429_v59 = vmax.f32 %v1297_v51, 0.0  ;;  %v1044_v60 = vadd.f32 %v3238_v48, %v2619_v56  ;;  %v1300_v61 = vadd.f32 %v3238_v48, %v2683_v57  ;;  %v1035_v62 = vpop.f32.mrb[63].mxu0  ;;  %v1291_v63 = vpop.f32.mrb[63].mxu1 }
 0x175   : > { %v1363_v0 = vmax.f32 %v1033_v54, 0.0  ;;  %v1427_v1 = vmax.f32 %v1289_v55, 0.0  ;;  %v1036_v2 = vadd.f32 %v3238_v48, %v1035_v62  ;;  %v1292_v3 = vadd.f32 %v3238_v48, %v1291_v63 }
 0x176   : > { %v2402_v4 = vpack.c.bf16 %v1365_v58, %v1365_v58  ;;  %v2466_v5 = vpack.c.bf16 %v1429_v59, %v1429_v59  ;;  %v1366_v6 = vmax.f32 %v1044_v60, 0.0  ;;  %v1430_v7 = vmax.f32 %v1300_v61, 0.0 }
 0x177   : > { %v2400_v9 = vpack.c.bf16 %v1363_v0, %v1363_v0  ;;  %v2464_v10 = vpack.c.bf16 %v1427_v1, %v1427_v1  ;;  %v1364_v11 = vmax.f32 %v1036_v2, 0.0  ;;  %v1428_v12 = vmax.f32 %v1292_v3, 0.0 }
 0x178   : > { %2006 = vst.msk [vmem:[%s2931_s13 + $0xf8] sm:$0xf] %vm1943_vm0, %v2402_v4  ;;  %2070 = vst.msk [vmem:[%s2931_s13 + $0x1f8] sm:$0xf] %vm1943_vm0, %v2466_v5  ;;  %v2403_v13 = vpack.c.bf16 %v1366_v6, %v1366_v6  ;;  %v2467_v14 = vpack.c.bf16 %v1430_v7, %v1430_v7 }
 0x179   : > { %2004 = vst.msk [vmem:[%s2931_s13 + $0xf0] sm:$0xf] %vm1943_vm0, %v2400_v9  ;;  %2068 = vst.msk [vmem:[%s2931_s13 + $0x1f0] sm:$0xf] %vm1943_vm0, %v2464_v10  ;;  %v2401_v48 = vpack.c.bf16 %v1364_v11, %v1364_v11  ;;  %v2465_v15 = vpack.c.bf16 %v1428_v12, %v1428_v12 }
 0x17a   : > { %2007 = vst.msk [vmem:[%s2931_s13 + $0xfc] sm:$0xf] %vm1943_vm0, %v2403_v13  ;;  %2071 = vst.msk [vmem:[%s2931_s13 + $0x1fc] sm:$0xf] %vm1943_vm0, %v2467_v14 }
 0x17b   : > { %2005 = vst.msk [vmem:[%s2931_s13 + $0xf4] sm:$0xf] %vm1943_vm0, %v2401_v48  ;;  %2069 = vst.msk [vmem:[%s2931_s13 + $0x1f4] sm:$0xf] %vm1943_vm0, %v2465_v15 }
 0x17c PF: > { %s13_s12 = sadd.s32 1, %s2787_s12  }
 0x17d   : > { %p10_p4 = scmp.ge.s32.totalorder %s13_s12, 4  }
 0x17f   :  { %12 = sbr.rel (!%p10_p4) target bundleno = 1 (0x1), region = 62 }

// kernel: patch_discriminator_t2s.6
= control target key start
LH: loop header
LB: loop body
LE: loop exit
PB: predicated region body
PF: predicated region fallthrough
CT: control target
= control target key end

     0   :  { %v2106_v0 = vmov 0   ;;  %vm819_vm0 = vcmask 261120   ;;  %vm1681_vm1 = vcmask 257024   ;;  %s4144_s1 = inlined_call_operand.vmem [shape: bf16[256,32], index: 1, kind: input, shape index: {}]   ;;  %s4145_s0 = inlined_call_operand.vmem [shape: bf16[512,256], index: 0, kind: input, shape index: {}]   ;;  %s4146_s2 = inlined_call_operand.vmem [shape: f32[1,32], index: 2, kind: input, shape index: {}]   ;;  %s4147_s3 = inlined_call_operand.vmem [shape: f32[1,32], index: 3, kind: input, shape index: {}]   ;;  %s4148_s4 = inlined_call_operand.vmem [shape: bf16[512,32], index: 4, kind: output, shape index: {}]  }
   0x1   :  { %530 = vmatprep.subr.bf16.mxu0 %v2106_v0  ;;  %v1992_v1 = vld [vmem:[%s4144_s1] sm:$0xff]   ;;  %1959 = vmatprep.subr.bf16.mxu1 %v2106_v0  ;;  %v1993_v2 = vld [vmem:[%s4144_s1 + $0x8] sm:$0xff]   ;;  %v1994_v3 = vld [vmem:[%s4144_s1 + $0x10] sm:$0xff]  }
   0x2   :  { %531 = vmatpush1.bf16.msra.mxu0 %v1992_v1  ;;  %1975 = vmatpush1.bf16.msra.mxu1 %v1992_v1  ;;  %v1995_v4 = vld [vmem:[%s4144_s1 + $0x18] sm:$0xff]   ;;  %v1996_v5 = vld [vmem:[%s4144_s1 + $0x20] sm:$0xff]   ;;  %v1997_v7 = vld [vmem:[%s4144_s1 + $0x28] sm:$0xff]  }
   0x3   :  { %532 = vmatprep.subr.bf16.mxu0 %v2106_v0  ;;  %1960 = vmatprep.subr.bf16.mxu1 %v2106_v0  ;;  %v2010_v6 = vld [vmem:[%s4145_s0 + $0x4] ss:$8 sps:$4 sm:$0xff]   ;;  %v1998_v8 = vld [vmem:[%s4144_s1 + $0x30] sm:$0xff]   ;;  %v1999_v9 = vld [vmem:[%s4144_s1 + $0x38] sm:$0xff]  }
   0x4   :  { %562 = vmatprep.mubr.bf16.mxu0 %v2010_v6  ;;  %v2034_v10 = vld [vmem:[%s4145_s0 + $0x104] ss:$8 sps:$4 sm:$0xff]   ;;  %v2002_v13 = vld [vmem:[%s4144_s1 + $0x50] sm:$0xff]   ;;  %v2003_v14 = vld [vmem:[%s4144_s1 + $0x58] sm:$0xff]  }
   0x5   :  { %690 = vmatprep.mubr.bf16.mxu1 %v2034_v10  ;;  %v2000_v11 = vld [vmem:[%s4144_s1 + $0x40] sm:$0xff]   ;;  %v2001_v12 = vld [vmem:[%s4144_s1 + $0x48] sm:$0xff]   ;;  %v2006_v17 = vld [vmem:[%s4144_s1 + $0x70] sm:$0xff]  }
   0x6   :  { %533 = vmatpush1.bf16.msra.mxu0 %v1993_v2  ;;  %1976 = vmatpush1.bf16.msra.mxu1 %v1993_v2  ;;  %v2004_v15 = vld [vmem:[%s4144_s1 + $0x60] sm:$0xff]   ;;  %v2005_v16 = vld [vmem:[%s4144_s1 + $0x68] sm:$0xff]   ;;  %v2007_v18 = vld [vmem:[%s4144_s1 + $0x78] sm:$0xff]  }
   0x7   :  { %534 = vmatprep.subr.bf16.mxu0 %v2106_v0  ;;  %1961 = vmatprep.subr.bf16.mxu1 %v2106_v0  ;;  %v2008_v19 = vld [vmem:[%s4145_s0] ss:$8 sps:$4 sm:$0xff]   ;;  %v2011_v21 = vld [vmem:[%s4145_s0 + $0x14] ss:$8 sps:$4 sm:$0xff]   ;;  %v2013_v23 = vld [vmem:[%s4145_s0 + $0x10] ss:$8 sps:$4 sm:$0xff]  }
   0x8   :  { %v2032_v20 = vld [vmem:[%s4145_s0 + $0x100] ss:$8 sps:$4 sm:$0xff]   ;;  %v2038_v22 = vld [vmem:[%s4145_s0 + $0x114] ss:$8 sps:$4 sm:$0xff]   ;;  %v2040_v24 = vld [vmem:[%s4145_s0 + $0x110] ss:$8 sps:$4 sm:$0xff]  }
   0x9   :  { %v2014_v25 = vld [vmem:[%s4145_s0 + $0x24] ss:$8 sps:$4 sm:$0xff]   ;;  %v2016_v27 = vld [vmem:[%s4145_s0 + $0x20] ss:$8 sps:$4 sm:$0xff]   ;;  %v2017_v29 = vld [vmem:[%s4145_s0 + $0x34] ss:$8 sps:$4 sm:$0xff]  }
   0xa   :  { %535 = vmatpush1.bf16.msra.mxu0 %v1994_v3  ;;  %1977 = vmatpush1.bf16.msra.mxu1 %v1994_v3  ;;  %v2044_v26 = vld [vmem:[%s4145_s0 + $0x124] ss:$8 sps:$4 sm:$0xff]   ;;  %v2046_v28 = vld [vmem:[%s4145_s0 + $0x120] ss:$8 sps:$4 sm:$0xff]   ;;  %v2050_v30 = vld [vmem:[%s4145_s0 + $0x134] ss:$8 sps:$4 sm:$0xff]  }
   0xb   :  { %536 = vmatprep.subr.bf16.mxu0 %v2106_v0  ;;  %1962 = vmatprep.subr.bf16.mxu1 %v2106_v0  ;;  %v2019_v31 = vld [vmem:[%s4145_s0 + $0x30] ss:$8 sps:$4 sm:$0xff]   ;;  %v2020_v33 = vld [vmem:[%s4145_s0 + $0x44] ss:$8 sps:$4 sm:$0xff]   ;;  %v2022_v35 = vld [vmem:[%s4145_s0 + $0x40] ss:$8 sps:$4 sm:$0xff]  }
   0xc   :  { %v2052_v32 = vld [vmem:[%s4145_s0 + $0x130] ss:$8 sps:$4 sm:$0xff]   ;;  %v2056_v34 = vld [vmem:[%s4145_s0 + $0x144] ss:$8 sps:$4 sm:$0xff]   ;;  %v2058_v36 = vld [vmem:[%s4145_s0 + $0x140] ss:$8 sps:$4 sm:$0xff]  }
   0xd   :  { %v2023_v37 = vld [vmem:[%s4145_s0 + $0x54] ss:$8 sps:$4 sm:$0xff]   ;;  %v2025_v39 = vld [vmem:[%s4145_s0 + $0x50] ss:$8 sps:$4 sm:$0xff]   ;;  %v2026_v41 = vld [vmem:[%s4145_s0 + $0x64] ss:$8 sps:$4 sm:$0xff]  }
   0xe   :  { %537 = vmatpush1.bf16.msra.mxu0 %v1995_v4  ;;  %1978 = vmatpush1.bf16.msra.mxu1 %v1995_v4  ;;  %v2062_v38 = vld [vmem:[%s4145_s0 + $0x154] ss:$8 sps:$4 sm:$0xff]   ;;  %v2064_v40 = vld [vmem:[%s4145_s0 + $0x150] ss:$8 sps:$4 sm:$0xff]   ;;  %v2068_v42 = vld [vmem:[%s4145_s0 + $0x164] ss:$8 sps:$4 sm:$0xff]  }
   0xf   :  { %538 = vmatprep.subr.bf16.mxu0 %v2106_v0  ;;  %1963 = vmatprep.subr.bf16.mxu1 %v2106_v0  ;;  %v2028_v43 = vld [vmem:[%s4145_s0 + $0x60] ss:$8 sps:$4 sm:$0xff]   ;;  %v2029_v45 = vld [vmem:[%s4145_s0 + $0x74] ss:$8 sps:$4 sm:$0xff]   ;;  %v2031_v47 = vld [vmem:[%s4145_s0 + $0x70] ss:$8 sps:$4 sm:$0xff]  }
  0x10   :  { %v2070_v44 = vld [vmem:[%s4145_s0 + $0x160] ss:$8 sps:$4 sm:$0xff]   ;;  %v2074_v46 = vld [vmem:[%s4145_s0 + $0x174] ss:$8 sps:$4 sm:$0xff]   ;;  %v2076_v48 = vld [vmem:[%s4145_s0 + $0x170] ss:$8 sps:$4 sm:$0xff]  }
  0x11   :  { %v2035_v49 = vld [vmem:[%s4145_s0 + $0x84] ss:$8 sps:$4 sm:$0xff]   ;;  %v2037_v51 = vld [vmem:[%s4145_s0 + $0x80] ss:$8 sps:$4 sm:$0xff]   ;;  %v2041_v53 = vld [vmem:[%s4145_s0 + $0x94] ss:$8 sps:$4 sm:$0xff]  }
  0x12   :  { %539 = vmatpush1.bf16.msra.mxu0 %v1996_v5  ;;  %1979 = vmatpush1.bf16.msra.mxu1 %v1996_v5  ;;  %v2080_v50 = vld [vmem:[%s4145_s0 + $0x184] ss:$8 sps:$4 sm:$0xff]   ;;  %v2082_v52 = vld [vmem:[%s4145_s0 + $0x180] ss:$8 sps:$4 sm:$0xff]   ;;  %v2083_v54 = vld [vmem:[%s4145_s0 + $0x194] ss:$8 sps:$4 sm:$0xff]  }
  0x13   :  { %540 = vmatprep.subr.bf16.mxu0 %v2106_v0  ;;  %1964 = vmatprep.subr.bf16.mxu1 %v2106_v0  ;;  %v2043_v55 = vld [vmem:[%s4145_s0 + $0x90] ss:$8 sps:$4 sm:$0xff]   ;;  %v2047_v57 = vld [vmem:[%s4145_s0 + $0xa4] ss:$8 sps:$4 sm:$0xff]   ;;  %v2049_v59 = vld [vmem:[%s4145_s0 + $0xa0] ss:$8 sps:$4 sm:$0xff]  }
  0x14   :  { %v2085_v56 = vld [vmem:[%s4145_s0 + $0x190] ss:$8 sps:$4 sm:$0xff]   ;;  %v2086_v58 = vld [vmem:[%s4145_s0 + $0x1a4] ss:$8 sps:$4 sm:$0xff]   ;;  %v2088_v60 = vld [vmem:[%s4145_s0 + $0x1a0] ss:$8 sps:$4 sm:$0xff]  }
  0x15   :  { %v2053_v61 = vld [vmem:[%s4145_s0 + $0xb4] ss:$8 sps:$4 sm:$0xff]   ;;  %v2055_v63 = vld [vmem:[%s4145_s0 + $0xb0] ss:$8 sps:$4 sm:$0xff]   ;;  %v2059_v1 = vld [vmem:[%s4145_s0 + $0xc4] ss:$8 sps:$4 sm:$0xff]  }
  0x16   :  { %541 = vmatpush1.bf16.msra.mxu0 %v1997_v7  ;;  %1980 = vmatpush1.bf16.msra.mxu1 %v1997_v7  ;;  %v2089_v62 = vld [vmem:[%s4145_s0 + $0x1b4] ss:$8 sps:$4 sm:$0xff]   ;;  %v2092_v2 = vld [vmem:[%s4145_s0 + $0x1c4] ss:$8 sps:$4 sm:$0xff]   ;;  %v2061_v3 = vld [vmem:[%s4145_s0 + $0xc0] ss:$8 sps:$4 sm:$0xff]  }
  0x17   :  { %542 = vmatprep.subr.bf16.mxu0 %v2106_v0  ;;  %1965 = vmatprep.subr.bf16.mxu1 %v2106_v0  ;;  %v2094_v4 = vld [vmem:[%s4145_s0 + $0x1c0] ss:$8 sps:$4 sm:$0xff]   ;;  %v2065_v5 = vld [vmem:[%s4145_s0 + $0xd4] ss:$8 sps:$4 sm:$0xff]   ;;  %v2067_v7 = vld [vmem:[%s4145_s0 + $0xd0] ss:$8 sps:$4 sm:$0xff]  }
  0x18   :  { %v2095_v6 = vld [vmem:[%s4145_s0 + $0x1d4] ss:$8 sps:$4 sm:$0xff]   ;;  %v2098_v10 = vld [vmem:[%s4145_s0 + $0x1e4] ss:$8 sps:$4 sm:$0xff]  }
  0x1a   :  { %543 = vmatpush1.bf16.msra.mxu0 %v1998_v8  ;;  %1981 = vmatpush1.bf16.msra.mxu1 %v1998_v8  ;;  %v2097_v8 = vld [vmem:[%s4145_s0 + $0x1d0] ss:$8 sps:$4 sm:$0xff]  }
  0x1b   :  { %544 = vmatprep.subr.bf16.mxu0 %v2106_v0  ;;  %1966 = vmatprep.subr.bf16.mxu1 %v2106_v0 }
  0x1e   :  { %545 = vmatpush1.bf16.msra.mxu0 %v1999_v9  ;;  %1982 = vmatpush1.bf16.msra.mxu1 %v1999_v9  ;;  %v2071_v9 = vld [vmem:[%s4145_s0 + $0xe4] ss:$8 sps:$4 sm:$0xff]  }
  0x1f   :  { %546 = vmatprep.subr.bf16.mxu0 %v2106_v0  ;;  %1967 = vmatprep.subr.bf16.mxu1 %v2106_v0 }
  0x22   :  { %547 = vmatpush1.bf16.msra.mxu0 %v2000_v11  ;;  %1983 = vmatpush1.bf16.msra.mxu1 %v2000_v11  ;;  %v2073_v11 = vld [vmem:[%s4145_s0 + $0xe0] ss:$8 sps:$4 sm:$0xff]  }
  0x23   :  { %548 = vmatprep.subr.bf16.mxu0 %v2106_v0  ;;  %1968 = vmatprep.subr.bf16.mxu1 %v2106_v0 }
  0x26   :  { %549 = vmatpush1.bf16.msra.mxu0 %v2001_v12  ;;  %1984 = vmatpush1.bf16.msra.mxu1 %v2001_v12  ;;  %v2100_v12 = vld [vmem:[%s4145_s0 + $0x1e0] ss:$8 sps:$4 sm:$0xff]  }
  0x27   :  { %550 = vmatprep.subr.bf16.mxu0 %v2106_v0  ;;  %1969 = vmatprep.subr.bf16.mxu1 %v2106_v0 }
  0x2a   :  { %551 = vmatpush1.bf16.msra.mxu0 %v2002_v13  ;;  %1985 = vmatpush1.bf16.msra.mxu1 %v2002_v13  ;;  %v2077_v13 = vld [vmem:[%s4145_s0 + $0xf4] ss:$8 sps:$4 sm:$0xff]  }
  0x2b   :  { %552 = vmatprep.subr.bf16.mxu0 %v2106_v0  ;;  %1970 = vmatprep.subr.bf16.mxu1 %v2106_v0 }
  0x2e   :  { %553 = vmatpush1.bf16.msra.mxu0 %v2003_v14  ;;  %1986 = vmatpush1.bf16.msra.mxu1 %v2003_v14  ;;  %v2101_v14 = vld [vmem:[%s4145_s0 + $0x1f4] ss:$8 sps:$4 sm:$0xff]  }
  0x2f   :  { %554 = vmatprep.subr.bf16.mxu0 %v2106_v0  ;;  %1971 = vmatprep.subr.bf16.mxu1 %v2106_v0 }
  0x32   :  { %555 = vmatpush1.bf16.msra.mxu0 %v2004_v15  ;;  %1987 = vmatpush1.bf16.msra.mxu1 %v2004_v15  ;;  %v2079_v15 = vld [vmem:[%s4145_s0 + $0xf0] ss:$8 sps:$4 sm:$0xff]  }
  0x33   :  { %556 = vmatprep.subr.bf16.mxu0 %v2106_v0  ;;  %1972 = vmatprep.subr.bf16.mxu1 %v2106_v0 }
  0x36   :  { %557 = vmatpush1.bf16.msra.mxu0 %v2005_v16  ;;  %1988 = vmatpush1.bf16.msra.mxu1 %v2005_v16  ;;  %v2103_v16 = vld [vmem:[%s4145_s0 + $0x1f0] ss:$8 sps:$4 sm:$0xff]  }
  0x37   :  { %558 = vmatprep.subr.bf16.mxu0 %v2106_v0  ;;  %1973 = vmatprep.subr.bf16.mxu1 %v2106_v0 }
  0x3a   :  { %559 = vmatpush1.bf16.msra.mxu0 %v2006_v17  ;;  %1989 = vmatpush1.bf16.msra.mxu1 %v2006_v17 }
  0x3b   :  { %560 = vmatprep.subr.bf16.mxu0 %v2106_v0  ;;  %1974 = vmatprep.subr.bf16.mxu1 %v2106_v0  ;;  %v2091_v0 = vld [vmem:[%s4145_s0 + $0x1b0] ss:$8 sps:$4 sm:$0xff]  }
  0x3e   :  { %561 = vmatpush1.bf16.msra.mxu0 %v2007_v18  ;;  %1990 = vmatpush1.bf16.msra.mxu1 %v2007_v18 }
  0x41   :  { %563 = vmatmul.mubr.bf16.vlgmr.msra.gmra.mrb[0].mxu0 %v2008_v19  ;;  %691 = vmatmul.mubr.bf16.vlgmr.msra.gmra.mrb[0].mxu1 %v2032_v20 }
  0x42   :  { %570 = vmatprep.mubr.bf16.mxu0 %v2011_v21  ;;  %698 = vmatprep.mubr.bf16.mxu1 %v2038_v22 }
  0x49   :  { %571 = vmatmul.mubr.bf16.gmra.mrb[4].mxu0 %v2013_v23  ;;  %699 = vmatmul.mubr.bf16.gmra.mrb[4].mxu1 %v2040_v24 }
  0x4a   :  { %578 = vmatprep.mubr.bf16.mxu0 %v2014_v25  ;;  %706 = vmatprep.mubr.bf16.mxu1 %v2044_v26 }
  0x51   :  { %579 = vmatmul.mubr.bf16.gmra.mrb[8].mxu0 %v2016_v27  ;;  %707 = vmatmul.mubr.bf16.gmra.mrb[8].mxu1 %v2046_v28 }
  0x52   :  { %586 = vmatprep.mubr.bf16.mxu0 %v2017_v29  ;;  %714 = vmatprep.mubr.bf16.mxu1 %v2050_v30 }
  0x59   :  { %587 = vmatmul.mubr.bf16.gmra.mrb[12].mxu0 %v2019_v31  ;;  %715 = vmatmul.mubr.bf16.gmra.mrb[12].mxu1 %v2052_v32 }
  0x5a   :  { %594 = vmatprep.mubr.bf16.mxu0 %v2020_v33  ;;  %722 = vmatprep.mubr.bf16.mxu1 %v2056_v34 }
  0x61   :  { %595 = vmatmul.mubr.bf16.gmra.mrb[16].mxu0 %v2022_v35  ;;  %723 = vmatmul.mubr.bf16.gmra.mrb[16].mxu1 %v2058_v36 }
  0x62   :  { %602 = vmatprep.mubr.bf16.mxu0 %v2023_v37  ;;  %730 = vmatprep.mubr.bf16.mxu1 %v2062_v38 }
  0x69   :  { %603 = vmatmul.mubr.bf16.gmra.mrb[20].mxu0 %v2025_v39  ;;  %731 = vmatmul.mubr.bf16.gmra.mrb[20].mxu1 %v2064_v40 }
  0x6a   :  { %610 = vmatprep.mubr.bf16.mxu0 %v2026_v41  ;;  %738 = vmatprep.mubr.bf16.mxu1 %v2068_v42 }
  0x71   :  { %611 = vmatmul.mubr.bf16.gmra.mrb[24].mxu0 %v2028_v43  ;;  %739 = vmatmul.mubr.bf16.gmra.mrb[24].mxu1 %v2070_v44 }
  0x72   :  { %618 = vmatprep.mubr.bf16.mxu0 %v2029_v45  ;;  %746 = vmatprep.mubr.bf16.mxu1 %v2074_v46 }
  0x79   :  { %619 = vmatmul.mubr.bf16.gmra.mrb[28].mxu0 %v2031_v47  ;;  %747 = vmatmul.mubr.bf16.gmra.mrb[28].mxu1 %v2076_v48 }
  0x7a   :  { %626 = vmatprep.mubr.bf16.mxu0 %v2035_v49  ;;  %754 = vmatprep.mubr.bf16.mxu1 %v2080_v50 }
  0x81   :  { %627 = vmatmul.mubr.bf16.gmra.mrb[32].mxu0 %v2037_v51  ;;  %755 = vmatmul.mubr.bf16.gmra.mrb[32].mxu1 %v2082_v52 }
  0x82   :  { %634 = vmatprep.mubr.bf16.mxu0 %v2041_v53  ;;  %762 = vmatprep.mubr.bf16.mxu1 %v2083_v54 }
  0x89   :  { %635 = vmatmul.mubr.bf16.gmra.mrb[36].mxu0 %v2043_v55  ;;  %763 = vmatmul.mubr.bf16.gmra.mrb[36].mxu1 %v2085_v56 }
  0x8a   :  { %642 = vmatprep.mubr.bf16.mxu0 %v2047_v57  ;;  %770 = vmatprep.mubr.bf16.mxu1 %v2086_v58 }
  0x91   :  { %643 = vmatmul.mubr.bf16.gmra.mrb[40].mxu0 %v2049_v59  ;;  %771 = vmatmul.mubr.bf16.gmra.mrb[40].mxu1 %v2088_v60 }
  0x92   :  { %650 = vmatprep.mubr.bf16.mxu0 %v2053_v61  ;;  %778 = vmatprep.mubr.bf16.mxu1 %v2089_v62 }
  0x99   :  { %651 = vmatmul.mubr.bf16.gmra.mrb[44].mxu0 %v2055_v63  ;;  %779 = vmatmul.mubr.bf16.gmra.mrb[44].mxu1 %v2091_v0 }
  0x9a   :  { %658 = vmatprep.mubr.bf16.mxu0 %v2059_v1  ;;  %786 = vmatprep.mubr.bf16.mxu1 %v2092_v2 }
  0xa1   :  { %659 = vmatmul.mubr.bf16.gmra.mrb[48].mxu0 %v2061_v3  ;;  %787 = vmatmul.mubr.bf16.gmra.mrb[48].mxu1 %v2094_v4 }
  0xa2   :  { %666 = vmatprep.mubr.bf16.mxu0 %v2065_v5  ;;  %794 = vmatprep.mubr.bf16.mxu1 %v2095_v6 }
  0xa9   :  { %667 = vmatmul.mubr.bf16.gmra.mrb[52].mxu0 %v2067_v7  ;;  %795 = vmatmul.mubr.bf16.gmra.mrb[52].mxu1 %v2097_v8 }
  0xaa   :  { %674 = vmatprep.mubr.bf16.mxu0 %v2071_v9  ;;  %802 = vmatprep.mubr.bf16.mxu1 %v2098_v10 }
  0xb1   :  { %675 = vmatmul.mubr.bf16.gmra.mrb[56].mxu0 %v2073_v11  ;;  %803 = vmatmul.mubr.bf16.gmra.mrb[56].mxu1 %v2100_v12 }
  0xb2   :  { %682 = vmatprep.mubr.bf16.mxu0 %v2077_v13  ;;  %810 = vmatprep.mubr.bf16.mxu1 %v2101_v14 }
  0xb9   :  { %683 = vmatmul.mubr.bf16.gmra.mrb[60].mxu0 %v2079_v15  ;;  %811 = vmatmul.mubr.bf16.gmra.mrb[60].mxu1 %v2103_v16 }
 0x114   :  { %v2404_v17 = vpop.f32.mrb[0].mxu0  ;;  %v2406_v18 = vpop.f32.mrb[0].mxu1 }
 0x115   :  { %v566_v19 = vpop.f32.mrb[1].mxu0  ;;  %v694_v20 = vpop.f32.mrb[1].mxu1  ;;  %v820_v23 = vsel %vm819_vm0, %v2404_v17, 0.0 }
 0x116   :  { %v2408_v21 = vpop.f32.mrb[2].mxu0  ;;  %v2410_v22 = vpop.f32.mrb[2].mxu1 }
 0x117   :  { %v821_v24 = vsel %vm819_vm0, %v2408_v21, 0.0  ;;  %v569_v25 = vpop.f32.mrb[3].mxu0  ;;  %v697_v26 = vpop.f32.mrb[3].mxu1 }
 0x118   :  { %v822_v27 = vadd.f32 %v821_v24, %v820_v23 }
 0x11c   :  { %v2416_v28 = vpop.f32.mrb[4].mxu0  ;;  %v2418_v29 = vpop.f32.mrb[4].mxu1 }
 0x11d   :  { %v823_v30 = vsel %vm819_vm0, %v2416_v28, 0.0  ;;  %v574_v31 = vpop.f32.mrb[5].mxu0  ;;  %v702_v32 = vpop.f32.mrb[5].mxu1 }
 0x11e   :  { %v824_v33 = vadd.f32 %v823_v30, %v822_v27  ;;  %v2422_v34 = vpop.f32.mrb[6].mxu0  ;;  %v2424_v35 = vpop.f32.mrb[6].mxu1 }
 0x11f   :  { %v825_v36 = vsel %vm819_vm0, %v2422_v34, 0.0  ;;  %v577_v37 = vpop.f32.mrb[7].mxu0  ;;  %v705_v38 = vpop.f32.mrb[7].mxu1 }
 0x120   :  { %v826_v39 = vadd.f32 %v825_v36, %v824_v33 }
 0x124   :  { %v2428_v40 = vpop.f32.mrb[8].mxu0  ;;  %v2430_v41 = vpop.f32.mrb[8].mxu1 }
 0x125   :  { %v827_v42 = vsel %vm819_vm0, %v2428_v40, 0.0  ;;  %v582_v43 = vpop.f32.mrb[9].mxu0  ;;  %v710_v44 = vpop.f32.mrb[9].mxu1 }
 0x126   :  { %v828_v45 = vadd.f32 %v827_v42, %v826_v39  ;;  %v2434_v46 = vpop.f32.mrb[10].mxu0  ;;  %v2436_v47 = vpop.f32.mrb[10].mxu1 }
 0x127   :  { %v829_v48 = vsel %vm819_vm0, %v2434_v46, 0.0  ;;  %v585_v49 = vpop.f32.mrb[11].mxu0  ;;  %v713_v50 = vpop.f32.mrb[11].mxu1 }
 0x128   :  { %v830_v51 = vadd.f32 %v829_v48, %v828_v45 }
 0x12c   :  { %v2440_v52 = vpop.f32.mrb[12].mxu0  ;;  %v2442_v53 = vpop.f32.mrb[12].mxu1 }
 0x12d   :  { %v831_v54 = vsel %vm819_vm0, %v2440_v52, 0.0  ;;  %v590_v55 = vpop.f32.mrb[13].mxu0  ;;  %v718_v56 = vpop.f32.mrb[13].mxu1 }
 0x12e   :  { %v832_v57 = vadd.f32 %v831_v54, %v830_v51  ;;  %v2446_v58 = vpop.f32.mrb[14].mxu0  ;;  %v2448_v59 = vpop.f32.mrb[14].mxu1 }
 0x12f   :  { %v833_v60 = vsel %vm819_vm0, %v2446_v58, 0.0  ;;  %v593_v61 = vpop.f32.mrb[15].mxu0  ;;  %v721_v62 = vpop.f32.mrb[15].mxu1 }
 0x130   :  { %v834_v63 = vadd.f32 %v833_v60, %v832_v57 }
 0x134   :  { %v2452_v0 = vpop.f32.mrb[16].mxu0  ;;  %v2454_v1 = vpop.f32.mrb[16].mxu1 }
 0x135   :  { %v835_v2 = vsel %vm819_vm0, %v2452_v0, 0.0  ;;  %v598_v3 = vpop.f32.mrb[17].mxu0  ;;  %v726_v4 = vpop.f32.mrb[17].mxu1 }
 0x136   :  { %v836_v5 = vadd.f32 %v835_v2, %v834_v63  ;;  %v2458_v6 = vpop.f32.mrb[18].mxu0  ;;  %v2460_v7 = vpop.f32.mrb[18].mxu1 }
 0x137   :  { %v837_v8 = vsel %vm819_vm0, %v2458_v6, 0.0  ;;  %v601_v9 = vpop.f32.mrb[19].mxu0  ;;  %v729_v10 = vpop.f32.mrb[19].mxu1 }
 0x138   :  { %v838_v11 = vadd.f32 %v837_v8, %v836_v5 }
 0x13c   :  { %v2464_v12 = vpop.f32.mrb[20].mxu0  ;;  %v2466_v13 = vpop.f32.mrb[20].mxu1 }
 0x13d   :  { %v839_v14 = vsel %vm819_vm0, %v2464_v12, 0.0  ;;  %v606_v15 = vpop.f32.mrb[21].mxu0  ;;  %v734_v16 = vpop.f32.mrb[21].mxu1 }
 0x13e   :  { %v840_v19 = vadd.f32 %v839_v14, %v838_v11  ;;  %v2470_v20 = vpop.f32.mrb[22].mxu0  ;;  %v2472_v23 = vpop.f32.mrb[22].mxu1 }
 0x13f   :  { %v841_v24 = vsel %vm819_vm0, %v2470_v20, 0.0  ;;  %v609_v25 = vpop.f32.mrb[23].mxu0  ;;  %v737_v26 = vpop.f32.mrb[23].mxu1 }
 0x140   :  { %v842_v27 = vadd.f32 %v841_v24, %v840_v19 }
 0x144   :  { %v2476_v30 = vpop.f32.mrb[24].mxu0  ;;  %v2478_v31 = vpop.f32.mrb[24].mxu1 }
 0x145   :  { %v843_v32 = vsel %vm819_vm0, %v2476_v30, 0.0  ;;  %v614_v33 = vpop.f32.mrb[25].mxu0  ;;  %v742_v36 = vpop.f32.mrb[25].mxu1 }
 0x146   :  { %v844_v37 = vadd.f32 %v843_v32, %v842_v27  ;;  %v2482_v38 = vpop.f32.mrb[26].mxu0  ;;  %v2484_v39 = vpop.f32.mrb[26].mxu1 }
 0x147   :  { %v845_v42 = vsel %vm819_vm0, %v2482_v38, 0.0  ;;  %v617_v43 = vpop.f32.mrb[27].mxu0  ;;  %v745_v44 = vpop.f32.mrb[27].mxu1 }
 0x148   :  { %v846_v45 = vadd.f32 %v845_v42, %v844_v37 }
 0x14c   :  { %v2488_v48 = vpop.f32.mrb[28].mxu0  ;;  %v2490_v49 = vpop.f32.mrb[28].mxu1 }
 0x14d   :  { %v847_v50 = vsel %vm819_vm0, %v2488_v48, 0.0  ;;  %v622_v51 = vpop.f32.mrb[29].mxu0  ;;  %v750_v54 = vpop.f32.mrb[29].mxu1 }
 0x14e   :  { %v848_v55 = vadd.f32 %v847_v50, %v846_v45  ;;  %v2494_v56 = vpop.f32.mrb[30].mxu0  ;;  %v2496_v57 = vpop.f32.mrb[30].mxu1 }
 0x14f   :  { %v849_v60 = vsel %vm819_vm0, %v2494_v56, 0.0  ;;  %v625_v61 = vpop.f32.mrb[31].mxu0  ;;  %v753_v62 = vpop.f32.mrb[31].mxu1 }
 0x150   :  { %v850_v63 = vadd.f32 %v849_v60, %v848_v55 }
 0x154   :  { %v2500_v2 = vpop.f32.mrb[32].mxu0  ;;  %v2502_v3 = vpop.f32.mrb[32].mxu1 }
 0x155   :  { %v851_v4 = vsel %vm819_vm0, %v2500_v2, 0.0  ;;  %v630_v5 = vpop.f32.mrb[33].mxu0  ;;  %v758_v8 = vpop.f32.mrb[33].mxu1 }
 0x156   :  { %v852_v9 = vadd.f32 %v851_v4, %v850_v63  ;;  %v2506_v10 = vpop.f32.mrb[34].mxu0  ;;  %v2508_v11 = vpop.f32.mrb[34].mxu1 }
 0x157   :  { %v853_v14 = vsel %vm819_vm0, %v2506_v10, 0.0  ;;  %v633_v15 = vpop.f32.mrb[35].mxu0  ;;  %v761_v16 = vpop.f32.mrb[35].mxu1 }
 0x158   :  { %v854_v19 = vadd.f32 %v853_v14, %v852_v9 }
 0x15c   :  { %v2512_v24 = vpop.f32.mrb[36].mxu0  ;;  %v2514_v25 = vpop.f32.mrb[36].mxu1 }
 0x15d   :  { %4206 = vst [vmem:[#allocation2_spill] sm:$0xff] %v2512_v24  ;;  %v855_v26 = vsel %vm819_vm0, %v2512_v24, 0.0  ;;  %v638_v27 = vpop.f32.mrb[37].mxu0  ;;  %v766_v32 = vpop.f32.mrb[37].mxu1 }
 0x15e   :  { %v856_v33 = vadd.f32 %v855_v26, %v854_v19  ;;  %v2518_v36 = vpop.f32.mrb[38].mxu0  ;;  %v2520_v37 = vpop.f32.mrb[38].mxu1 }
 0x15f   :  { %4207 = vst [vmem:[#allocation3_spill] sm:$0xff] %v2518_v36  ;;  %v857_v42 = vsel %vm819_vm0, %v2518_v36, 0.0  ;;  %v641_v43 = vpop.f32.mrb[39].mxu0  ;;  %v769_v44 = vpop.f32.mrb[39].mxu1 }
 0x160   :  { %v858_v45 = vadd.f32 %v857_v42, %v856_v33 }
 0x164   :  { %v2524_v50 = vpop.f32.mrb[40].mxu0  ;;  %v2526_v51 = vpop.f32.mrb[40].mxu1 }
 0x165   :  { %4208 = vst [vmem:[#allocation4_spill] sm:$0xff] %v2524_v50  ;;  %v859_v54 = vsel %vm819_vm0, %v2524_v50, 0.0  ;;  %v646_v55 = vpop.f32.mrb[41].mxu0  ;;  %v774_v60 = vpop.f32.mrb[41].mxu1 }
 0x166   :  { %v860_v61 = vadd.f32 %v859_v54, %v858_v45  ;;  %v2530_v62 = vpop.f32.mrb[42].mxu0  ;;  %v2532_v63 = vpop.f32.mrb[42].mxu1 }
 0x167   :  { %4209 = vst [vmem:[#allocation5_spill] sm:$0xff] %v2530_v62  ;;  %v861_v4 = vsel %vm819_vm0, %v2530_v62, 0.0  ;;  %v649_v5 = vpop.f32.mrb[43].mxu0  ;;  %v777_v8 = vpop.f32.mrb[43].mxu1 }
 0x168   :  { %v862_v9 = vadd.f32 %v861_v4, %v860_v61 }
 0x16c   :  { %v2536_v14 = vpop.f32.mrb[44].mxu0  ;;  %v2538_v15 = vpop.f32.mrb[44].mxu1 }
 0x16d   :  { %4210 = vst [vmem:[#allocation6_spill] sm:$0xff] %v2536_v14  ;;  %v863_v16 = vsel %vm819_vm0, %v2536_v14, 0.0  ;;  %v654_v19 = vpop.f32.mrb[45].mxu0  ;;  %v782_v26 = vpop.f32.mrb[45].mxu1 }
 0x16e   :  { %v864_v27 = vadd.f32 %v863_v16, %v862_v9  ;;  %v2542_v32 = vpop.f32.mrb[46].mxu0  ;;  %v2544_v33 = vpop.f32.mrb[46].mxu1 }
 0x16f   :  { %4211 = vst [vmem:[#allocation7_spill] sm:$0xff] %v2542_v32  ;;  %v865_v42 = vsel %vm819_vm0, %v2542_v32, 0.0  ;;  %v657_v43 = vpop.f32.mrb[47].mxu0  ;;  %v785_v44 = vpop.f32.mrb[47].mxu1 }
 0x170   :  { %v866_v45 = vadd.f32 %v865_v42, %v864_v27 }
 0x174   :  { %v2548_v54 = vpop.f32.mrb[48].mxu0  ;;  %v2550_v55 = vpop.f32.mrb[48].mxu1 }
 0x175   :  { %4212 = vst [vmem:[#allocation8_spill] sm:$0xff] %v2548_v54  ;;  %v867_v60 = vsel %vm819_vm0, %v2548_v54, 0.0  ;;  %v662_v61 = vpop.f32.mrb[49].mxu0  ;;  %v790_v4 = vpop.f32.mrb[49].mxu1 }
 0x176   :  { %v868_v5 = vadd.f32 %v867_v60, %v866_v45  ;;  %v2554_v8 = vpop.f32.mrb[50].mxu0  ;;  %v2556_v9 = vpop.f32.mrb[50].mxu1 }
 0x177   :  { %4213 = vst [vmem:[#allocation9_spill] sm:$0xff] %v2554_v8  ;;  %v869_v16 = vsel %vm819_vm0, %v2554_v8, 0.0  ;;  %v665_v19 = vpop.f32.mrb[51].mxu0  ;;  %v793_v26 = vpop.f32.mrb[51].mxu1 }
 0x178   :  { %v870_v27 = vadd.f32 %v869_v16, %v868_v5 }
 0x17c   :  { %v2560_v42 = vpop.f32.mrb[52].mxu0  ;;  %v2562_v43 = vpop.f32.mrb[52].mxu1 }
 0x17d   :  { %4214 = vst [vmem:[#allocation10_spill] sm:$0xff] %v2560_v42  ;;  %4215 = vst [vmem:[#allocation11_spill] sm:$0xff] %v2562_v43  ;;  %v871_v44 = vsel %vm819_vm0, %v2560_v42, 0.0  ;;  %v670_v61 = vpop.f32.mrb[53].mxu0  ;;  %v798_v4 = vpop.f32.mrb[53].mxu1 }
 0x17e   :  { %v872_v45 = vadd.f32 %v871_v44, %v870_v27  ;;  %v2566_v60 = vpop.f32.mrb[54].mxu0  ;;  %v2568_v54 = vpop.f32.mrb[54].mxu1 }
 0x17f   :  { %4216 = vst [vmem:[#allocation12_spill] sm:$0xff] %v2566_v60  ;;  %4217 = vst [vmem:[#allocation13_spill] sm:$0xff] %v2568_v54  ;;  %v873_v8 = vsel %vm819_vm0, %v2566_v60, 0.0  ;;  %v673_v19 = vpop.f32.mrb[55].mxu0  ;;  %v801_v26 = vpop.f32.mrb[55].mxu1 }
 0x180   :  { %v874_v5 = vadd.f32 %v873_v8, %v872_v45 }
 0x184   :  { %v2572_v16 = vpop.f32.mrb[56].mxu0  ;;  %v2574_v32 = vpop.f32.mrb[56].mxu1 }
 0x185   :  { %4218 = vst [vmem:[#allocation14_spill] sm:$0xff] %v2572_v16  ;;  %4219 = vst [vmem:[#allocation15_spill] sm:$0xff] %v2574_v32  ;;  %v875_v42 = vsel %vm819_vm0, %v2572_v16, 0.0  ;;  %v678_v61 = vpop.f32.mrb[57].mxu0  ;;  %v806_v4 = vpop.f32.mrb[57].mxu1 }
 0x186   :  { %v876_v27 = vadd.f32 %v875_v42, %v874_v5  ;;  %v2578_v44 = vpop.f32.mrb[58].mxu0  ;;  %v2580_v14 = vpop.f32.mrb[58].mxu1 }
 0x187   :  { %4220 = vst [vmem:[#allocation16_spill] sm:$0xff] %v2578_v44  ;;  %v877_v60 = vsel %vm819_vm0, %v2578_v44, 0.0  ;;  %v681_v19 = vpop.f32.mrb[59].mxu0  ;;  %v809_v26 = vpop.f32.mrb[59].mxu1 }
 0x188   :  { %v878_v8 = vadd.f32 %v877_v60, %v876_v27  ;;  %v883_v27 = vsel %vm819_vm0, %v2406_v18, 0.0 }
 0x18c   :  { %v2584_v45 = vpop.f32.mrb[60].mxu0  ;;  %v2586_v62 = vpop.f32.mrb[60].mxu1 }
 0x18d   :  { %4221 = vst [vmem:[#allocation17_spill] sm:$0xff] %v2584_v45  ;;  %v879_v16 = vsel %vm819_vm0, %v2584_v45, 0.0  ;;  %v686_v61 = vpop.f32.mrb[61].mxu0  ;;  %v814_v4 = vpop.f32.mrb[61].mxu1  ;;  %v885_v45 = vsel %vm819_vm0, %v2410_v22, 0.0 }
 0x18e   :  { %v880_v42 = vadd.f32 %v879_v16, %v878_v8  ;;  %v2590_v5 = vpop.f32.mrb[62].mxu0  ;;  %v2592_v50 = vpop.f32.mrb[62].mxu1  ;;  %v887_v16 = vsel %vm819_vm0, %v2418_v29, 0.0  ;;  %v889_v4 = vsel %vm819_vm0, %v2424_v35, 0.0 }
 0x18f   :  { %v881_v44 = vsel %vm819_vm0, %v2590_v5, 0.0  ;;  %v689_v19 = vpop.f32.mrb[63].mxu0  ;;  %v817_v26 = vpop.f32.mrb[63].mxu1 }
 0x190   :  { %v882_v60 = vadd.f32 %v881_v44, %v880_v42  ;;  %v891_v19 = vsel %vm819_vm0, %v2430_v41, 0.0  ;;  %v893_v42 = vsel %vm819_vm0, %v2436_v47, 0.0 }
 0x192   :  { %v884_v36 = vadd.f32 %v883_v27, %v882_v60  ;;  %v895_v60 = vsel %vm819_vm0, %v2442_v53, 0.0 }
 0x194   :  { %v886_v61 = vadd.f32 %v885_v45, %v884_v36  ;;  %v897_v45 = vsel %vm819_vm0, %v2448_v59, 0.0 }
 0x196   :  { %v888_v8 = vadd.f32 %v887_v16, %v886_v61  ;;  %v899_v61 = vsel %vm819_vm0, %v2454_v1, 0.0 }
 0x198   :  { %v890_v24 = vadd.f32 %v889_v4, %v888_v8  ;;  %v901_v8 = vsel %vm819_vm0, %v2460_v7, 0.0  ;;  %v903_v4 = vsel %vm819_vm0, %v2466_v13, 0.0 }
 0x19a   :  { %v892_v44 = vadd.f32 %v891_v19, %v890_v24 }
 0x19c   :  { %v894_v26 = vadd.f32 %v893_v42, %v892_v44  ;;  %v905_v44 = vsel %vm819_vm0, %v2472_v23, 0.0 }
 0x19e   :  { %v896_v36 = vadd.f32 %v895_v60, %v894_v26  ;;  %v907_v26 = vsel %vm819_vm0, %v2478_v31, 0.0 }
 0x1a0   :  { %v898_v27 = vadd.f32 %v897_v45, %v896_v36  ;;  %v909_v36 = vsel %vm819_vm0, %v2484_v39, 0.0 }
 0x1a2   :  { %v900_v16 = vadd.f32 %v899_v61, %v898_v27  ;;  %v911_v27 = vsel %vm819_vm0, %v2490_v49, 0.0 }
 0x1a4   :  { %v902_v24 = vadd.f32 %v901_v8, %v900_v16  ;;  %v913_v16 = vsel %vm819_vm0, %v2496_v57, 0.0 }
 0x1a6   :  { %v904_v19 = vadd.f32 %v903_v4, %v902_v24  ;;  %v915_v24 = vsel %vm819_vm0, %v2502_v3, 0.0 }
 0x1a8   :  { %v906_v42 = vadd.f32 %v905_v44, %v904_v19  ;;  %v917_v19 = vsel %vm819_vm0, %v2508_v11, 0.0 }
 0x1aa   :  { %v908_v60 = vadd.f32 %v907_v26, %v906_v42  ;;  %v919_v42 = vsel %vm819_vm0, %v2514_v25, 0.0 }
 0x1ac   :  { %v910_v45 = vadd.f32 %v909_v36, %v908_v60  ;;  %v921_v60 = vsel %vm819_vm0, %v2520_v37, 0.0 }
 0x1ae   :  { %v912_v61 = vadd.f32 %v911_v27, %v910_v45  ;;  %v923_v45 = vsel %vm819_vm0, %v2526_v51, 0.0 }
 0x1b0   :  { %v914_v8 = vadd.f32 %v913_v16, %v912_v61  ;;  %v925_v61 = vsel %vm819_vm0, %v2532_v63, 0.0 }
 0x1b2   :  { %v916_v4 = vadd.f32 %v915_v24, %v914_v8  ;;  %v927_v8 = vsel %vm819_vm0, %v2538_v15, 0.0 }
 0x1b4   :  { %v918_v44 = vadd.f32 %v917_v19, %v916_v4  ;;  %v929_v4 = vsel %vm819_vm0, %v2544_v33, 0.0 }
 0x1b6   :  { %v920_v26 = vadd.f32 %v919_v42, %v918_v44  ;;  %v931_v44 = vsel %vm819_vm0, %v2550_v55, 0.0 }
 0x1b8   :  { %v922_v36 = vadd.f32 %v921_v60, %v920_v26  ;;  %v933_v26 = vsel %vm819_vm0, %v2556_v9, 0.0 }
 0x1ba   :  { %v924_v27 = vadd.f32 %v923_v45, %v922_v36  ;;  %v935_v36 = vsel %vm819_vm0, %v2562_v43, 0.0 }
 0x1bc   :  { %v926_v16 = vadd.f32 %v925_v61, %v924_v27  ;;  %v937_v27 = vsel %vm819_vm0, %v2568_v54, 0.0 }
 0x1be   :  { %v928_v24 = vadd.f32 %v927_v8, %v926_v16  ;;  %v939_v16 = vsel %vm819_vm0, %v2574_v32, 0.0 }
 0x1c0   :  { %v930_v19 = vadd.f32 %v929_v4, %v928_v24  ;;  %v941_v24 = vsel %vm819_vm0, %v2580_v14, 0.0  ;;  %v943_v4 = vsel %vm819_vm0, %v2586_v62, 0.0 }
 0x1c2   :  { %v932_v42 = vadd.f32 %v931_v44, %v930_v19 }
 0x1c4   :  { %v934_v60 = vadd.f32 %v933_v26, %v932_v42  ;;  %v945_v42 = vsel %vm819_vm0, %v2592_v50, 0.0 }
 0x1c6   :  { %v936_v45 = vadd.f32 %v935_v36, %v934_v60 }
 0x1c8   :  { %v938_v61 = vadd.f32 %v937_v27, %v936_v45 }
 0x1ca   :  { %v940_v8 = vadd.f32 %v939_v16, %v938_v61 }
 0x1cc   :  { %v942_v19 = vadd.f32 %v941_v24, %v940_v8 }
 0x1ce   :  { %v944_v44 = vadd.f32 %v943_v4, %v942_v19  ;;  %v4227_v4 = vld [vmem:[#allocation3_spill] sm:$0xff]  ;;  %v4229_v19 = vld [vmem:[#allocation4_spill] sm:$0xff] }
 0x1d0   :  { %v946_v26 = vadd.f32 %v945_v42, %v944_v44  ;;  %v4231_v44 = vld [vmem:[#allocation5_spill] sm:$0xff]  ;;  %v4233_v42 = vld [vmem:[#allocation6_spill] sm:$0xff] }
 0x1d2   :  { %v947_v60 = vrot.slane %v946_v26, 4 }
 0x1d4   :  { %v948_v36 = vadd.f32 %v947_v60, %v946_v26  ;;  %v4235_v26 = vld [vmem:[#allocation7_spill] sm:$0xff] }
 0x1d6   :  { %v949_v54 = vrot.slane %v948_v36, 2 }
 0x1d8   :  { %v950_v45 = vadd.f32 %v949_v54, %v948_v36  ;;  %v4237_v36 = vld [vmem:[#allocation8_spill] sm:$0xff] }
 0x1da   :  { %v951_v27 = vrot.slane %v950_v45, 1 }
 0x1dc   :  { %v952_v43 = vadd.f32 %v951_v27, %v950_v45  ;;  %v4239_v27 = vld [vmem:[#allocation9_spill] sm:$0xff] }
 0x1de   :  { %v2660_v32 = vmul.f32 0.001953125, %v952_v43  ;;  %v4226_v43 = vld [vmem:[#allocation2_spill] sm:$0xff] }
 0x1e0   :  { %v2664_v61 = vsub.f32 %v2404_v17, %v2660_v32  ;;  %v2668_v16 = vsub.f32 %v2408_v21, %v2660_v32  ;;  %v2672_v8 = vsub.f32 %v2416_v28, %v2660_v32  ;;  %v2676_v24 = vsub.f32 %v2422_v34, %v2660_v32 }
 0x1e1   :  { %v2680_v54 = vsub.f32 %v2428_v40, %v2660_v32  ;;  %v2684_v17 = vsub.f32 %v2434_v46, %v2660_v32  ;;  %v2688_v21 = vsub.f32 %v2440_v52, %v2660_v32  ;;  %v2692_v28 = vsub.f32 %v2446_v58, %v2660_v32 }
 0x1e2   :  { %4222 = vst [vmem:[#allocation18_spill] sm:$0xff] %v2664_v61  ;;  %4223 = vst [vmem:[#allocation19_spill] sm:$0xff] %v2668_v16  ;;  %v2696_v34 = vsub.f32 %v2452_v0, %v2660_v32  ;;  %v2700_v40 = vsub.f32 %v2458_v6, %v2660_v32  ;;  %v2704_v46 = vsub.f32 %v2464_v12, %v2660_v32 }
 0x1e3   :  { %4224 = vst [vmem:[#allocation20_spill] sm:$0xff] %v2672_v8  ;;  %4225 = vst [vmem:[#allocation21_spill] sm:$0xff] %v2676_v24  ;;  %v2708_v52 = vsub.f32 %v2470_v20, %v2660_v32  ;;  %v2712_v58 = vsub.f32 %v2476_v30, %v2660_v32  ;;  %v2716_v0 = vsub.f32 %v2482_v38, %v2660_v32 }
 0x1e4   :  { %v2720_v6 = vsub.f32 %v2488_v48, %v2660_v32  ;;  %v2724_v12 = vsub.f32 %v2494_v56, %v2660_v32  ;;  %v2728_v20 = vsub.f32 %v2500_v2, %v2660_v32  ;;  %v2732_v30 = vsub.f32 %v2506_v10, %v2660_v32 }
 0x1e5   :  { %v2736_v38 = vsub.f32 %v4226_v43, %v2660_v32  ;;  %v2740_v48 = vsub.f32 %v4227_v4, %v2660_v32  ;;  %v2744_v56 = vsub.f32 %v4229_v19, %v2660_v32  ;;  %v2748_v2 = vsub.f32 %v4231_v44, %v2660_v32  ;;  %v4240_v4 = vld [vmem:[#allocation10_spill] sm:$0xff]  ;;  %v4241_v44 = vld [vmem:[#allocation12_spill] sm:$0xff] }
 0x1e6   :  { %v2752_v10 = vsub.f32 %v4233_v42, %v2660_v32  ;;  %v2756_v60 = vsub.f32 %v4235_v26, %v2660_v32  ;;  %v2760_v45 = vsub.f32 %v4237_v36, %v2660_v32  ;;  %v2764_v43 = vsub.f32 %v4239_v27, %v2660_v32 }
 0x1e7   :  { %4228 = vst [vmem:[#allocation2_spill] sm:$0xff] %v2740_v48  ;;  %4230 = vst [vmem:[#allocation3_spill] sm:$0xff] %v2744_v56  ;;  %v2768_v19 = vsub.f32 %v4240_v4, %v2660_v32  ;;  %v2772_v42 = vsub.f32 %v4241_v44, %v2660_v32  ;;  %v2788_v4 = vsub.f32 %v2590_v5, %v2660_v32 }
 0x1e8   :  { %4232 = vst [vmem:[#allocation4_spill] sm:$0xff] %v2748_v2  ;;  %4234 = vst [vmem:[#allocation5_spill] sm:$0xff] %v2752_v10  ;;  %v4242_v10 = vld [vmem:[#allocation14_spill] sm:$0xff]  ;;  %v2792_v44 = vsub.f32 %v2406_v18, %v2660_v32  ;;  %v2808_v5 = vsub.f32 %v2430_v41, %v2660_v32  ;;  %v2812_v18 = vsub.f32 %v2436_v47, %v2660_v32 }
 0x1e9   :  { %4236 = vst [vmem:[#allocation6_spill] sm:$0xff] %v2756_v60  ;;  %4238 = vst [vmem:[#allocation7_spill] sm:$0xff] %v2760_v45  ;;  %v2776_v26 = vsub.f32 %v4242_v10, %v2660_v32  ;;  %v4243_v60 = vld [vmem:[#allocation16_spill] sm:$0xff]  ;;  %v4244_v45 = vld [vmem:[#allocation17_spill] sm:$0xff]  ;;  %v2796_v10 = vsub.f32 %v2410_v22, %v2660_v32  ;;  %v2816_v22 = vsub.f32 %v2442_v53, %v2660_v32 }
 0x1ea   :  { %v2780_v36 = vsub.f32 %v4243_v60, %v2660_v32  ;;  %v2784_v27 = vsub.f32 %v4244_v45, %v2660_v32  ;;  %v2800_v60 = vsub.f32 %v2418_v29, %v2660_v32  ;;  %v2804_v45 = vsub.f32 %v2424_v35, %v2660_v32 }
 0x1eb   :  { %v2820_v29 = vsub.f32 %v2448_v59, %v2660_v32  ;;  %v2824_v35 = vsub.f32 %v2454_v1, %v2660_v32  ;;  %v2828_v41 = vsub.f32 %v2460_v7, %v2660_v32  ;;  %v2832_v47 = vsub.f32 %v2466_v13, %v2660_v32 }
 0x1ec   :  { %v2836_v53 = vsub.f32 %v2472_v23, %v2660_v32  ;;  %v2840_v59 = vsub.f32 %v2478_v31, %v2660_v32  ;;  %v2844_v1 = vsub.f32 %v2484_v39, %v2660_v32  ;;  %v2848_v7 = vsub.f32 %v2490_v49, %v2660_v32 }
 0x1ed   :  { %v2852_v13 = vsub.f32 %v2496_v57, %v2660_v32  ;;  %v2856_v23 = vsub.f32 %v2502_v3, %v2660_v32  ;;  %v2860_v31 = vsub.f32 %v2508_v11, %v2660_v32  ;;  %v2864_v39 = vsub.f32 %v2514_v25, %v2660_v32 }
 0x1ee   :  { %v2868_v49 = vsub.f32 %v2520_v37, %v2660_v32  ;;  %v2872_v57 = vsub.f32 %v2526_v51, %v2660_v32  ;;  %v2876_v3 = vsub.f32 %v2532_v63, %v2660_v32  ;;  %v2880_v11 = vsub.f32 %v2538_v15, %v2660_v32 }
 0x1ef   :  { %4245 = vst [vmem:[#allocation8_spill] sm:$0xff] %v2860_v31  ;;  %4246 = vst [vmem:[#allocation9_spill] sm:$0xff] %v2864_v39  ;;  %v2884_v25 = vsub.f32 %v2544_v33, %v2660_v32  ;;  %v2888_v37 = vsub.f32 %v2550_v55, %v2660_v32  ;;  %v2892_v51 = vsub.f32 %v2556_v9, %v2660_v32 }
 0x1f0   :  { %4247 = vst [vmem:[#allocation10_spill] sm:$0xff] %v2868_v49  ;;  %4248 = vst [vmem:[#allocation12_spill] sm:$0xff] %v2872_v57  ;;  %v4254_v57 = vld [vmem:[#allocation11_spill] sm:$0xff]  ;;  %v2908_v55 = vsub.f32 %v2580_v14, %v2660_v32  ;;  %v2912_v9 = vsub.f32 %v2586_v62, %v2660_v32  ;;  %v1021_v14 = vmul.f32 %v2676_v24, %v2676_v24 }
 0x1f1   :  { %4249 = vst [vmem:[#allocation14_spill] sm:$0xff] %v2876_v3  ;;  %4250 = vst [vmem:[#allocation16_spill] sm:$0xff] %v2880_v11  ;;  %v2896_v63 = vsub.f32 %v4254_v57, %v2660_v32  ;;  %v4256_v3 = vld [vmem:[#allocation13_spill] sm:$0xff]  ;;  %v4258_v11 = vld [vmem:[#allocation15_spill] sm:$0xff]  ;;  %v2916_v57 = vsub.f32 %v2592_v50, %v2660_v32  ;;  %v1022_v50 = vmul.f32 %v2680_v54, %v2680_v54 }
 0x1f2   :  { %4251 = vst [vmem:[#allocation17_spill] sm:$0xff] %v2884_v25  ;;  %4252 = vst [vmem:[#allocation22_spill] sm:$0xff] %v2888_v37  ;;  %v2900_v15 = vsub.f32 %v4256_v3, %v2660_v32  ;;  %v2904_v33 = vsub.f32 %v4258_v11, %v2660_v32  ;;  %v1018_v3 = vmul.f32 %v2664_v61, %v2664_v61 }
 0x1f3   :  { %4253 = vst [vmem:[#allocation23_spill] sm:$0xff] %v2892_v51  ;;  %4255 = vst [vmem:[#allocation11_spill] sm:$0xff] %v2896_v63  ;;  %v1020_v11 = vmul.f32 %v2672_v8, %v2672_v8  ;;  %v1024_v24 = vmul.f32 %v2688_v21, %v2688_v21 }
 0x1f4   :  { %4257 = vst [vmem:[#allocation13_spill] sm:$0xff] %v2900_v15  ;;  %4259 = vst [vmem:[#allocation15_spill] sm:$0xff] %v2904_v33  ;;  %v1019_v15 = vmul.f32 %v2668_v16, %v2668_v16  ;;  %v1023_v16 = vmul.f32 %v2684_v17, %v2684_v17 }
 0x1f5   :  { %4260 = vst [vmem:[#allocation24_spill] sm:$0xff] %v2908_v55  ;;  %4261 = vst [vmem:[#allocation25_spill] sm:$0xff] %v2912_v9  ;;  %v1082_v55 = vsel %vm819_vm0, %v1018_v3, 0.0  ;;  %v1085_v32 = vsel %vm819_vm0, %v1020_v11, 0.0  ;;  %v1089_v3 = vsel %vm819_vm0, %v1022_v50, 0.0  ;;  %v1093_v11 = vsel %vm819_vm0, %v1024_v24, 0.0 }
 0x1f6   :  { %4262 = vst [vmem:[#allocation26_spill] sm:$0xff] %v2916_v57  ;;  %v1083_v62 = vsel %vm819_vm0, %v1019_v15, 0.0  ;;  %v1087_v57 = vsel %vm819_vm0, %v1021_v14, 0.0  ;;  %v1025_v15 = vmul.f32 %v2692_v28, %v2692_v28  ;;  %v1030_v24 = vmul.f32 %v2712_v58, %v2712_v58 }
 0x1f7   :  { %v1084_v9 = vadd.f32 %v1083_v62, %v1082_v55  ;;  %v1091_v55 = vsel %vm819_vm0, %v1023_v16, 0.0  ;;  %v1029_v16 = vmul.f32 %v2708_v52, %v2708_v52 }
 0x1f9   :  { %v1086_v61 = vadd.f32 %v1085_v32, %v1084_v9  ;;  %v1026_v9 = vmul.f32 %v2696_v34, %v2696_v34 }
 0x1fb   :  { %v1088_v8 = vadd.f32 %v1087_v57, %v1086_v61  ;;  %v1027_v61 = vmul.f32 %v2700_v40, %v2700_v40  ;;  %v1095_v57 = vsel %vm819_vm0, %v1025_v15, 0.0  ;;  %v1097_v50 = vsel %vm819_vm0, %v1026_v9, 0.0 }
 0x1fc   :  { %v1031_v15 = vmul.f32 %v2716_v0, %v2716_v0  ;;  %v1032_v9 = vmul.f32 %v2720_v6, %v2720_v6 }
 0x1fd   :  { %v1090_v33 = vadd.f32 %v1089_v3, %v1088_v8  ;;  %v1028_v8 = vmul.f32 %v2704_v46, %v2704_v46 }
 0x1ff   :  { %v1092_v62 = vadd.f32 %v1091_v55, %v1090_v33  ;;  %v1099_v33 = vsel %vm819_vm0, %v1027_v61, 0.0  ;;  %v1033_v61 = vmul.f32 %v2724_v12, %v2724_v12 }
 0x201   :  { %v1094_v32 = vadd.f32 %v1093_v11, %v1092_v62  ;;  %v1101_v62 = vsel %vm819_vm0, %v1028_v8, 0.0  ;;  %v1034_v8 = vmul.f32 %v2728_v20, %v2728_v20 }
 0x203   :  { %v1096_v14 = vadd.f32 %v1095_v57, %v1094_v32  ;;  %v1103_v32 = vsel %vm819_vm0, %v1029_v16, 0.0  ;;  %v1035_v16 = vmul.f32 %v2732_v30, %v2732_v30 }
 0x205   :  { %v1098_v3 = vadd.f32 %v1097_v50, %v1096_v14  ;;  %v1105_v14 = vsel %vm819_vm0, %v1030_v24, 0.0  ;;  %v1036_v24 = vmul.f32 %v2736_v38, %v2736_v38 }
 0x207   :  { %v1100_v55 = vadd.f32 %v1099_v33, %v1098_v3  ;;  %v1107_v3 = vsel %vm819_vm0, %v1031_v15, 0.0  ;;  %v1037_v15 = vmul.f32 %v2740_v48, %v2740_v48 }
 0x209   :  { %v1102_v11 = vadd.f32 %v1101_v62, %v1100_v55  ;;  %v1109_v55 = vsel %vm819_vm0, %v1032_v9, 0.0  ;;  %v1038_v9 = vmul.f32 %v2744_v56, %v2744_v56 }
 0x20b   :  { %v1104_v57 = vadd.f32 %v1103_v32, %v1102_v11  ;;  %v1111_v11 = vsel %vm819_vm0, %v1033_v61, 0.0  ;;  %v1039_v61 = vmul.f32 %v2748_v2, %v2748_v2 }
 0x20d   :  { %v1106_v50 = vadd.f32 %v1105_v14, %v1104_v57  ;;  %v1113_v57 = vsel %vm819_vm0, %v1034_v8, 0.0  ;;  %v4263_v8 = vld [vmem:[#allocation5_spill] sm:$0xff] }
 0x20f   :  { %v1108_v33 = vadd.f32 %v1107_v3, %v1106_v50  ;;  %v1115_v50 = vsel %vm819_vm0, %v1035_v16, 0.0  ;;  %v4264_v16 = vld [vmem:[#allocation6_spill] sm:$0xff] }
 0x211   :  { %v1110_v62 = vadd.f32 %v1109_v55, %v1108_v33  ;;  %v1117_v33 = vsel %vm819_vm0, %v1036_v24, 0.0  ;;  %v4265_v24 = vld [vmem:[#allocation7_spill] sm:$0xff] }
 0x213   :  { %v1112_v32 = vadd.f32 %v1111_v11, %v1110_v62  ;;  %v1119_v62 = vsel %vm819_vm0, %v1037_v15, 0.0  ;;  %v1043_v15 = vmul.f32 %v2764_v43, %v2764_v43 }
 0x215   :  { %v1114_v14 = vadd.f32 %v1113_v57, %v1112_v32  ;;  %v1040_v32 = vmul.f32 %v4263_v8, %v4263_v8  ;;  %v1121_v57 = vsel %vm819_vm0, %v1038_v9, 0.0  ;;  %v1044_v9 = vmul.f32 %v2768_v19, %v2768_v19 }
 0x217   :  { %v1116_v3 = vadd.f32 %v1115_v50, %v1114_v14  ;;  %v1041_v14 = vmul.f32 %v4264_v16, %v4264_v16  ;;  %v1123_v50 = vsel %vm819_vm0, %v1039_v61, 0.0  ;;  %v1131_v61 = vsel %vm819_vm0, %v1043_v15, 0.0 }
 0x218   :  { %v1049_v15 = vmul.f32 %v2788_v4, %v2788_v4 }
 0x219   :  { %v1118_v55 = vadd.f32 %v1117_v33, %v1116_v3  ;;  %v1042_v3 = vmul.f32 %v4265_v24, %v4265_v24  ;;  %v1125_v33 = vsel %vm819_vm0, %v1040_v32, 0.0  ;;  %v1133_v32 = vsel %vm819_vm0, %v1044_v9, 0.0 }
 0x21a   :  { %v1050_v9 = vmul.f32 %v2792_v44, %v2792_v44 }
 0x21b   :  { %v1120_v11 = vadd.f32 %v1119_v62, %v1118_v55  ;;  %v1127_v55 = vsel %vm819_vm0, %v1041_v14, 0.0 }
 0x21d   :  { %v1122_v48 = vadd.f32 %v1121_v57, %v1120_v11  ;;  %v1129_v11 = vsel %vm819_vm0, %v1042_v3, 0.0  ;;  %v1048_v3 = vmul.f32 %v2784_v27, %v2784_v27 }
 0x21f   :  { %v1124_v56 = vadd.f32 %v1123_v50, %v1122_v48  ;;  %v1045_v48 = vmul.f32 %v2772_v42, %v2772_v42 }
 0x221   :  { %v1126_v2 = vadd.f32 %v1125_v33, %v1124_v56  ;;  %v1046_v56 = vmul.f32 %v2776_v26, %v2776_v26  ;;  %v1135_v14 = vsel %vm819_vm0, %v1045_v48, 0.0  ;;  %v1051_v48 = vmul.f32 %v2796_v10, %v2796_v10 }
 0x223   :  { %v1128_v62 = vadd.f32 %v1127_v55, %v1126_v2  ;;  %v1047_v2 = vmul.f32 %v2780_v36, %v2780_v36 }
 0x225   :  { %v1130_v57 = vadd.f32 %v1129_v11, %v1128_v62  ;;  %v1137_v62 = vsel %vm819_vm0, %v1046_v56, 0.0  ;;  %v1052_v56 = vmul.f32 %v2800_v60, %v2800_v60 }
 0x227   :  { %v1132_v50 = vadd.f32 %v1131_v61, %v1130_v57  ;;  %v1139_v57 = vsel %vm819_vm0, %v1047_v2, 0.0  ;;  %v1053_v2 = vmul.f32 %v2804_v45, %v2804_v45 }
 0x229   :  { %v1134_v33 = vadd.f32 %v1133_v32, %v1132_v50  ;;  %v1141_v50 = vsel %vm819_vm0, %v1048_v3, 0.0  ;;  %v1054_v3 = vmul.f32 %v2808_v5, %v2808_v5 }
 0x22b   :  { %v1136_v55 = vadd.f32 %v1135_v14, %v1134_v33  ;;  %v1143_v33 = vsel %vm819_vm0, %v1049_v15, 0.0  ;;  %v1055_v15 = vmul.f32 %v2812_v18, %v2812_v18 }
 0x22d   :  { %v1138_v11 = vadd.f32 %v1137_v62, %v1136_v55  ;;  %v1145_v55 = vsel %vm819_vm0, %v1050_v9, 0.0  ;;  %v1056_v9 = vmul.f32 %v2816_v22, %v2816_v22 }
 0x22f   :  { %v1140_v61 = vadd.f32 %v1139_v57, %v1138_v11  ;;  %v1147_v11 = vsel %vm819_vm0, %v1051_v48, 0.0  ;;  %v1057_v48 = vmul.f32 %v2820_v29, %v2820_v29 }
 0x231   :  { %v1142_v32 = vadd.f32 %v1141_v50, %v1140_v61  ;;  %v1149_v61 = vsel %vm819_vm0, %v1052_v56, 0.0  ;;  %v1058_v56 = vmul.f32 %v2824_v35, %v2824_v35 }
 0x233   :  { %v1144_v14 = vadd.f32 %v1143_v33, %v1142_v32  ;;  %v1151_v32 = vsel %vm819_vm0, %v1053_v2, 0.0  ;;  %v1059_v2 = vmul.f32 %v2828_v41, %v2828_v41 }
 0x235   :  { %v1146_v62 = vadd.f32 %v1145_v55, %v1144_v14  ;;  %v1153_v14 = vsel %vm819_vm0, %v1054_v3, 0.0  ;;  %v1060_v3 = vmul.f32 %v2832_v47, %v2832_v47 }
 0x237   :  { %v1148_v57 = vadd.f32 %v1147_v11, %v1146_v62  ;;  %v1155_v62 = vsel %vm819_vm0, %v1055_v15, 0.0  ;;  %v1061_v15 = vmul.f32 %v2836_v53, %v2836_v53 }
 0x239   :  { %v1150_v50 = vadd.f32 %v1149_v61, %v1148_v57  ;;  %v1157_v57 = vsel %vm819_vm0, %v1056_v9, 0.0  ;;  %v1062_v9 = vmul.f32 %v2840_v59, %v2840_v59 }
 0x23b   :  { %v1152_v33 = vadd.f32 %v1151_v32, %v1150_v50  ;;  %v1159_v50 = vsel %vm819_vm0, %v1057_v48, 0.0  ;;  %v1063_v48 = vmul.f32 %v2844_v1, %v2844_v1 }
 0x23d   :  { %v1154_v55 = vadd.f32 %v1153_v14, %v1152_v33  ;;  %v1161_v33 = vsel %vm819_vm0, %v1058_v56, 0.0  ;;  %v1064_v56 = vmul.f32 %v2848_v7, %v2848_v7 }
 0x23f   :  { %v1156_v11 = vadd.f32 %v1155_v62, %v1154_v55  ;;  %v1163_v55 = vsel %vm819_vm0, %v1059_v2, 0.0  ;;  %v1065_v2 = vmul.f32 %v2852_v13, %v2852_v13 }
 0x241   :  { %v1158_v61 = vadd.f32 %v1157_v57, %v1156_v11  ;;  %v1165_v11 = vsel %vm819_vm0, %v1060_v3, 0.0  ;;  %v1066_v3 = vmul.f32 %v2856_v23, %v2856_v23 }
 0x243   :  { %v1160_v32 = vadd.f32 %v1159_v50, %v1158_v61  ;;  %v1167_v61 = vsel %vm819_vm0, %v1061_v15, 0.0  ;;  %v1067_v15 = vmul.f32 %v2860_v31, %v2860_v31 }
 0x245   :  { %v1162_v14 = vadd.f32 %v1161_v33, %v1160_v32  ;;  %v1169_v32 = vsel %vm819_vm0, %v1062_v9, 0.0  ;;  %v1068_v9 = vmul.f32 %v2864_v39, %v2864_v39 }
 0x247   :  { %v1164_v62 = vadd.f32 %v1163_v55, %v1162_v14  ;;  %v1171_v14 = vsel %vm819_vm0, %v1063_v48, 0.0  ;;  %v1069_v48 = vmul.f32 %v2868_v49, %v2868_v49 }
 0x249   :  { %v1166_v57 = vadd.f32 %v1165_v11, %v1164_v62  ;;  %v1173_v62 = vsel %vm819_vm0, %v1064_v56, 0.0  ;;  %v4266_v56 = vld [vmem:[#allocation12_spill] sm:$0xff] }
 0x24b   :  { %v1168_v50 = vadd.f32 %v1167_v61, %v1166_v57  ;;  %v1175_v57 = vsel %vm819_vm0, %v1065_v2, 0.0  ;;  %v4267_v2 = vld [vmem:[#allocation14_spill] sm:$0xff] }
 0x24d   :  { %v1170_v33 = vadd.f32 %v1169_v32, %v1168_v50  ;;  %v1177_v50 = vsel %vm819_vm0, %v1066_v3, 0.0  ;;  %v4268_v3 = vld [vmem:[#allocation16_spill] sm:$0xff] }
 0x24f   :  { %v1172_v55 = vadd.f32 %v1171_v14, %v1170_v33  ;;  %v1179_v33 = vsel %vm819_vm0, %v1067_v15, 0.0  ;;  %v1073_v15 = vmul.f32 %v2884_v25, %v2884_v25 }
 0x251   :  { %v1174_v11 = vadd.f32 %v1173_v62, %v1172_v55  ;;  %v1070_v55 = vmul.f32 %v4266_v56, %v4266_v56  ;;  %v1181_v62 = vsel %vm819_vm0, %v1068_v9, 0.0  ;;  %v1074_v9 = vmul.f32 %v2888_v37, %v2888_v37 }
 0x253   :  { %v1176_v61 = vadd.f32 %v1175_v57, %v1174_v11  ;;  %v1071_v11 = vmul.f32 %v4267_v2, %v4267_v2  ;;  %v1183_v57 = vsel %vm819_vm0, %v1069_v48, 0.0  ;;  %v1191_v48 = vsel %vm819_vm0, %v1073_v15, 0.0  ;;  %v4271_v15 = vld [vmem:[#allocation24_spill] sm:$0xff] }
 0x255   :  { %v1178_v32 = vadd.f32 %v1177_v50, %v1176_v61  ;;  %v1072_v61 = vmul.f32 %v4268_v3, %v4268_v3  ;;  %v1185_v50 = vsel %vm819_vm0, %v1070_v55, 0.0  ;;  %v1193_v55 = vsel %vm819_vm0, %v1074_v9, 0.0  ;;  %v4272_v9 = vld [vmem:[#allocation25_spill] sm:$0xff] }
 0x257   :  { %v1180_v14 = vadd.f32 %v1179_v33, %v1178_v32  ;;  %v1187_v32 = vsel %vm819_vm0, %v1071_v11, 0.0  ;;  %v4269_v11 = vld [vmem:[#allocation13_spill] sm:$0xff] }
 0x259   :  { %v1182_v31 = vadd.f32 %v1181_v62, %v1180_v14  ;;  %v1189_v14 = vsel %vm819_vm0, %v1072_v61, 0.0  ;;  %v4270_v61 = vld [vmem:[#allocation15_spill] sm:$0xff] }
 0x25b   :  { %v1184_v39 = vadd.f32 %v1183_v57, %v1182_v31  ;;  %v1075_v31 = vmul.f32 %v2892_v51, %v2892_v51 }
 0x25d   :  { %v1186_v49 = vadd.f32 %v1185_v50, %v1184_v39  ;;  %v1076_v39 = vmul.f32 %v2896_v63, %v2896_v63 }
 0x25f   :  { %v1188_v33 = vadd.f32 %v1187_v32, %v1186_v49  ;;  %v1077_v49 = vmul.f32 %v4269_v11, %v4269_v11  ;;  %v1195_v32 = vsel %vm819_vm0, %v1075_v31, 0.0  ;;  %v4273_v31 = vld [vmem:[#allocation26_spill] sm:$0xff] }
 0x261   :  { %v1190_v62 = vadd.f32 %v1189_v14, %v1188_v33  ;;  %v1078_v33 = vmul.f32 %v4270_v61, %v4270_v61  ;;  %v1197_v14 = vsel %vm819_vm0, %v1076_v39, 0.0 }
 0x263   :  { %v1192_v57 = vadd.f32 %v1191_v48, %v1190_v62  ;;  %v1079_v62 = vmul.f32 %v4271_v15, %v4271_v15  ;;  %v1199_v48 = vsel %vm819_vm0, %v1077_v49, 0.0 }
 0x265   :  { %v1194_v50 = vadd.f32 %v1193_v55, %v1192_v57  ;;  %v1080_v57 = vmul.f32 %v4272_v9, %v4272_v9  ;;  %v1201_v55 = vsel %vm819_vm0, %v1078_v33, 0.0 }
 0x267   :  { %v1196_v37 = vadd.f32 %v1195_v32, %v1194_v50  ;;  %v1081_v50 = vmul.f32 %v4273_v31, %v4273_v31  ;;  %v1203_v32 = vsel %vm819_vm0, %v1079_v62, 0.0 }
 0x269   :  { %v1198_v51 = vadd.f32 %v1197_v14, %v1196_v37  ;;  %v1205_v37 = vsel %vm819_vm0, %v1080_v57, 0.0  ;;  %v1207_v14 = vsel %vm819_vm0, %v1081_v50, 0.0 }
 0x26b   :  { %v1200_v63 = vadd.f32 %v1199_v48, %v1198_v51 }
 0x26d   :  { %v1202_v11 = vadd.f32 %v1201_v55, %v1200_v63  ;;  %v1221_v55 = vlaneseq }
 0x26f   :  { %v1204_v61 = vadd.f32 %v1203_v32, %v1202_v11  ;;  %v1222_v31 = vshrl.u32 %v1221_v55, 7  ;;  %v1216_v11 = vld [vmem:[%s4146_s2] sm:$0x1]  ;;  %v4279_v55 = vld [vmem:[#allocation3_spill] sm:$0xff] }
 0x270   :  { %v4274_v32 = vld [vmem:[#allocation18_spill] sm:$0xff] }
 0x271   :  { %v1206_v39 = vadd.f32 %v1205_v37, %v1204_v61  ;;  %v1223_v62 = vsub.s32 0, %v1222_v31  ;;  %v4275_v37 = vld [vmem:[#allocation19_spill] sm:$0xff] }
 0x273   :  { %v1208_v15 = vadd.f32 %v1207_v14, %v1206_v39  ;;  %v4277_v39 = vld [vmem:[#allocation21_spill] sm:$0xff] }
 0x275   :  { %v1209_v49 = vrot.slane %v1208_v15, 4 }
 0x277   :  { %v1210_v51 = vadd.f32 %v1209_v49, %v1208_v15 }
 0x279   :  { %v1211_v48 = vrot.slane %v1210_v51, 2 }
 0x27b   :  { %v1212_v25 = vadd.f32 %v1211_v48, %v1210_v51 }
 0x27d   :  { %v1213_v9 = vrot.slane %v1212_v25, 1 }
 0x27f   :  { %v1214_v3 = vadd.f32 %v1213_v9, %v1212_v25 }
 0x281   :  { %v1215_v33 = vmul.f32 0.001953125, %v1214_v3  ;;  %v4276_v3 = vld [vmem:[#allocation20_spill] sm:$0xff] }
 0x283   :  { %v1217_v63 = vadd.f32 1e-05, %v1215_v33 }
 0x285   :  { %2104 = vrsqrt.f32 %v1217_v63  ;;  %v4278_v63 = vld [vmem:[#allocation2_spill] sm:$0xff] }
 0x28f   :  { %v2105_v61 = vpop.eup %2104 }
 0x290   :  { %v1219_v57 = vmul.f32 %v2105_v61, %v1216_v11  ;;  %v4280_v11 = vld [vmem:[#allocation4_spill] sm:$0xff] }
 0x292   :  { %v3113_v50 = vrot.slane %v1219_v57, %v1223_v62 }
 0x294   :  { %v3117_v15 = vmul.f32 %v3113_v50, %v4274_v32  ;;  %v3121_v25 = vmul.f32 %v3113_v50, %v4275_v37  ;;  %v3125_v9 = vmul.f32 %v3113_v50, %v4276_v3  ;;  %v3129_v14 = vmul.f32 %v3113_v50, %v4277_v39  ;;  %v4281_v32 = vld [vmem:[#allocation8_spill] sm:$0xff]  ;;  %v4282_v37 = vld [vmem:[#allocation9_spill] sm:$0xff]  ;;  %v4283_v3 = vld [vmem:[#allocation10_spill] sm:$0xff] }
 0x295   :  { %v3133_v31 = vmul.f32 %v3113_v50, %v2680_v54  ;;  %v3137_v49 = vmul.f32 %v3113_v50, %v2684_v17  ;;  %v3141_v51 = vmul.f32 %v3113_v50, %v2688_v21  ;;  %v3145_v48 = vmul.f32 %v3113_v50, %v2692_v28  ;;  %v4287_v39 = vld [vmem:[#allocation16_spill] sm:$0xff] }
 0x296   :  { %v3149_v33 = vmul.f32 %v3113_v50, %v2696_v34  ;;  %v3153_v54 = vmul.f32 %v3113_v50, %v2700_v40  ;;  %v3157_v17 = vmul.f32 %v3113_v50, %v2704_v46  ;;  %v3161_v21 = vmul.f32 %v3113_v50, %v2708_v52 }
 0x297   :  { %v3165_v28 = vmul.f32 %v3113_v50, %v2712_v58  ;;  %v3169_v34 = vmul.f32 %v3113_v50, %v2716_v0  ;;  %v3173_v40 = vmul.f32 %v3113_v50, %v2720_v6  ;;  %v3177_v46 = vmul.f32 %v3113_v50, %v2724_v12 }
 0x298   :  { %v3181_v52 = vmul.f32 %v3113_v50, %v2728_v20  ;;  %v3185_v58 = vmul.f32 %v3113_v50, %v2732_v30  ;;  %v3189_v0 = vmul.f32 %v3113_v50, %v2736_v38  ;;  %v3193_v6 = vmul.f32 %v3113_v50, %v4278_v63 }
 0x299   :  { %v3197_v12 = vmul.f32 %v3113_v50, %v4279_v55  ;;  %v3201_v20 = vmul.f32 %v3113_v50, %v4280_v11  ;;  %v3205_v30 = vmul.f32 %v3113_v50, %v4263_v8  ;;  %v3209_v38 = vmul.f32 %v3113_v50, %v4264_v16  ;;  %v4289_v55 = vld [vmem:[#allocation17_spill] sm:$0xff] }
 0x29a   :  { %v3213_v62 = vmul.f32 %v3113_v50, %v4265_v24  ;;  %v3217_v61 = vmul.f32 %v3113_v50, %v2764_v43  ;;  %v3221_v57 = vmul.f32 %v3113_v50, %v2768_v19  ;;  %v3225_v8 = vmul.f32 %v3113_v50, %v2772_v42 }
 0x29b   :  { %v3229_v16 = vmul.f32 %v3113_v50, %v2776_v26  ;;  %v3233_v24 = vmul.f32 %v3113_v50, %v2780_v36  ;;  %v3237_v43 = vmul.f32 %v3113_v50, %v2784_v27  ;;  %v3241_v19 = vmul.f32 %v3113_v50, %v2788_v4 }
 0x29c   :  { %v3245_v42 = vmul.f32 %v3113_v50, %v2792_v44  ;;  %v3249_v26 = vmul.f32 %v3113_v50, %v2796_v10  ;;  %v3253_v36 = vmul.f32 %v3113_v50, %v2800_v60  ;;  %v3257_v27 = vmul.f32 %v3113_v50, %v2804_v45 }
 0x29d   :  { %v3261_v4 = vmul.f32 %v3113_v50, %v2808_v5  ;;  %v3265_v44 = vmul.f32 %v3113_v50, %v2812_v18  ;;  %v3269_v10 = vmul.f32 %v3113_v50, %v2816_v22  ;;  %v3273_v60 = vmul.f32 %v3113_v50, %v2820_v29 }
 0x29e   :  { %v3277_v45 = vmul.f32 %v3113_v50, %v2824_v35  ;;  %v3281_v5 = vmul.f32 %v3113_v50, %v2828_v41  ;;  %v3285_v18 = vmul.f32 %v3113_v50, %v2832_v47  ;;  %v3289_v22 = vmul.f32 %v3113_v50, %v2836_v53 }
 0x29f   :  { %v3293_v29 = vmul.f32 %v3113_v50, %v2840_v59  ;;  %v3297_v35 = vmul.f32 %v3113_v50, %v2844_v1  ;;  %v3301_v41 = vmul.f32 %v3113_v50, %v2848_v7  ;;  %v3305_v47 = vmul.f32 %v3113_v50, %v2852_v13 }
 0x2a0   :  { %v3309_v53 = vmul.f32 %v3113_v50, %v2856_v23  ;;  %v3313_v59 = vmul.f32 %v3113_v50, %v4281_v32  ;;  %v3317_v1 = vmul.f32 %v3113_v50, %v4282_v37  ;;  %v3321_v7 = vmul.f32 %v3113_v50, %v4283_v3  ;;  %v3342_v32 = vld [vmem:[%s4147_s3] ss:$0 sm:$0xff]  ;;  %v4293_v3 = vld [vmem:[#allocation23_spill] sm:$0xff] }
 0x2a1   :  { %v3325_v13 = vmul.f32 %v3113_v50, %v4266_v56  ;;  %v3329_v23 = vmul.f32 %v3113_v50, %v4267_v2  ;;  %v3333_v63 = vmul.f32 %v3113_v50, %v4287_v39  ;;  %v3337_v11 = vmul.f32 %v3113_v50, %v4289_v55  ;;  %v4291_v37 = vld [vmem:[#allocation22_spill] sm:$0xff] }
 0x2a2   :  { %4284 = vst [vmem:[#allocation5_spill] sm:$0xff] %v3321_v7  ;;  %v3346_v56 = vmul.f32 %v3113_v50, %v4291_v37  ;;  %v3350_v2 = vmul.f32 %v3113_v50, %v4293_v3  ;;  %v4298_v7 = vld [vmem:[#allocation24_spill] sm:$0xff] }
 0x2a3   :  { %4285 = vst [vmem:[#allocation6_spill] sm:$0xff] %v3325_v13  ;;  %4286 = vst [vmem:[#allocation7_spill] sm:$0xff] %v3329_v23  ;;  %v4295_v23 = vld [vmem:[#allocation11_spill] sm:$0xff]  ;;  %v3366_v37 = vmul.f32 %v3113_v50, %v4298_v7  ;;  %v3386_v7 = vadd.f32 %v3342_v32, %v3125_v9  ;;  %v3406_v9 = vadd.f32 %v3342_v32, %v3145_v48 }
 0x2a4   :  { %4288 = vst [vmem:[#allocation12_spill] sm:$0xff] %v3333_v63  ;;  %4290 = vst [vmem:[#allocation14_spill] sm:$0xff] %v3337_v11  ;;  %v3354_v39 = vmul.f32 %v3113_v50, %v4295_v23  ;;  %v4296_v63 = vld [vmem:[#allocation13_spill] sm:$0xff]  ;;  %v4297_v11 = vld [vmem:[#allocation15_spill] sm:$0xff]  ;;  %v3426_v48 = vadd.f32 %v3342_v32, %v3165_v28  ;;  %v3446_v28 = vadd.f32 %v3342_v32, %v3185_v58 }
 0x2a5   :  { %4292 = vst [vmem:[#allocation18_spill] sm:$0xff] %v3346_v56  ;;  %4294 = vst [vmem:[#allocation19_spill] sm:$0xff] %v3350_v2  ;;  %v3358_v55 = vmul.f32 %v3113_v50, %v4296_v63  ;;  %v3362_v13 = vmul.f32 %v3113_v50, %v4297_v11  ;;  %v4299_v56 = vld [vmem:[#allocation25_spill] sm:$0xff]  ;;  %v4300_v2 = vld [vmem:[#allocation26_spill] sm:$0xff]  ;;  %v3378_v63 = vadd.f32 %v3342_v32, %v3117_v15 }
 0x2a6   :  { %v3370_v3 = vmul.f32 %v3113_v50, %v4299_v56  ;;  %v3374_v23 = vmul.f32 %v3113_v50, %v4300_v2  ;;  %v3382_v11 = vadd.f32 %v3342_v32, %v3121_v25  ;;  %v3390_v56 = vadd.f32 %v3342_v32, %v3129_v14 }
 0x2a7   :  { %v3394_v50 = vadd.f32 %v3342_v32, %v3133_v31  ;;  %v3398_v15 = vadd.f32 %v3342_v32, %v3137_v49  ;;  %v3402_v25 = vadd.f32 %v3342_v32, %v3141_v51  ;;  %v3410_v14 = vadd.f32 %v3342_v32, %v3149_v33 }
 0x2a8   :  { %v3414_v31 = vadd.f32 %v3342_v32, %v3153_v54  ;;  %v3418_v49 = vadd.f32 %v3342_v32, %v3157_v17  ;;  %v3422_v51 = vadd.f32 %v3342_v32, %v3161_v21  ;;  %v3430_v33 = vadd.f32 %v3342_v32, %v3169_v34 }
 0x2a9   :  { %v3434_v54 = vadd.f32 %v3342_v32, %v3173_v40  ;;  %v3438_v17 = vadd.f32 %v3342_v32, %v3177_v46  ;;  %v3442_v21 = vadd.f32 %v3342_v32, %v3181_v52  ;;  %v3450_v34 = vadd.f32 %v3342_v32, %v3189_v0  ;;  %v4311_v2 = vld [vmem:[#allocation5_spill] sm:$0xff] }
 0x2aa   :  { %v3454_v40 = vadd.f32 %v3342_v32, %v3193_v6  ;;  %v3458_v46 = vadd.f32 %v3342_v32, %v3197_v12  ;;  %v3462_v52 = vadd.f32 %v3342_v32, %v3201_v20  ;;  %v3466_v58 = vadd.f32 %v3342_v32, %v3205_v30 }
 0x2ab   :  { %v3470_v0 = vadd.f32 %v3342_v32, %v3209_v38  ;;  %v3474_v6 = vadd.f32 %v3342_v32, %v3213_v62  ;;  %v3478_v12 = vadd.f32 %v3342_v32, %v3217_v61  ;;  %v3482_v20 = vadd.f32 %v3342_v32, %v3221_v57 }
 0x2ac   :  { %v3486_v30 = vadd.f32 %v3342_v32, %v3225_v8  ;;  %v3490_v38 = vadd.f32 %v3342_v32, %v3229_v16  ;;  %v3494_v62 = vadd.f32 %v3342_v32, %v3233_v24  ;;  %v3498_v61 = vadd.f32 %v3342_v32, %v3237_v43 }
 0x2ad   :  { %v3502_v57 = vadd.f32 %v3342_v32, %v3241_v19  ;;  %v3506_v8 = vadd.f32 %v3342_v32, %v3245_v42  ;;  %v3510_v16 = vadd.f32 %v3342_v32, %v3249_v26  ;;  %v3514_v24 = vadd.f32 %v3342_v32, %v3253_v36 }
 0x2ae   :  { %v3518_v43 = vadd.f32 %v3342_v32, %v3257_v27  ;;  %v3522_v19 = vadd.f32 %v3342_v32, %v3261_v4  ;;  %v3526_v42 = vadd.f32 %v3342_v32, %v3265_v44  ;;  %v3530_v26 = vadd.f32 %v3342_v32, %v3269_v10 }
 0x2af   :  { %v3534_v36 = vadd.f32 %v3342_v32, %v3273_v60  ;;  %v3538_v27 = vadd.f32 %v3342_v32, %v3277_v45  ;;  %v3542_v4 = vadd.f32 %v3342_v32, %v3281_v5  ;;  %v3546_v44 = vadd.f32 %v3342_v32, %v3285_v18 }
 0x2b0   :  { %4301 = vst [vmem:[#allocation20_spill] sm:$0xff] %v3522_v19  ;;  %4302 = vst [vmem:[#allocation21_spill] sm:$0xff] %v3526_v42  ;;  %v3550_v10 = vadd.f32 %v3342_v32, %v3289_v22  ;;  %v3554_v60 = vadd.f32 %v3342_v32, %v3293_v29  ;;  %v3558_v45 = vadd.f32 %v3342_v32, %v3297_v35 }
 0x2b1   :  { %4303 = vst [vmem:[#allocation2_spill] sm:$0xff] %v3530_v26  ;;  %4304 = vst [vmem:[#allocation3_spill] sm:$0xff] %v3534_v36  ;;  %v3562_v5 = vadd.f32 %v3342_v32, %v3301_v41  ;;  %v3566_v18 = vadd.f32 %v3342_v32, %v3305_v47  ;;  %v3570_v22 = vadd.f32 %v3342_v32, %v3309_v53 }
 0x2b2   :  { %4305 = vst [vmem:[#allocation4_spill] sm:$0xff] %v3538_v27  ;;  %v3574_v29 = vadd.f32 %v3342_v32, %v3313_v59  ;;  %v3578_v35 = vadd.f32 %v3342_v32, %v3317_v1  ;;  %v3582_v41 = vadd.f32 %v3342_v32, %v4311_v2 }
 0x2b3   :  { %4306 = vst [vmem:[#allocation8_spill] sm:$0xff] %v3562_v5  ;;  %4307 = vst [vmem:[#allocation9_spill] sm:$0xff] %v3566_v18  ;;  %v4313_v5 = vld [vmem:[#allocation6_spill] sm:$0xff]  ;;  %v4314_v18 = vld [vmem:[#allocation7_spill] sm:$0xff] }
 0x2b4   :  { %4308 = vst [vmem:[#allocation10_spill] sm:$0xff] %v3570_v22  ;;  %4309 = vst [vmem:[#allocation16_spill] sm:$0xff] %v3574_v29  ;;  %v3586_v47 = vadd.f32 %v3342_v32, %v4313_v5  ;;  %v3590_v53 = vadd.f32 %v3342_v32, %v4314_v18  ;;  %v4315_v22 = vld [vmem:[#allocation12_spill] sm:$0xff]  ;;  %v4316_v29 = vld [vmem:[#allocation14_spill] sm:$0xff]  ;;  %v3610_v18 = vadd.f32 %v3342_v32, %v3354_v39 }
 0x2b5   :  { %4310 = vst [vmem:[#allocation17_spill] sm:$0xff] %v3578_v35  ;;  %4312 = vst [vmem:[#allocation22_spill] sm:$0xff] %v3582_v41  ;;  %v3594_v59 = vadd.f32 %v3342_v32, %v4315_v22  ;;  %v3598_v1 = vadd.f32 %v3342_v32, %v4316_v29  ;;  %v4317_v35 = vld [vmem:[#allocation18_spill] sm:$0xff]  ;;  %v4318_v41 = vld [vmem:[#allocation19_spill] sm:$0xff]  ;;  %v3614_v22 = vadd.f32 %v3342_v32, %v3358_v55 }
 0x2b6   :  { %v3602_v2 = vadd.f32 %v3342_v32, %v4317_v35  ;;  %v3606_v5 = vadd.f32 %v3342_v32, %v4318_v41  ;;  %4319 = vst [vmem:[#allocation23_spill] sm:$0xff] %v3610_v18  ;;  %v3618_v29 = vadd.f32 %v3342_v32, %v3362_v13  ;;  %v3622_v35 = vadd.f32 %v3342_v32, %v3366_v37 }
 0x2b7   :  { %4320 = vst [vmem:[#allocation11_spill] sm:$0xff] %v3614_v22  ;;  %v3626_v41 = vadd.f32 %v3342_v32, %v3370_v3  ;;  %v3630_v39 = vadd.f32 %v3342_v32, %v3374_v23  ;;  %v4331_v42 = vmov %v3614_v22  ;;  %v4338_v23 = vmax.f32 %v3390_v56, 0.0 }
 0x2b8   :  { %4321 = vst [vmem:[#allocation13_spill] sm:$0xff] %v3618_v29  ;;  %4322 = vst [vmem:[#allocation15_spill] sm:$0xff] %v3622_v35  ;;  %v4332_v26 = vmov %v3618_v29  ;;  %v4333_v36 = vmov %v3622_v35  ;;  %v4335_v29 = vmax.f32 %v3378_v63, 0.0  ;;  %v4336_v35 = vmax.f32 %v3382_v11, 0.0 }
 0x2b9   :  { %4323 = vst [vmem:[#allocation24_spill] sm:$0xff] %v3626_v41  ;;  %v4334_v27 = vmov %v3626_v41  ;;  %v4337_v41 = vmax.f32 %v3386_v7, 0.0  ;;  %v1898_v55 = vpack.c.bf16 %v4338_v23, %v4338_v23  ;;  %v4339_v22 = vmax.f32 %v3394_v50, 0.0 }
 0x2ba   :  { %v4324_v18 = vld [vmem:[#allocation8_spill] sm:$0xff]  ;;  %v1895_v37 = vpack.c.bf16 %v4335_v29, %v4335_v29  ;;  %v1896_v3 = vpack.c.bf16 %v4336_v35, %v4336_v35  ;;  %v4340_v63 = vmax.f32 %v3398_v15, 0.0  ;;  %v4341_v11 = vmax.f32 %v3402_v25, 0.0 }
 0x2bb   :  { %v1897_v32 = vpack.c.bf16 %v4337_v41, %v4337_v41  ;;  %v1899_v13 = vpack.c.bf16 %v4339_v22, %v4339_v22  ;;  %v4342_v7 = vmax.f32 %v3406_v9, 0.0  ;;  %v4343_v56 = vmax.f32 %v3410_v14, 0.0  ;;  %1685 = vst.msk [vmem:[%s4148_s4 + $0xc] sm:$0xf] %vm1681_vm1, %v1898_v55 }
 0x2bc   :  { %v1900_v29 = vpack.c.bf16 %v4340_v63, %v4340_v63  ;;  %v1901_v35 = vpack.c.bf16 %v4341_v11, %v4341_v11  ;;  %v4344_v50 = vmax.f32 %v3414_v31, 0.0  ;;  %v4345_v15 = vmax.f32 %v3418_v49, 0.0  ;;  %1682 = vst.msk [vmem:[%s4148_s4] sm:$0xf] %vm1681_vm1, %v1895_v37  ;;  %1683 = vst.msk [vmem:[%s4148_s4 + $0x4] sm:$0xf] %vm1681_vm1, %v1896_v3 }
 0x2bd   :  { %v4330_v19 = vld [vmem:[#allocation23_spill] sm:$0xff]  ;;  %v1902_v41 = vpack.c.bf16 %v4342_v7, %v4342_v7  ;;  %v1903_v23 = vpack.c.bf16 %v4343_v56, %v4343_v56  ;;  %v4346_v25 = vmax.f32 %v3422_v51, 0.0  ;;  %1684 = vst.msk [vmem:[%s4148_s4 + $0x8] sm:$0xf] %vm1681_vm1, %v1897_v32  ;;  %v4347_v9 = vmax.f32 %v3426_v48, 0.0 }
 0x2be   :  { %v1904_v22 = vpack.c.bf16 %v4344_v50, %v4344_v50  ;;  %v1905_v63 = vpack.c.bf16 %v4345_v15, %v4345_v15  ;;  %v4348_v31 = vmax.f32 %v3430_v33, 0.0  ;;  %v4349_v51 = vmax.f32 %v3434_v54, 0.0  ;;  %1686 = vst.msk [vmem:[%s4148_s4 + $0x10] sm:$0xf] %vm1681_vm1, %v1899_v13  ;;  %1687 = vst.msk [vmem:[%s4148_s4 + $0x14] sm:$0xf] %vm1681_vm1, %v1900_v29 }
 0x2bf   :  { %v1906_v11 = vpack.c.bf16 %v4346_v25, %v4346_v25  ;;  %v1907_v14 = vpack.c.bf16 %v4347_v9, %v4347_v9  ;;  %v4350_v3 = vmax.f32 %v3438_v17, 0.0  ;;  %1688 = vst.msk [vmem:[%s4148_s4 + $0x18] sm:$0xf] %vm1681_vm1, %v1901_v35  ;;  %1689 = vst.msk [vmem:[%s4148_s4 + $0x1c] sm:$0xf] %vm1681_vm1, %v1902_v41  ;;  %v4351_v48 = vmax.f32 %v3442_v21, 0.0 }
 0x2c0   :  { %v1908_v49 = vpack.c.bf16 %v4348_v31, %v4348_v31  ;;  %v1909_v37 = vpack.c.bf16 %v4349_v51, %v4349_v51  ;;  %v4352_v54 = vmax.f32 %v3446_v28, 0.0  ;;  %v4353_v55 = vmax.f32 %v3450_v34, 0.0  ;;  %1690 = vst.msk [vmem:[%s4148_s4 + $0x20] sm:$0xf] %vm1681_vm1, %v1903_v23  ;;  %1691 = vst.msk [vmem:[%s4148_s4 + $0x24] sm:$0xf] %vm1681_vm1, %v1904_v22 }
 0x2c1   :  { %v1910_v32 = vpack.c.bf16 %v4350_v3, %v4350_v3  ;;  %v1911_v33 = vpack.c.bf16 %v4351_v48, %v4351_v48  ;;  %v4354_v29 = vmax.f32 %v3454_v40, 0.0  ;;  %1692 = vst.msk [vmem:[%s4148_s4 + $0x28] sm:$0xf] %vm1681_vm1, %v1905_v63  ;;  %1693 = vst.msk [vmem:[%s4148_s4 + $0x2c] sm:$0xf] %vm1681_vm1, %v1906_v11  ;;  %v4355_v21 = vmax.f32 %v3458_v46, 0.0 }
 0x2c2   :  { %v1912_v17 = vpack.c.bf16 %v4352_v54, %v4352_v54  ;;  %v1913_v13 = vpack.c.bf16 %v4353_v55, %v4353_v55  ;;  %v4356_v34 = vmax.f32 %v3462_v52, 0.0  ;;  %v4357_v7 = vmax.f32 %v3466_v58, 0.0  ;;  %1694 = vst.msk [vmem:[%s4148_s4 + $0x30] sm:$0xf] %vm1681_vm1, %v1907_v14  ;;  %1695 = vst.msk [vmem:[%s4148_s4 + $0x34] sm:$0xf] %vm1681_vm1, %v1908_v49 }
 0x2c3   :  { %v1914_v35 = vpack.c.bf16 %v4354_v29, %v4354_v29  ;;  %v1915_v28 = vpack.c.bf16 %v4355_v21, %v4355_v21  ;;  %v4358_v56 = vmax.f32 %v3470_v0, 0.0  ;;  %1696 = vst.msk [vmem:[%s4148_s4 + $0x38] sm:$0xf] %vm1681_vm1, %v1909_v37  ;;  %1697 = vst.msk [vmem:[%s4148_s4 + $0x3c] sm:$0xf] %vm1681_vm1, %v1910_v32  ;;  %v4359_v46 = vmax.f32 %v3474_v6, 0.0 }
 0x2c4   :  { %v1916_v40 = vpack.c.bf16 %v4356_v34, %v4356_v34  ;;  %v1917_v41 = vpack.c.bf16 %v4357_v7, %v4357_v7  ;;  %v4360_v58 = vmax.f32 %v3478_v12, 0.0  ;;  %v4361_v50 = vmax.f32 %v3482_v20, 0.0  ;;  %1698 = vst.msk [vmem:[%s4148_s4 + $0x40] sm:$0xf] %vm1681_vm1, %v1911_v33  ;;  %1699 = vst.msk [vmem:[%s4148_s4 + $0x44] sm:$0xf] %vm1681_vm1, %v1912_v17 }
 0x2c5   :  { %v1918_v23 = vpack.c.bf16 %v4358_v56, %v4358_v56  ;;  %v1919_v52 = vpack.c.bf16 %v4359_v46, %v4359_v46  ;;  %v4362_v15 = vmax.f32 %v3486_v30, 0.0  ;;  %1700 = vst.msk [vmem:[%s4148_s4 + $0x48] sm:$0xf] %vm1681_vm1, %v1913_v13  ;;  %1701 = vst.msk [vmem:[%s4148_s4 + $0x4c] sm:$0xf] %vm1681_vm1, %v1914_v35  ;;  %v4363_v6 = vmax.f32 %v3490_v38, 0.0 }
 0x2c6   :  { %v1920_v0 = vpack.c.bf16 %v4360_v58, %v4360_v58  ;;  %v1921_v22 = vpack.c.bf16 %v4361_v50, %v4361_v50  ;;  %v4364_v20 = vmax.f32 %v3494_v62, 0.0  ;;  %v4365_v25 = vmax.f32 %v3498_v61, 0.0  ;;  %1702 = vst.msk [vmem:[%s4148_s4 + $0x50] sm:$0xf] %vm1681_vm1, %v1915_v28  ;;  %1703 = vst.msk [vmem:[%s4148_s4 + $0x54] sm:$0xf] %vm1681_vm1, %v1916_v40 }
 0x2c7   :  { %v1922_v63 = vpack.c.bf16 %v4362_v15, %v4362_v15  ;;  %v1923_v12 = vpack.c.bf16 %v4363_v6, %v4363_v6  ;;  %v4366_v9 = vmax.f32 %v3502_v57, 0.0  ;;  %1704 = vst.msk [vmem:[%s4148_s4 + $0x58] sm:$0xf] %vm1681_vm1, %v1917_v41  ;;  %1705 = vst.msk [vmem:[%s4148_s4 + $0x5c] sm:$0xf] %vm1681_vm1, %v1918_v23  ;;  %v4367_v38 = vmax.f32 %v3506_v8, 0.0 }
 0x2c8   :  { %v1924_v30 = vpack.c.bf16 %v4364_v20, %v4364_v20  ;;  %v1925_v11 = vpack.c.bf16 %v4365_v25, %v4365_v25  ;;  %v4368_v61 = vmax.f32 %v3510_v16, 0.0  ;;  %v4369_v31 = vmax.f32 %v3514_v24, 0.0  ;;  %1706 = vst.msk [vmem:[%s4148_s4 + $0x60] sm:$0xf] %vm1681_vm1, %v1919_v52  ;;  %1707 = vst.msk [vmem:[%s4148_s4 + $0x64] sm:$0xf] %vm1681_vm1, %v1920_v0 }
 0x2c9   :  { %v1926_v14 = vpack.c.bf16 %v4366_v9, %v4366_v9  ;;  %v1927_v62 = vpack.c.bf16 %v4367_v38, %v4367_v38  ;;  %v4370_v51 = vmax.f32 %v3518_v43, 0.0  ;;  %1708 = vst.msk [vmem:[%s4148_s4 + $0x68] sm:$0xf] %vm1681_vm1, %v1921_v22  ;;  %1709 = vst.msk [vmem:[%s4148_s4 + $0x6c] sm:$0xf] %vm1681_vm1, %v1922_v63  ;;  %v4371_v8 = vld [vmem:[#allocation20_spill] sm:$0xff] }
 0x2ca   :  { %v1928_v57 = vpack.c.bf16 %v4368_v61, %v4368_v61  ;;  %v1929_v49 = vpack.c.bf16 %v4369_v31, %v4369_v31  ;;  %v4372_v16 = vmax.f32 %v4371_v8, 0.0  ;;  %v4373_v43 = vld [vmem:[#allocation21_spill] sm:$0xff]  ;;  %v4375_v48 = vld [vmem:[#allocation2_spill] sm:$0xff]  ;;  %v4377_v17 = vld [vmem:[#allocation3_spill] sm:$0xff]  ;;  %1710 = vst.msk [vmem:[%s4148_s4 + $0x70] sm:$0xf] %vm1681_vm1, %v1923_v12 }
 0x2cb   :  { %v1930_v37 = vpack.c.bf16 %v4370_v51, %v4370_v51  ;;  %v4374_v3 = vmax.f32 %v4373_v43, 0.0  ;;  %v4376_v33 = vmax.f32 %v4375_v48, 0.0  ;;  %v4378_v55 = vmax.f32 %v4377_v17, 0.0  ;;  %1711 = vst.msk [vmem:[%s4148_s4 + $0x74] sm:$0xf] %vm1681_vm1, %v1924_v30  ;;  %v4379_v29 = vld [vmem:[#allocation4_spill] sm:$0xff] }
 0x2cc   :  { %v1931_v24 = vpack.c.bf16 %v4372_v16, %v4372_v16  ;;  %1712 = vst.msk [vmem:[%s4148_s4 + $0x78] sm:$0xf] %vm1681_vm1, %v1925_v11  ;;  %1713 = vst.msk [vmem:[%s4148_s4 + $0x7c] sm:$0xf] %vm1681_vm1, %v1926_v14  ;;  %v4380_v35 = vmax.f32 %v4379_v29, 0.0  ;;  %v4381_v28 = vmax.f32 %v3542_v4, 0.0 }
 0x2cd   :  { %v1932_v32 = vpack.c.bf16 %v4374_v3, %v4374_v3  ;;  %v1933_v54 = vpack.c.bf16 %v4376_v33, %v4376_v33  ;;  %v1934_v13 = vpack.c.bf16 %v4378_v55, %v4378_v55  ;;  %v4382_v40 = vmax.f32 %v3546_v44, 0.0  ;;  %1714 = vst.msk [vmem:[%s4148_s4 + $0x80] sm:$0xf] %vm1681_vm1, %v1927_v62  ;;  %1715 = vst.msk [vmem:[%s4148_s4 + $0x84] sm:$0xf] %vm1681_vm1, %v1928_v57  ;;  %v4387_v58 = vld [vmem:[#allocation9_spill] sm:$0xff] }
 0x2ce   :  { %v1935_v21 = vpack.c.bf16 %v4380_v35, %v4380_v35  ;;  %v1936_v34 = vpack.c.bf16 %v4381_v28, %v4381_v28  ;;  %v4383_v41 = vmax.f32 %v3550_v10, 0.0  ;;  %1716 = vst.msk [vmem:[%s4148_s4 + $0x88] sm:$0xf] %vm1681_vm1, %v1929_v49  ;;  %1717 = vst.msk [vmem:[%s4148_s4 + $0x8c] sm:$0xf] %vm1681_vm1, %v1930_v37  ;;  %v4384_v4 = vmax.f32 %v3554_v60, 0.0 }
 0x2cf   :  { %v1937_v7 = vpack.c.bf16 %v4382_v40, %v4382_v40  ;;  %v4385_v10 = vmax.f32 %v3558_v45, 0.0  ;;  %v4386_v46 = vmax.f32 %v4324_v18, 0.0  ;;  %v4388_v0 = vmax.f32 %v4387_v58, 0.0  ;;  %1718 = vst.msk [vmem:[%s4148_s4 + $0x90] sm:$0xf] %vm1681_vm1, %v1931_v24  ;;  %v4389_v60 = vld [vmem:[#allocation10_spill] sm:$0xff] }
 0x2d0   :  { %v1938_v56 = vpack.c.bf16 %v4383_v41, %v4383_v41  ;;  %v1939_v44 = vpack.c.bf16 %v4384_v4, %v4384_v4  ;;  %1719 = vst.msk [vmem:[%s4148_s4 + $0x94] sm:$0xf] %vm1681_vm1, %v1932_v32  ;;  %1720 = vst.msk [vmem:[%s4148_s4 + $0x98] sm:$0xf] %vm1681_vm1, %v1933_v54  ;;  %v4390_v45 = vmax.f32 %v4389_v60, 0.0  ;;  %v4391_v22 = vld [vmem:[#allocation16_spill] sm:$0xff] }
 0x2d1   :  { %v1940_v23 = vpack.c.bf16 %v4385_v10, %v4385_v10  ;;  %v1941_v52 = vpack.c.bf16 %v4386_v46, %v4386_v46  ;;  %v1942_v50 = vpack.c.bf16 %v4388_v0, %v4388_v0  ;;  %1721 = vst.msk [vmem:[%s4148_s4 + $0x9c] sm:$0xf] %vm1681_vm1, %v1934_v13  ;;  %v4392_v15 = vmax.f32 %v4391_v22, 0.0  ;;  %v4393_v6 = vld [vmem:[#allocation17_spill] sm:$0xff]  ;;  %v4395_v30 = vld [vmem:[#allocation22_spill] sm:$0xff] }
 0x2d2   :  { %v1943_v18 = vpack.c.bf16 %v4390_v45, %v4390_v45  ;;  %v4394_v12 = vmax.f32 %v4393_v6, 0.0  ;;  %v4396_v25 = vmax.f32 %v4395_v30, 0.0  ;;  %1722 = vst.msk [vmem:[%s4148_s4 + $0xa0] sm:$0xf] %vm1681_vm1, %v1935_v21  ;;  %1723 = vst.msk [vmem:[%s4148_s4 + $0xa4] sm:$0xf] %vm1681_vm1, %v1936_v34 }
 0x2d3   :  { %v1944_v63 = vpack.c.bf16 %v4392_v15, %v4392_v15  ;;  %1724 = vst.msk [vmem:[%s4148_s4 + $0xa8] sm:$0xf] %vm1681_vm1, %v1937_v7  ;;  %1725 = vst.msk [vmem:[%s4148_s4 + $0xac] sm:$0xf] %vm1681_vm1, %v1938_v56  ;;  %v4397_v9 = vmax.f32 %v3586_v47, 0.0  ;;  %v4398_v38 = vmax.f32 %v3590_v53, 0.0 }
 0x2d4   :  { %v1945_v20 = vpack.c.bf16 %v4394_v12, %v4394_v12  ;;  %v1946_v11 = vpack.c.bf16 %v4396_v25, %v4396_v25  ;;  %v4399_v61 = vmax.f32 %v3594_v59, 0.0  ;;  %v4400_v31 = vmax.f32 %v3598_v1, 0.0  ;;  %1726 = vst.msk [vmem:[%s4148_s4 + $0xb0] sm:$0xf] %vm1681_vm1, %v1939_v44  ;;  %1727 = vst.msk [vmem:[%s4148_s4 + $0xb4] sm:$0xf] %vm1681_vm1, %v1940_v23 }
 0x2d5   :  { %v1947_v14 = vpack.c.bf16 %v4397_v9, %v4397_v9  ;;  %v1948_v62 = vpack.c.bf16 %v4398_v38, %v4398_v38  ;;  %1728 = vst.msk [vmem:[%s4148_s4 + $0xb8] sm:$0xf] %vm1681_vm1, %v1941_v52  ;;  %1729 = vst.msk [vmem:[%s4148_s4 + $0xbc] sm:$0xf] %vm1681_vm1, %v1942_v50  ;;  %v4401_v47 = vmax.f32 %v3602_v2, 0.0  ;;  %v4402_v59 = vmax.f32 %v3606_v5, 0.0 }
 0x2d6   :  { %v1949_v57 = vpack.c.bf16 %v4399_v61, %v4399_v61  ;;  %v1950_v49 = vpack.c.bf16 %v4400_v31, %v4400_v31  ;;  %v4403_v51 = vmax.f32 %v4330_v19, 0.0  ;;  %v4404_v8 = vmax.f32 %v4331_v42, 0.0  ;;  %1730 = vst.msk [vmem:[%s4148_s4 + $0xc0] sm:$0xf] %vm1681_vm1, %v1943_v18  ;;  %1731 = vst.msk [vmem:[%s4148_s4 + $0xc4] sm:$0xf] %vm1681_vm1, %v1944_v63 }
 0x2d7   :  { %v1951_v53 = vpack.c.bf16 %v4401_v47, %v4401_v47  ;;  %v1952_v1 = vpack.c.bf16 %v4402_v59, %v4402_v59  ;;  %1732 = vst.msk [vmem:[%s4148_s4 + $0xc8] sm:$0xf] %vm1681_vm1, %v1945_v20  ;;  %1733 = vst.msk [vmem:[%s4148_s4 + $0xcc] sm:$0xf] %vm1681_vm1, %v1946_v11  ;;  %v4405_v19 = vmax.f32 %v4332_v26, 0.0  ;;  %v4406_v2 = vmax.f32 %v4333_v36, 0.0 }
 0x2d8   :  { %v1953_v37 = vpack.c.bf16 %v4403_v51, %v4403_v51  ;;  %v1954_v16 = vpack.c.bf16 %v4404_v8, %v4404_v8  ;;  %v4407_v24 = vmax.f32 %v4334_v27, 0.0  ;;  %v4408_v3 = vmax.f32 %v3630_v39, 0.0  ;;  %1734 = vst.msk [vmem:[%s4148_s4 + $0xd0] sm:$0xf] %vm1681_vm1, %v1947_v14  ;;  %1735 = vst.msk [vmem:[%s4148_s4 + $0xd4] sm:$0xf] %vm1681_vm1, %v1948_v62 }
 0x2d9   :  { %v1955_v42 = vpack.c.bf16 %v4405_v19, %v4405_v19  ;;  %v1956_v5 = vpack.c.bf16 %v4406_v2, %v4406_v2  ;;  %1736 = vst.msk [vmem:[%s4148_s4 + $0xd8] sm:$0xf] %vm1681_vm1, %v1949_v57  ;;  %1737 = vst.msk [vmem:[%s4148_s4 + $0xdc] sm:$0xf] %vm1681_vm1, %v1950_v49 }
 0x2da   :  { %v1957_v43 = vpack.c.bf16 %v4407_v24, %v4407_v24  ;;  %v1958_v32 = vpack.c.bf16 %v4408_v3, %v4408_v3  ;;  %1738 = vst.msk [vmem:[%s4148_s4 + $0xe0] sm:$0xf] %vm1681_vm1, %v1951_v53  ;;  %1739 = vst.msk [vmem:[%s4148_s4 + $0xe4] sm:$0xf] %vm1681_vm1, %v1952_v1 }
 0x2db   :  { %1740 = vst.msk [vmem:[%s4148_s4 + $0xe8] sm:$0xf] %vm1681_vm1, %v1953_v37  ;;  %1741 = vst.msk [vmem:[%s4148_s4 + $0xec] sm:$0xf] %vm1681_vm1, %v1954_v16 }
 0x2dc   :  { %1742 = vst.msk [vmem:[%s4148_s4 + $0xf0] sm:$0xf] %vm1681_vm1, %v1955_v42  ;;  %1743 = vst.msk [vmem:[%s4148_s4 + $0xf4] sm:$0xf] %vm1681_vm1, %v1956_v5 }
 0x2dd   :  { %1744 = vst.msk [vmem:[%s4148_s4 + $0xf8] sm:$0xf] %vm1681_vm1, %v1957_v43  ;;  %1745 = vst.msk [vmem:[%s4148_s4 + $0xfc] sm:$0xf] %vm1681_vm1, %v1958_v32 }

// kernel: patch_discriminator_t2s.7
= control target key start
LH: loop header
LB: loop body
LE: loop exit
PB: predicated region body
PF: predicated region fallthrough
CT: control target
= control target key end

     0   :  { %vm660_vm0 = vcmask 523264   ;;  %vm898_vm1 = vcmask 519168   ;;  %s1665_s1 = inlined_call_operand.vmem [shape: bf16[512,64], index: 1, kind: input, shape index: {}]   ;;  %s1666_s0 = inlined_call_operand.vmem [shape: bf16[128,512], index: 0, kind: input, shape index: {}]   ;;  %s1667_s2 = inlined_call_operand.vmem [shape: f32[1,64], index: 2, kind: input, shape index: {}]   ;;  %s1668_s3 = inlined_call_operand.vmem [shape: f32[1,64], index: 3, kind: input, shape index: {}]   ;;  %s1669_s4 = inlined_call_operand.vmem [shape: bf16[128,64], index: 4, kind: output, shape index: {}]  }
   0x1   :  { %v1144_v0 = vld [vmem:[%s1665_s1 + $0x40] sm:$0xff]   ;;  %v1148_v4 = vld [vmem:[%s1665_s1 + $0x48] sm:$0xff]   ;;  %v1152_v8 = vld [vmem:[%s1665_s1 + $0x50] sm:$0xff]  }
   0x2   :  { %v1145_v1 = vld [vmem:[%s1665_s1 + $0xc0] sm:$0xff]   ;;  %1016 = vmatprep.subr.bf16.mxu0 %v1144_v0  ;;  %v1149_v5 = vld [vmem:[%s1665_s1 + $0xc8] sm:$0xff]   ;;  %v1153_v9 = vld [vmem:[%s1665_s1 + $0xd0] sm:$0xff]  }
   0x3   :  { %v1146_v2 = vld [vmem:[%s1665_s1] sm:$0xff]   ;;  %1080 = vmatprep.subr.bf16.mxu1 %v1145_v1  ;;  %v1150_v6 = vld [vmem:[%s1665_s1 + $0x8] sm:$0xff]   ;;  %v1154_v10 = vld [vmem:[%s1665_s1 + $0x10] sm:$0xff]  }
   0x4   :  { %v1147_v3 = vld [vmem:[%s1665_s1 + $0x80] sm:$0xff]   ;;  %1017 = vmatpush3.bf16.msra.mxu0 %v1146_v2  ;;  %v1151_v7 = vld [vmem:[%s1665_s1 + $0x88] sm:$0xff]   ;;  %v1155_v11 = vld [vmem:[%s1665_s1 + $0x90] sm:$0xff]  }
   0x5   :  { %1081 = vmatpush3.bf16.msra.mxu1 %v1147_v3  ;;  %1018 = vmatprep.subr.bf16.mxu0 %v1148_v4  ;;  %v1156_v12 = vld [vmem:[%s1665_s1 + $0x58] sm:$0xff]   ;;  %v1160_v16 = vld [vmem:[%s1665_s1 + $0x60] sm:$0xff]   ;;  %v1164_v20 = vld [vmem:[%s1665_s1 + $0x68] sm:$0xff]  }
   0x6   :  { %1082 = vmatprep.subr.bf16.mxu1 %v1149_v5  ;;  %v1157_v13 = vld [vmem:[%s1665_s1 + $0xd8] sm:$0xff]   ;;  %v1161_v17 = vld [vmem:[%s1665_s1 + $0xe0] sm:$0xff]   ;;  %v1165_v21 = vld [vmem:[%s1665_s1 + $0xe8] sm:$0xff]  }
   0x7   :  { %v1158_v14 = vld [vmem:[%s1665_s1 + $0x18] sm:$0xff]   ;;  %v1162_v18 = vld [vmem:[%s1665_s1 + $0x20] sm:$0xff]   ;;  %v1166_v22 = vld [vmem:[%s1665_s1 + $0x28] sm:$0xff]  }
   0x8   :  { %1019 = vmatpush3.bf16.msra.mxu0 %v1150_v6  ;;  %v1159_v15 = vld [vmem:[%s1665_s1 + $0x98] sm:$0xff]   ;;  %v1163_v19 = vld [vmem:[%s1665_s1 + $0xa0] sm:$0xff]   ;;  %v1167_v23 = vld [vmem:[%s1665_s1 + $0xa8] sm:$0xff]  }
   0x9   :  { %1083 = vmatpush3.bf16.msra.mxu1 %v1151_v7  ;;  %1020 = vmatprep.subr.bf16.mxu0 %v1152_v8  ;;  %v1168_v24 = vld [vmem:[%s1665_s1 + $0x70] sm:$0xff]   ;;  %v1172_v28 = vld [vmem:[%s1665_s1 + $0x78] sm:$0xff]  }
   0xa   :  { %1084 = vmatprep.subr.bf16.mxu1 %v1153_v9  ;;  %v1169_v25 = vld [vmem:[%s1665_s1 + $0xf0] sm:$0xff]   ;;  %v1173_v29 = vld [vmem:[%s1665_s1 + $0xf8] sm:$0xff]  }
   0xb   :  { %v1170_v26 = vld [vmem:[%s1665_s1 + $0x30] sm:$0xff]   ;;  %v1174_v30 = vld [vmem:[%s1665_s1 + $0x38] sm:$0xff]  }
   0xc   :  { %1021 = vmatpush3.bf16.msra.mxu0 %v1154_v10  ;;  %v1171_v27 = vld [vmem:[%s1665_s1 + $0xb0] sm:$0xff]   ;;  %v1175_v31 = vld [vmem:[%s1665_s1 + $0xb8] sm:$0xff]  }
   0xd   :  { %1085 = vmatpush3.bf16.msra.mxu1 %v1155_v11  ;;  %1022 = vmatprep.subr.bf16.mxu0 %v1156_v12  ;;  %v1176_v32 = vld [vmem:[%s1666_s0] ss:$16 sps:$4 sm:$0xff]   ;;  %v1178_v33 = vld [vmem:[%s1666_s0 + $0x4] ss:$16 sps:$4 sm:$0xff]   ;;  %v1179_v34 = vld [vmem:[%s1666_s0 + $0x8] ss:$16 sps:$4 sm:$0xff]  }
   0xe   :  { %1086 = vmatprep.subr.bf16.mxu1 %v1157_v13  ;;  %v1181_v35 = vld [vmem:[%s1666_s0 + $0xc] ss:$16 sps:$4 sm:$0xff]   ;;  %498 = vmatprep.mubr.bf16.mxu0 %v1178_v33  ;;  %v1182_v36 = vld [vmem:[%s1666_s0 + $0x24] ss:$16 sps:$4 sm:$0xff]   ;;  %v1186_v38 = vld [vmem:[%s1666_s0 + $0x20] ss:$16 sps:$4 sm:$0xff]  }
   0xf   :  { %595 = vmatprep.mubr.bf16.mxu1 %v1181_v35  ;;  %v1184_v37 = vld [vmem:[%s1666_s0 + $0x2c] ss:$16 sps:$4 sm:$0xff]   ;;  %v1187_v39 = vld [vmem:[%s1666_s0 + $0x28] ss:$16 sps:$4 sm:$0xff]   ;;  %v1188_v40 = vld [vmem:[%s1666_s0 + $0x44] ss:$16 sps:$4 sm:$0xff]  }
  0x10   :  { %1023 = vmatpush3.bf16.msra.mxu0 %v1158_v14  ;;  %v1190_v41 = vld [vmem:[%s1666_s0 + $0x4c] ss:$16 sps:$4 sm:$0xff]   ;;  %v1192_v42 = vld [vmem:[%s1666_s0 + $0x40] ss:$16 sps:$4 sm:$0xff]   ;;  %v1193_v43 = vld [vmem:[%s1666_s0 + $0x48] ss:$16 sps:$4 sm:$0xff]  }
  0x11   :  { %1087 = vmatpush3.bf16.msra.mxu1 %v1159_v15  ;;  %1024 = vmatprep.subr.bf16.mxu0 %v1160_v16  ;;  %v1194_v44 = vld [vmem:[%s1666_s0 + $0x64] ss:$16 sps:$4 sm:$0xff]   ;;  %v1196_v45 = vld [vmem:[%s1666_s0 + $0x6c] ss:$16 sps:$4 sm:$0xff]   ;;  %v1198_v46 = vld [vmem:[%s1666_s0 + $0x60] ss:$16 sps:$4 sm:$0xff]  }
  0x12   :  { %1088 = vmatprep.subr.bf16.mxu1 %v1161_v17  ;;  %v1199_v47 = vld [vmem:[%s1666_s0 + $0x68] ss:$16 sps:$4 sm:$0xff]   ;;  %v1200_v48 = vld [vmem:[%s1666_s0 + $0x84] ss:$16 sps:$4 sm:$0xff]   ;;  %v1202_v49 = vld [vmem:[%s1666_s0 + $0x8c] ss:$16 sps:$4 sm:$0xff]  }
  0x13   :  { %v1204_v50 = vld [vmem:[%s1666_s0 + $0x80] ss:$16 sps:$4 sm:$0xff]   ;;  %v1205_v51 = vld [vmem:[%s1666_s0 + $0x88] ss:$16 sps:$4 sm:$0xff]   ;;  %v1206_v52 = vld [vmem:[%s1666_s0 + $0xa4] ss:$16 sps:$4 sm:$0xff]  }
  0x14   :  { %1025 = vmatpush3.bf16.msra.mxu0 %v1162_v18  ;;  %v1208_v53 = vld [vmem:[%s1666_s0 + $0xac] ss:$16 sps:$4 sm:$0xff]   ;;  %v1210_v54 = vld [vmem:[%s1666_s0 + $0xa0] ss:$16 sps:$4 sm:$0xff]   ;;  %v1211_v55 = vld [vmem:[%s1666_s0 + $0xa8] ss:$16 sps:$4 sm:$0xff]  }
  0x15   :  { %1089 = vmatpush3.bf16.msra.mxu1 %v1163_v19  ;;  %1026 = vmatprep.subr.bf16.mxu0 %v1164_v20  ;;  %v1212_v56 = vld [vmem:[%s1666_s0 + $0xc4] ss:$16 sps:$4 sm:$0xff]   ;;  %v1214_v57 = vld [vmem:[%s1666_s0 + $0xcc] ss:$16 sps:$4 sm:$0xff]   ;;  %v1216_v58 = vld [vmem:[%s1666_s0 + $0xc0] ss:$16 sps:$4 sm:$0xff]  }
  0x16   :  { %1090 = vmatprep.subr.bf16.mxu1 %v1165_v21  ;;  %v1217_v59 = vld [vmem:[%s1666_s0 + $0xc8] ss:$16 sps:$4 sm:$0xff]   ;;  %v1218_v60 = vld [vmem:[%s1666_s0 + $0xe4] ss:$16 sps:$4 sm:$0xff]   ;;  %v1220_v61 = vld [vmem:[%s1666_s0 + $0xec] ss:$16 sps:$4 sm:$0xff]  }
  0x17   :  { %v1222_v62 = vld [vmem:[%s1666_s0 + $0xe0] ss:$16 sps:$4 sm:$0xff]   ;;  %v1223_v63 = vld [vmem:[%s1666_s0 + $0xe8] ss:$16 sps:$4 sm:$0xff]  }
  0x18   :  { %1027 = vmatpush3.bf16.msra.mxu0 %v1166_v22 }
  0x19   :  { %1091 = vmatpush3.bf16.msra.mxu1 %v1167_v23  ;;  %1028 = vmatprep.subr.bf16.mxu0 %v1168_v24 }
  0x1a   :  { %1092 = vmatprep.subr.bf16.mxu1 %v1169_v25 }
  0x1c   :  { %1029 = vmatpush3.bf16.msra.mxu0 %v1170_v26 }
  0x1d   :  { %1093 = vmatpush3.bf16.msra.mxu1 %v1171_v27  ;;  %1030 = vmatprep.subr.bf16.mxu0 %v1172_v28 }
  0x1e   :  { %1094 = vmatprep.subr.bf16.mxu1 %v1173_v29 }
  0x20   :  { %1031 = vmatpush3.bf16.msra.mxu0 %v1174_v30 }
  0x21   :  { %1095 = vmatpush3.bf16.msra.mxu1 %v1175_v31 }
  0x23   :  { %499 = vmatmul.mubr.bf16.vlgmr.msra.gmra.mrb[0].mxu0 %v1176_v32 }
  0x24   :  { %596 = vmatmul.mubr.bf16.vlgmr.msra.gmra.mrb[0].mxu1 %v1179_v34  ;;  %506 = vmatprep.mubr.bf16.mxu0 %v1182_v36 }
  0x25   :  { %603 = vmatprep.mubr.bf16.mxu1 %v1184_v37 }
  0x2b   :  { %507 = vmatmul.mubr.bf16.gmra.mrb[4].mxu0 %v1186_v38 }
  0x2c   :  { %604 = vmatmul.mubr.bf16.gmra.mrb[4].mxu1 %v1187_v39  ;;  %514 = vmatprep.mubr.bf16.mxu0 %v1188_v40 }
  0x2d   :  { %611 = vmatprep.mubr.bf16.mxu1 %v1190_v41 }
  0x33   :  { %515 = vmatmul.mubr.bf16.gmra.mrb[8].mxu0 %v1192_v42 }
  0x34   :  { %612 = vmatmul.mubr.bf16.gmra.mrb[8].mxu1 %v1193_v43  ;;  %522 = vmatprep.mubr.bf16.mxu0 %v1194_v44 }
  0x35   :  { %619 = vmatprep.mubr.bf16.mxu1 %v1196_v45 }
  0x3b   :  { %523 = vmatmul.mubr.bf16.gmra.mrb[12].mxu0 %v1198_v46 }
  0x3c   :  { %620 = vmatmul.mubr.bf16.gmra.mrb[12].mxu1 %v1199_v47  ;;  %530 = vmatprep.mubr.bf16.mxu0 %v1200_v48 }
  0x3d   :  { %627 = vmatprep.mubr.bf16.mxu1 %v1202_v49 }
  0x43   :  { %531 = vmatmul.mubr.bf16.gmra.mrb[16].mxu0 %v1204_v50 }
  0x44   :  { %628 = vmatmul.mubr.bf16.gmra.mrb[16].mxu1 %v1205_v51  ;;  %538 = vmatprep.mubr.bf16.mxu0 %v1206_v52 }
  0x45   :  { %635 = vmatprep.mubr.bf16.mxu1 %v1208_v53 }
  0x4b   :  { %539 = vmatmul.mubr.bf16.gmra.mrb[20].mxu0 %v1210_v54 }
  0x4c   :  { %636 = vmatmul.mubr.bf16.gmra.mrb[20].mxu1 %v1211_v55  ;;  %546 = vmatprep.mubr.bf16.mxu0 %v1212_v56 }
  0x4d   :  { %643 = vmatprep.mubr.bf16.mxu1 %v1214_v57 }
  0x53   :  { %547 = vmatmul.mubr.bf16.gmra.mrb[24].mxu0 %v1216_v58 }
  0x54   :  { %644 = vmatmul.mubr.bf16.gmra.mrb[24].mxu1 %v1217_v59  ;;  %554 = vmatprep.mubr.bf16.mxu0 %v1218_v60 }
  0x55   :  { %651 = vmatprep.mubr.bf16.mxu1 %v1220_v61 }
  0x5b   :  { %555 = vmatmul.mubr.bf16.gmra.mrb[28].mxu0 %v1222_v62 }
  0x5c   :  { %652 = vmatmul.mubr.bf16.gmra.mrb[28].mxu1 %v1223_v63 }
  0xf6   :  { %v1032_v0 = vpop.f32.mrb[0].mxu0 }
  0xf7   :  { %v1096_v1 = vpop.f32.mrb[0].mxu1  ;;  %v1033_v2 = vpop.f32.mrb[1].mxu0 }
  0xf8   :  { %v1034_v3 = vadd.f32 %v1033_v2, %v1032_v0  ;;  %v1097_v4 = vpop.f32.mrb[1].mxu1  ;;  %v1035_v5 = vpop.f32.mrb[2].mxu0 }
  0xf9   :  { %v1098_v6 = vadd.f32 %v1097_v4, %v1096_v1  ;;  %v1099_v7 = vpop.f32.mrb[2].mxu1  ;;  %v1036_v8 = vpop.f32.mrb[3].mxu0 }
  0xfa   :  { %v1037_v9 = vadd.f32 %v1036_v8, %v1035_v5  ;;  %v1100_v10 = vpop.f32.mrb[3].mxu1 }
  0xfb   :  { %v1443_v11 = vadd.f32 %v1098_v6, %v1034_v3  ;;  %v1101_v12 = vadd.f32 %v1100_v10, %v1099_v7 }
  0xfd   :  { %v1445_v13 = vadd.f32 %v1101_v12, %v1037_v9  ;;  %v661_v15 = vsel %vm660_vm0, %v1443_v11, 0.0 }
  0xfe   :  { %v1038_v14 = vpop.f32.mrb[4].mxu0 }
  0xff   :  { %v662_v16 = vsel %vm660_vm0, %v1445_v13, 0.0  ;;  %v1102_v17 = vpop.f32.mrb[4].mxu1  ;;  %v1039_v18 = vpop.f32.mrb[5].mxu0 }
 0x100   :  { %v663_v19 = vadd.f32 %v662_v16, %v661_v15  ;;  %v1040_v20 = vadd.f32 %v1039_v18, %v1038_v14  ;;  %v1103_v21 = vpop.f32.mrb[5].mxu1  ;;  %v1041_v22 = vpop.f32.mrb[6].mxu0 }
 0x101   :  { %v1104_v23 = vadd.f32 %v1103_v21, %v1102_v17  ;;  %v1105_v24 = vpop.f32.mrb[6].mxu1  ;;  %v1042_v25 = vpop.f32.mrb[7].mxu0 }
 0x102   :  { %v1043_v26 = vadd.f32 %v1042_v25, %v1041_v22  ;;  %v1106_v27 = vpop.f32.mrb[7].mxu1 }
 0x103   :  { %v1451_v28 = vadd.f32 %v1104_v23, %v1040_v20  ;;  %v1107_v29 = vadd.f32 %v1106_v27, %v1105_v24 }
 0x105   :  { %v664_v30 = vsel %vm660_vm0, %v1451_v28, 0.0  ;;  %v1455_v31 = vadd.f32 %v1107_v29, %v1043_v26 }
 0x106   :  { %v665_v32 = vadd.f32 %v664_v30, %v663_v19  ;;  %v1044_v33 = vpop.f32.mrb[8].mxu0 }
 0x107   :  { %v666_v34 = vsel %vm660_vm0, %v1455_v31, 0.0  ;;  %v1108_v35 = vpop.f32.mrb[8].mxu1  ;;  %v1045_v36 = vpop.f32.mrb[9].mxu0 }
 0x108   :  { %v667_v37 = vadd.f32 %v666_v34, %v665_v32  ;;  %v1046_v38 = vadd.f32 %v1045_v36, %v1044_v33  ;;  %v1109_v39 = vpop.f32.mrb[9].mxu1  ;;  %v1047_v40 = vpop.f32.mrb[10].mxu0 }
 0x109   :  { %v1110_v41 = vadd.f32 %v1109_v39, %v1108_v35  ;;  %v1111_v42 = vpop.f32.mrb[10].mxu1  ;;  %v1048_v43 = vpop.f32.mrb[11].mxu0 }
 0x10a   :  { %v1049_v44 = vadd.f32 %v1048_v43, %v1047_v40  ;;  %v1112_v45 = vpop.f32.mrb[11].mxu1 }
 0x10b   :  { %v1459_v46 = vadd.f32 %v1110_v41, %v1046_v38  ;;  %v1113_v47 = vadd.f32 %v1112_v45, %v1111_v42 }
 0x10d   :  { %v668_v48 = vsel %vm660_vm0, %v1459_v46, 0.0  ;;  %v1463_v49 = vadd.f32 %v1113_v47, %v1049_v44 }
 0x10e   :  { %v669_v50 = vadd.f32 %v668_v48, %v667_v37  ;;  %v1050_v51 = vpop.f32.mrb[12].mxu0 }
 0x10f   :  { %v670_v52 = vsel %vm660_vm0, %v1463_v49, 0.0  ;;  %v1114_v53 = vpop.f32.mrb[12].mxu1  ;;  %v1051_v54 = vpop.f32.mrb[13].mxu0 }
 0x110   :  { %v671_v55 = vadd.f32 %v670_v52, %v669_v50  ;;  %v1052_v56 = vadd.f32 %v1051_v54, %v1050_v51  ;;  %v1115_v57 = vpop.f32.mrb[13].mxu1  ;;  %v1053_v58 = vpop.f32.mrb[14].mxu0 }
 0x111   :  { %v1116_v59 = vadd.f32 %v1115_v57, %v1114_v53  ;;  %v1117_v60 = vpop.f32.mrb[14].mxu1  ;;  %v1054_v61 = vpop.f32.mrb[15].mxu0 }
 0x112   :  { %v1055_v62 = vadd.f32 %v1054_v61, %v1053_v58  ;;  %v1118_v63 = vpop.f32.mrb[15].mxu1 }
 0x113   :  { %v1467_v0 = vadd.f32 %v1116_v59, %v1052_v56  ;;  %v1119_v1 = vadd.f32 %v1118_v63, %v1117_v60 }
 0x115   :  { %v672_v2 = vsel %vm660_vm0, %v1467_v0, 0.0  ;;  %v1471_v3 = vadd.f32 %v1119_v1, %v1055_v62 }
 0x116   :  { %v673_v4 = vadd.f32 %v672_v2, %v671_v55  ;;  %v1056_v5 = vpop.f32.mrb[16].mxu0 }
 0x117   :  { %v674_v6 = vsel %vm660_vm0, %v1471_v3, 0.0  ;;  %v1120_v7 = vpop.f32.mrb[16].mxu1  ;;  %v1057_v8 = vpop.f32.mrb[17].mxu0 }
 0x118   :  { %v675_v9 = vadd.f32 %v674_v6, %v673_v4  ;;  %v1058_v10 = vadd.f32 %v1057_v8, %v1056_v5  ;;  %v1121_v12 = vpop.f32.mrb[17].mxu1  ;;  %v1059_v14 = vpop.f32.mrb[18].mxu0 }
 0x119   :  { %v1122_v15 = vadd.f32 %v1121_v12, %v1120_v7  ;;  %v1123_v16 = vpop.f32.mrb[18].mxu1  ;;  %v1060_v17 = vpop.f32.mrb[19].mxu0 }
 0x11a   :  { %v1061_v18 = vadd.f32 %v1060_v17, %v1059_v14  ;;  %v1124_v19 = vpop.f32.mrb[19].mxu1 }
 0x11b   :  { %v1475_v20 = vadd.f32 %v1122_v15, %v1058_v10  ;;  %v1125_v21 = vadd.f32 %v1124_v19, %v1123_v16 }
 0x11d   :  { %v676_v22 = vsel %vm660_vm0, %v1475_v20, 0.0  ;;  %v1479_v23 = vadd.f32 %v1125_v21, %v1061_v18 }
 0x11e   :  { %v677_v24 = vadd.f32 %v676_v22, %v675_v9  ;;  %v1062_v25 = vpop.f32.mrb[20].mxu0 }
 0x11f   :  { %v678_v26 = vsel %vm660_vm0, %v1479_v23, 0.0  ;;  %v1126_v27 = vpop.f32.mrb[20].mxu1  ;;  %v1063_v29 = vpop.f32.mrb[21].mxu0 }
 0x120   :  { %v679_v30 = vadd.f32 %v678_v26, %v677_v24  ;;  %v1064_v32 = vadd.f32 %v1063_v29, %v1062_v25  ;;  %v1127_v33 = vpop.f32.mrb[21].mxu1  ;;  %v1065_v34 = vpop.f32.mrb[22].mxu0 }
 0x121   :  { %v1128_v35 = vadd.f32 %v1127_v33, %v1126_v27  ;;  %v1129_v36 = vpop.f32.mrb[22].mxu1  ;;  %v1066_v37 = vpop.f32.mrb[23].mxu0 }
 0x122   :  { %v1067_v38 = vadd.f32 %v1066_v37, %v1065_v34  ;;  %v1130_v39 = vpop.f32.mrb[23].mxu1 }
 0x123   :  { %v638_v40 = vadd.f32 %v1128_v35, %v1064_v32  ;;  %v1131_v41 = vadd.f32 %v1130_v39, %v1129_v36 }
 0x125   :  { %v680_v42 = vsel %vm660_vm0, %v638_v40, 0.0  ;;  %v641_v43 = vadd.f32 %v1131_v41, %v1067_v38 }
 0x126   :  { %v681_v44 = vadd.f32 %v680_v42, %v679_v30  ;;  %v1068_v45 = vpop.f32.mrb[24].mxu0 }
 0x127   :  { %v682_v47 = vsel %vm660_vm0, %v641_v43, 0.0  ;;  %v1132_v48 = vpop.f32.mrb[24].mxu1  ;;  %v1069_v50 = vpop.f32.mrb[25].mxu0 }
 0x128   :  { %v683_v51 = vadd.f32 %v682_v47, %v681_v44  ;;  %v1070_v52 = vadd.f32 %v1069_v50, %v1068_v45  ;;  %v1133_v53 = vpop.f32.mrb[25].mxu1  ;;  %v1071_v54 = vpop.f32.mrb[26].mxu0 }
 0x129   :  { %v1134_v55 = vadd.f32 %v1133_v53, %v1132_v48  ;;  %v1135_v56 = vpop.f32.mrb[26].mxu1  ;;  %v1072_v57 = vpop.f32.mrb[27].mxu0 }
 0x12a   :  { %v1073_v58 = vadd.f32 %v1072_v57, %v1071_v54  ;;  %v1136_v59 = vpop.f32.mrb[27].mxu1 }
 0x12b   :  { %v646_v60 = vadd.f32 %v1134_v55, %v1070_v52  ;;  %v1137_v61 = vadd.f32 %v1136_v59, %v1135_v56 }
 0x12d   :  { %v684_v62 = vsel %vm660_vm0, %v646_v60, 0.0  ;;  %v649_v63 = vadd.f32 %v1137_v61, %v1073_v58 }
 0x12e   :  { %v685_v1 = vadd.f32 %v684_v62, %v683_v51  ;;  %v1074_v2 = vpop.f32.mrb[28].mxu0 }
 0x12f   :  { %v686_v4 = vsel %vm660_vm0, %v649_v63, 0.0  ;;  %v1138_v5 = vpop.f32.mrb[28].mxu1  ;;  %v1075_v6 = vpop.f32.mrb[29].mxu0 }
 0x130   :  { %v687_v7 = vadd.f32 %v686_v4, %v685_v1  ;;  %v1076_v8 = vadd.f32 %v1075_v6, %v1074_v2  ;;  %v1139_v9 = vpop.f32.mrb[29].mxu1  ;;  %v1077_v10 = vpop.f32.mrb[30].mxu0 }
 0x131   :  { %v1140_v12 = vadd.f32 %v1139_v9, %v1138_v5  ;;  %v1141_v14 = vpop.f32.mrb[30].mxu1  ;;  %v1078_v15 = vpop.f32.mrb[31].mxu0 }
 0x132   :  { %v1079_v16 = vadd.f32 %v1078_v15, %v1077_v10  ;;  %v1142_v17 = vpop.f32.mrb[31].mxu1 }
 0x133   :  { %v654_v18 = vadd.f32 %v1140_v12, %v1076_v8  ;;  %v1143_v19 = vadd.f32 %v1142_v17, %v1141_v14 }
 0x135   :  { %v688_v21 = vsel %vm660_vm0, %v654_v18, 0.0  ;;  %v657_v22 = vadd.f32 %v1143_v19, %v1079_v16 }
 0x136   :  { %v689_v24 = vadd.f32 %v688_v21, %v687_v7 }
 0x137   :  { %v690_v25 = vsel %vm660_vm0, %v657_v22, 0.0 }
 0x138   :  { %v691_v26 = vadd.f32 %v690_v25, %v689_v24 }
 0x13a   :  { %v692_v27 = vrot.slane %v691_v26, 4 }
 0x13c   :  { %v693_v29 = vadd.f32 %v692_v27, %v691_v26 }
 0x13e   :  { %v694_v30 = vrot.slane %v693_v29, 2 }
 0x140   :  { %v695_v32 = vadd.f32 %v694_v30, %v693_v29 }
 0x142   :  { %v696_v33 = vrot.slane %v695_v32, 1 }
 0x144   :  { %v697_v34 = vadd.f32 %v696_v33, %v695_v32 }
 0x146   :  { %v698_v35 = vmul.f32 0.0078125, %v697_v34 }
 0x148   :  { %v1490_v36 = vsub.f32 %v1443_v11, %v698_v35  ;;  %v1493_v37 = vsub.f32 %v1445_v13, %v698_v35  ;;  %v1496_v38 = vsub.f32 %v1451_v28, %v698_v35  ;;  %v1499_v39 = vsub.f32 %v1455_v31, %v698_v35 }
 0x149   :  { %v1502_v41 = vsub.f32 %v1459_v46, %v698_v35  ;;  %v1505_v42 = vsub.f32 %v1463_v49, %v698_v35  ;;  %v1508_v44 = vsub.f32 %v1467_v0, %v698_v35  ;;  %v1511_v11 = vsub.f32 %v1471_v3, %v698_v35 }
 0x14a   :  { %v1514_v13 = vsub.f32 %v1475_v20, %v698_v35  ;;  %v1517_v28 = vsub.f32 %v1479_v23, %v698_v35  ;;  %v1519_v31 = vsub.f32 %v638_v40, %v698_v35  ;;  %v1521_v45 = vsub.f32 %v641_v43, %v698_v35 }
 0x14b   :  { %v1523_v46 = vsub.f32 %v646_v60, %v698_v35  ;;  %v1525_v49 = vsub.f32 %v649_v63, %v698_v35  ;;  %v1527_v47 = vsub.f32 %v654_v18, %v698_v35  ;;  %v1529_v0 = vsub.f32 %v657_v22, %v698_v35 }
 0x14c   :  { %v715_v3 = vmul.f32 %v1490_v36, %v1490_v36  ;;  %v716_v20 = vmul.f32 %v1493_v37, %v1493_v37  ;;  %v717_v23 = vmul.f32 %v1496_v38, %v1496_v38  ;;  %v718_v40 = vmul.f32 %v1499_v39, %v1499_v39 }
 0x14d   :  { %v719_v51 = vmul.f32 %v1502_v41, %v1502_v41  ;;  %v720_v54 = vmul.f32 %v1505_v42, %v1505_v42  ;;  %v721_v57 = vmul.f32 %v1508_v44, %v1508_v44  ;;  %v722_v60 = vmul.f32 %v1511_v11, %v1511_v11 }
 0x14e   :  { %v731_v43 = vsel %vm660_vm0, %v715_v3, 0.0  ;;  %v732_v48 = vsel %vm660_vm0, %v716_v20, 0.0  ;;  %v734_v52 = vsel %vm660_vm0, %v717_v23, 0.0  ;;  %v736_v55 = vsel %vm660_vm0, %v718_v40, 0.0 }
 0x14f   :  { %v733_v50 = vadd.f32 %v732_v48, %v731_v43  ;;  %v738_v58 = vsel %vm660_vm0, %v719_v51, 0.0  ;;  %v740_v61 = vsel %vm660_vm0, %v720_v54, 0.0  ;;  %v723_v63 = vmul.f32 %v1514_v13, %v1514_v13 }
 0x150   :  { %v742_v1 = vsel %vm660_vm0, %v721_v57, 0.0  ;;  %v724_v4 = vmul.f32 %v1517_v28, %v1517_v28  ;;  %v744_v5 = vsel %vm660_vm0, %v722_v60, 0.0  ;;  %v725_v7 = vmul.f32 %v1519_v31, %v1519_v31 }
 0x151   :  { %v735_v53 = vadd.f32 %v734_v52, %v733_v50  ;;  %v746_v8 = vsel %vm660_vm0, %v723_v63, 0.0  ;;  %v726_v10 = vmul.f32 %v1521_v45, %v1521_v45  ;;  %v727_v15 = vmul.f32 %v1523_v46, %v1523_v46 }
 0x152   :  { %v748_v12 = vsel %vm660_vm0, %v724_v4, 0.0  ;;  %v750_v16 = vsel %vm660_vm0, %v725_v7, 0.0  ;;  %v728_v18 = vmul.f32 %v1525_v49, %v1525_v49  ;;  %v729_v22 = vmul.f32 %v1527_v47, %v1527_v47  ;;  %v983_v4 = vld [vmem:[%s1668_s3] ss:$0 sm:$0xff] }
 0x153   :  { %v737_v56 = vadd.f32 %v736_v55, %v735_v53  ;;  %v752_v19 = vsel %vm660_vm0, %v726_v10, 0.0  ;;  %v754_v24 = vsel %vm660_vm0, %v727_v15, 0.0  ;;  %v730_v26 = vmul.f32 %v1529_v0, %v1529_v0  ;;  %v769_v53 = vld [vmem:[%s1667_s2] sm:$0x1] }
 0x154   :  { %v756_v27 = vsel %vm660_vm0, %v728_v18, 0.0  ;;  %v758_v30 = vsel %vm660_vm0, %v729_v22, 0.0  ;;  %v774_v51 = vlaneseq }
 0x155   :  { %v739_v59 = vadd.f32 %v738_v58, %v737_v56  ;;  %v760_v33 = vsel %vm660_vm0, %v730_v26, 0.0 }
 0x156   :  { %v775_v52 = vshrl.u32 %v774_v51, 7 }
 0x157   :  { %v741_v62 = vadd.f32 %v740_v61, %v739_v59 }
 0x158   :  { %v776_v54 = vsub.s32 0, %v775_v52 }
 0x159   :  { %v743_v2 = vadd.f32 %v742_v1, %v741_v62 }
 0x15b   :  { %v745_v6 = vadd.f32 %v744_v5, %v743_v2 }
 0x15d   :  { %v747_v9 = vadd.f32 %v746_v8, %v745_v6 }
 0x15f   :  { %v749_v14 = vadd.f32 %v748_v12, %v747_v9 }
 0x161   :  { %v751_v17 = vadd.f32 %v750_v16, %v749_v14 }
 0x163   :  { %v753_v21 = vadd.f32 %v752_v19, %v751_v17 }
 0x165   :  { %v755_v25 = vadd.f32 %v754_v24, %v753_v21 }
 0x167   :  { %v757_v29 = vadd.f32 %v756_v27, %v755_v25 }
 0x169   :  { %v759_v32 = vadd.f32 %v758_v30, %v757_v29 }
 0x16b   :  { %v761_v34 = vadd.f32 %v760_v33, %v759_v32 }
 0x16d   :  { %v762_v35 = vrot.slane %v761_v34, 4 }
 0x16f   :  { %v763_v3 = vadd.f32 %v762_v35, %v761_v34 }
 0x171   :  { %v764_v20 = vrot.slane %v763_v3, 2 }
 0x173   :  { %v765_v23 = vadd.f32 %v764_v20, %v763_v3 }
 0x175   :  { %v766_v40 = vrot.slane %v765_v23, 1 }
 0x177   :  { %v767_v43 = vadd.f32 %v766_v40, %v765_v23 }
 0x179   :  { %v768_v48 = vmul.f32 0.0078125, %v767_v43 }
 0x17b   :  { %v770_v50 = vadd.f32 1e-05, %v768_v48 }
 0x17d   :  { %1224 = vrsqrt.f32 %v770_v50 }
 0x187   :  { %v1225_v55 = vpop.eup %1224 }
 0x188   :  { %v772_v56 = vmul.f32 %v1225_v55, %v769_v53 }
 0x18a   :  { %v777_v57 = vrot.slane %v772_v56, %v776_v54 }
 0x18c   :  { %v779_v58 = vmul.f32 %v777_v57, %v1490_v36  ;;  %v780_v59 = vmul.f32 %v777_v57, %v1493_v37  ;;  %v781_v60 = vmul.f32 %v777_v57, %v1496_v38  ;;  %v782_v61 = vmul.f32 %v777_v57, %v1499_v39 }
 0x18d   :  { %v783_v62 = vmul.f32 %v777_v57, %v1502_v41  ;;  %v784_v63 = vmul.f32 %v777_v57, %v1505_v42  ;;  %v785_v1 = vmul.f32 %v777_v57, %v1508_v44  ;;  %v786_v2 = vmul.f32 %v777_v57, %v1511_v11 }
 0x18e   :  { %v787_v36 = vmul.f32 %v777_v57, %v1514_v13  ;;  %v788_v37 = vmul.f32 %v777_v57, %v1517_v28  ;;  %v789_v38 = vmul.f32 %v777_v57, %v1519_v31  ;;  %v790_v39 = vmul.f32 %v777_v57, %v1521_v45 }
 0x18f   :  { %v791_v41 = vmul.f32 %v777_v57, %v1523_v46  ;;  %v792_v42 = vmul.f32 %v777_v57, %v1525_v49  ;;  %v793_v44 = vmul.f32 %v777_v57, %v1527_v47  ;;  %v794_v11 = vmul.f32 %v777_v57, %v1529_v0 }
 0x190   :  { %v802_v5 = vadd.f32 %v983_v4, %v779_v58  ;;  %v803_v6 = vadd.f32 %v983_v4, %v780_v59  ;;  %v804_v7 = vadd.f32 %v983_v4, %v781_v60  ;;  %v805_v8 = vadd.f32 %v983_v4, %v782_v61 }
 0x191   :  { %v806_v13 = vadd.f32 %v983_v4, %v783_v62  ;;  %v807_v9 = vadd.f32 %v983_v4, %v784_v63  ;;  %v808_v28 = vadd.f32 %v983_v4, %v785_v1  ;;  %v809_v10 = vadd.f32 %v983_v4, %v786_v2 }
 0x192   :  { %v810_v31 = vadd.f32 %v983_v4, %v787_v36  ;;  %v811_v12 = vadd.f32 %v983_v4, %v788_v37  ;;  %v812_v45 = vadd.f32 %v983_v4, %v789_v38  ;;  %v813_v14 = vadd.f32 %v983_v4, %v790_v39 }
 0x193   :  { %v814_v46 = vadd.f32 %v983_v4, %v791_v41  ;;  %v815_v15 = vadd.f32 %v983_v4, %v792_v42  ;;  %v816_v49 = vadd.f32 %v983_v4, %v793_v44  ;;  %v817_v16 = vadd.f32 %v983_v4, %v794_v11 }
 0x194   :  { %v818_v47 = vmax.f32 %v802_v5, 0.0  ;;  %v819_v17 = vmax.f32 %v803_v6, 0.0  ;;  %v820_v0 = vmax.f32 %v804_v7, 0.0  ;;  %v821_v18 = vmax.f32 %v805_v8, 0.0 }
 0x195   :  { %v822_v19 = vmax.f32 %v806_v13, 0.0  ;;  %v823_v21 = vmax.f32 %v807_v9, 0.0  ;;  %v824_v22 = vmax.f32 %v808_v28, 0.0  ;;  %v825_v24 = vmax.f32 %v809_v10, 0.0 }
 0x196   :  { %v826_v25 = vmax.f32 %v810_v31, 0.0  ;;  %v827_v26 = vmax.f32 %v811_v12, 0.0  ;;  %v828_v27 = vmax.f32 %v812_v45, 0.0  ;;  %v829_v29 = vmax.f32 %v813_v14, 0.0 }
 0x197   :  { %v830_v30 = vmax.f32 %v814_v46, 0.0  ;;  %v831_v32 = vmax.f32 %v815_v15, 0.0  ;;  %v832_v33 = vmax.f32 %v816_v49, 0.0  ;;  %v833_v34 = vmax.f32 %v817_v16, 0.0 }
 0x198   :  { %v1000_v35 = vpack.c.bf16 %v818_v47, %v818_v47  ;;  %v1001_v3 = vpack.c.bf16 %v819_v17, %v819_v17  ;;  %v1002_v20 = vpack.c.bf16 %v820_v0, %v820_v0  ;;  %v1003_v23 = vpack.c.bf16 %v821_v18, %v821_v18 }
 0x199   :  { %v1004_v40 = vpack.c.bf16 %v822_v19, %v822_v19  ;;  %v1005_v43 = vpack.c.bf16 %v823_v21, %v823_v21  ;;  %v1006_v48 = vpack.c.bf16 %v824_v22, %v824_v22  ;;  %v1007_v50 = vpack.c.bf16 %v825_v24, %v825_v24 }
 0x19a   :  { %v1008_v51 = vpack.c.bf16 %v826_v25, %v826_v25  ;;  %v1009_v52 = vpack.c.bf16 %v827_v26, %v827_v26  ;;  %v1010_v53 = vpack.c.bf16 %v828_v27, %v828_v27  ;;  %v1011_v54 = vpack.c.bf16 %v829_v29, %v829_v29  ;;  %899 = vst.msk [vmem:[%s1669_s4] sm:$0xf] %vm898_vm1, %v1000_v35 }
 0x19b   :  { %900 = vst.msk [vmem:[%s1669_s4 + $0x4] sm:$0xf] %vm898_vm1, %v1001_v3  ;;  %901 = vst.msk [vmem:[%s1669_s4 + $0x8] sm:$0xf] %vm898_vm1, %v1002_v20  ;;  %v1012_v55 = vpack.c.bf16 %v830_v30, %v830_v30  ;;  %v1013_v56 = vpack.c.bf16 %v831_v32, %v831_v32  ;;  %v1014_v57 = vpack.c.bf16 %v832_v33, %v832_v33 }
 0x19c   :  { %902 = vst.msk [vmem:[%s1669_s4 + $0xc] sm:$0xf] %vm898_vm1, %v1003_v23  ;;  %v1015_v58 = vpack.c.bf16 %v833_v34, %v833_v34  ;;  %903 = vst.msk [vmem:[%s1669_s4 + $0x10] sm:$0xf] %vm898_vm1, %v1004_v40 }
 0x19d   :  { %904 = vst.msk [vmem:[%s1669_s4 + $0x14] sm:$0xf] %vm898_vm1, %v1005_v43  ;;  %905 = vst.msk [vmem:[%s1669_s4 + $0x18] sm:$0xf] %vm898_vm1, %v1006_v48 }
 0x19e   :  { %906 = vst.msk [vmem:[%s1669_s4 + $0x1c] sm:$0xf] %vm898_vm1, %v1007_v50  ;;  %907 = vst.msk [vmem:[%s1669_s4 + $0x20] sm:$0xf] %vm898_vm1, %v1008_v51 }
 0x19f   :  { %908 = vst.msk [vmem:[%s1669_s4 + $0x24] sm:$0xf] %vm898_vm1, %v1009_v52  ;;  %909 = vst.msk [vmem:[%s1669_s4 + $0x28] sm:$0xf] %vm898_vm1, %v1010_v53 }
 0x1a0   :  { %910 = vst.msk [vmem:[%s1669_s4 + $0x2c] sm:$0xf] %vm898_vm1, %v1011_v54  ;;  %911 = vst.msk [vmem:[%s1669_s4 + $0x30] sm:$0xf] %vm898_vm1, %v1012_v55 }
 0x1a1   :  { %912 = vst.msk [vmem:[%s1669_s4 + $0x34] sm:$0xf] %vm898_vm1, %v1013_v56  ;;  %913 = vst.msk [vmem:[%s1669_s4 + $0x38] sm:$0xf] %vm898_vm1, %v1014_v57 }
 0x1a2   :  { %914 = vst.msk [vmem:[%s1669_s4 + $0x3c] sm:$0xf] %vm898_vm1, %v1015_v58 }

// kernel: patch_discriminator_t2s.8
= control target key start
LH: loop header
LB: loop body
LE: loop exit
PB: predicated region body
PF: predicated region fallthrough
CT: control target
= control target key end

     0   :  { %s1458_s1 = inlined_call_operand.vmem [shape: bf16[1024,128], index: 1, kind: input, shape index: {}]   ;;  %s1459_s0 = inlined_call_operand.vmem [shape: bf16[32,1024], index: 0, kind: input, shape index: {}]   ;;  %s1460_s2 = inlined_call_operand.vmem [shape: f32[1,128], index: 2, kind: input, shape index: {}]   ;;  %s1461_s3 = inlined_call_operand.vmem [shape: f32[1,128], index: 3, kind: input, shape index: {}]   ;;  %s1462_s4 = inlined_call_operand.vmem [shape: bf16[32,128], index: 4, kind: output, shape index: {}]  }
   0x1   :  { %v1115_v0 = vld [vmem:[%s1458_s1 + $0x40] sm:$0xff]   ;;  %v1119_v4 = vld [vmem:[%s1458_s1 + $0x48] sm:$0xff]   ;;  %v1123_v8 = vld [vmem:[%s1458_s1 + $0x50] sm:$0xff]  }
   0x2   :  { %v1116_v1 = vld [vmem:[%s1458_s1 + $0xc0] sm:$0xff]   ;;  %1003 = vmatprep.subr.bf16.mxu0 %v1115_v0  ;;  %v1120_v5 = vld [vmem:[%s1458_s1 + $0xc8] sm:$0xff]   ;;  %v1124_v9 = vld [vmem:[%s1458_s1 + $0xd0] sm:$0xff]  }
   0x3   :  { %v1117_v2 = vld [vmem:[%s1458_s1] sm:$0xff]   ;;  %1031 = vmatprep.subr.bf16.mxu1 %v1116_v1  ;;  %v1121_v6 = vld [vmem:[%s1458_s1 + $0x8] sm:$0xff]   ;;  %v1125_v10 = vld [vmem:[%s1458_s1 + $0x10] sm:$0xff]  }
   0x4   :  { %v1118_v3 = vld [vmem:[%s1458_s1 + $0x80] sm:$0xff]   ;;  %1004 = vmatpush3.bf16.msra.mxu0 %v1117_v2  ;;  %v1122_v7 = vld [vmem:[%s1458_s1 + $0x88] sm:$0xff]   ;;  %v1126_v11 = vld [vmem:[%s1458_s1 + $0x90] sm:$0xff]  }
   0x5   :  { %1032 = vmatpush3.bf16.msra.mxu1 %v1118_v3  ;;  %1005 = vmatprep.subr.bf16.mxu0 %v1119_v4  ;;  %v1127_v12 = vld [vmem:[%s1458_s1 + $0x58] sm:$0xff]   ;;  %v1131_v16 = vld [vmem:[%s1458_s1 + $0x60] sm:$0xff]   ;;  %v1135_v20 = vld [vmem:[%s1458_s1 + $0x68] sm:$0xff]  }
   0x6   :  { %1033 = vmatprep.subr.bf16.mxu1 %v1120_v5  ;;  %v1128_v13 = vld [vmem:[%s1458_s1 + $0xd8] sm:$0xff]   ;;  %v1132_v17 = vld [vmem:[%s1458_s1 + $0xe0] sm:$0xff]   ;;  %v1136_v21 = vld [vmem:[%s1458_s1 + $0xe8] sm:$0xff]  }
   0x7   :  { %v1129_v14 = vld [vmem:[%s1458_s1 + $0x18] sm:$0xff]   ;;  %v1133_v18 = vld [vmem:[%s1458_s1 + $0x20] sm:$0xff]   ;;  %v1137_v22 = vld [vmem:[%s1458_s1 + $0x28] sm:$0xff]  }
   0x8   :  { %1006 = vmatpush3.bf16.msra.mxu0 %v1121_v6  ;;  %v1130_v15 = vld [vmem:[%s1458_s1 + $0x98] sm:$0xff]   ;;  %v1134_v19 = vld [vmem:[%s1458_s1 + $0xa0] sm:$0xff]   ;;  %v1138_v23 = vld [vmem:[%s1458_s1 + $0xa8] sm:$0xff]  }
   0x9   :  { %1034 = vmatpush3.bf16.msra.mxu1 %v1122_v7  ;;  %1007 = vmatprep.subr.bf16.mxu0 %v1123_v8  ;;  %v1139_v24 = vld [vmem:[%s1458_s1 + $0x70] sm:$0xff]   ;;  %v1143_v28 = vld [vmem:[%s1458_s1 + $0x78] sm:$0xff]   ;;  %v18_v32 = vld [vmem:[%s1459_s0] sm:$0xff] }
   0xa   :  { %1035 = vmatprep.subr.bf16.mxu1 %v1124_v9  ;;  %v1140_v25 = vld [vmem:[%s1458_s1 + $0xf0] sm:$0xff]   ;;  %v1144_v29 = vld [vmem:[%s1458_s1 + $0xf8] sm:$0xff]   ;;  %v22_v33 = vld [vmem:[%s1459_s0 + $0x20] sm:$0xff] }
   0xb   :  { %v1141_v26 = vld [vmem:[%s1458_s1 + $0x30] sm:$0xff]   ;;  %v1145_v30 = vld [vmem:[%s1458_s1 + $0x38] sm:$0xff]   ;;  %v19_v34 = vld [vmem:[%s1459_s0 + $0x8] sm:$0xff]  ;;  %v903_v35 = vcombine.low %v18_v32, %v22_v33  ;;  %v904_v36 = vcombine.high %v18_v32, %v22_v33 }
   0xc   :  { %1008 = vmatpush3.bf16.msra.mxu0 %v1125_v10  ;;  %v1142_v27 = vld [vmem:[%s1458_s1 + $0xb0] sm:$0xff]   ;;  %v1146_v31 = vld [vmem:[%s1458_s1 + $0xb8] sm:$0xff]   ;;  %v23_v37 = vld [vmem:[%s1459_s0 + $0x28] sm:$0xff] }
   0xd   :  { %1036 = vmatpush3.bf16.msra.mxu1 %v1126_v11  ;;  %1009 = vmatprep.subr.bf16.mxu0 %v1127_v12  ;;  %v905_v38 = vcombine.low %v19_v34, %v23_v37  ;;  %v906_v39 = vcombine.high %v19_v34, %v23_v37  ;;  %v1147_v40 = vld [vmem:[%s1458_s1 + $0x140] sm:$0xff]   ;;  %v1151_v44 = vld [vmem:[%s1458_s1 + $0x148] sm:$0xff]   ;;  %v1155_v48 = vld [vmem:[%s1458_s1 + $0x150] sm:$0xff]  }
   0xe   :  { %1037 = vmatprep.subr.bf16.mxu1 %v1128_v13  ;;  %658 = vmatprep.mubr.bf16.mxu0 %v904_v36  ;;  %v1148_v41 = vld [vmem:[%s1458_s1 + $0x1c0] sm:$0xff]   ;;  %v1152_v45 = vld [vmem:[%s1458_s1 + $0x1c8] sm:$0xff]   ;;  %v1156_v49 = vld [vmem:[%s1458_s1 + $0x1d0] sm:$0xff]  }
   0xf   :  { %707 = vmatprep.mubr.bf16.mxu1 %v906_v39  ;;  %v1149_v42 = vld [vmem:[%s1458_s1 + $0x100] sm:$0xff]   ;;  %v1153_v46 = vld [vmem:[%s1458_s1 + $0x108] sm:$0xff]   ;;  %v1157_v50 = vld [vmem:[%s1458_s1 + $0x110] sm:$0xff]  }
  0x10   :  { %1010 = vmatpush3.bf16.msra.mxu0 %v1129_v14  ;;  %v1150_v43 = vld [vmem:[%s1458_s1 + $0x180] sm:$0xff]   ;;  %v1154_v47 = vld [vmem:[%s1458_s1 + $0x188] sm:$0xff]   ;;  %v1158_v51 = vld [vmem:[%s1458_s1 + $0x190] sm:$0xff]  }
  0x11   :  { %1038 = vmatpush3.bf16.msra.mxu1 %v1130_v15  ;;  %1011 = vmatprep.subr.bf16.mxu0 %v1131_v16  ;;  %v1159_v52 = vld [vmem:[%s1458_s1 + $0x158] sm:$0xff]   ;;  %v1163_v56 = vld [vmem:[%s1458_s1 + $0x160] sm:$0xff]   ;;  %v27_v63 = vld [vmem:[%s1459_s0 + $0x48] sm:$0xff] }
  0x12   :  { %1039 = vmatprep.subr.bf16.mxu1 %v1132_v17  ;;  %v1160_v53 = vld [vmem:[%s1458_s1 + $0x1d8] sm:$0xff]   ;;  %v1164_v57 = vld [vmem:[%s1458_s1 + $0x1e0] sm:$0xff]   ;;  %v31_v0 = vld [vmem:[%s1459_s0 + $0x68] sm:$0xff] }
  0x13   :  { %v1161_v54 = vld [vmem:[%s1458_s1 + $0x118] sm:$0xff]   ;;  %v1165_v58 = vld [vmem:[%s1458_s1 + $0x120] sm:$0xff]   ;;  %v914_v2 = vcombine.high %v27_v63, %v31_v0  ;;  %v1167_v3 = vld [vmem:[%s1458_s1 + $0x168] sm:$0xff]   ;;  %v913_v4 = vcombine.low %v27_v63, %v31_v0 }
  0x14   :  { %1012 = vmatpush3.bf16.msra.mxu0 %v1133_v18  ;;  %v1162_v55 = vld [vmem:[%s1458_s1 + $0x198] sm:$0xff]   ;;  %v1166_v59 = vld [vmem:[%s1458_s1 + $0x1a0] sm:$0xff]   ;;  %v1168_v5 = vld [vmem:[%s1458_s1 + $0x1e8] sm:$0xff]  }
  0x15   :  { %1040 = vmatpush3.bf16.msra.mxu1 %v1134_v19  ;;  %1013 = vmatprep.subr.bf16.mxu0 %v1135_v20  ;;  %v26_v60 = vld [vmem:[%s1459_s0 + $0x40] sm:$0xff]  ;;  %v1169_v6 = vld [vmem:[%s1458_s1 + $0x128] sm:$0xff]   ;;  %v1171_v8 = vld [vmem:[%s1458_s1 + $0x170] sm:$0xff]  }
  0x16   :  { %1041 = vmatprep.subr.bf16.mxu1 %v1136_v21  ;;  %v30_v61 = vld [vmem:[%s1459_s0 + $0x60] sm:$0xff]  ;;  %v1170_v7 = vld [vmem:[%s1458_s1 + $0x1a8] sm:$0xff]   ;;  %v1172_v9 = vld [vmem:[%s1458_s1 + $0x1f0] sm:$0xff]  }
  0x17   :  { %v912_v62 = vcombine.high %v26_v60, %v30_v61  ;;  %v911_v1 = vcombine.low %v26_v60, %v30_v61  ;;  %v1173_v10 = vld [vmem:[%s1458_s1 + $0x130] sm:$0xff]   ;;  %v1175_v12 = vld [vmem:[%s1458_s1 + $0x178] sm:$0xff]  }
  0x18   :  { %1014 = vmatpush3.bf16.msra.mxu0 %v1137_v22  ;;  %v1174_v11 = vld [vmem:[%s1458_s1 + $0x1b0] sm:$0xff]   ;;  %v1176_v13 = vld [vmem:[%s1458_s1 + $0x1f8] sm:$0xff]  }
  0x19   :  { %1042 = vmatpush3.bf16.msra.mxu1 %v1138_v23  ;;  %1015 = vmatprep.subr.bf16.mxu0 %v1139_v24  ;;  %v1177_v14 = vld [vmem:[%s1458_s1 + $0x138] sm:$0xff]   ;;  %v20_v16 = vld [vmem:[%s1459_s0 + $0x10] sm:$0xff] }
  0x1a   :  { %1043 = vmatprep.subr.bf16.mxu1 %v1140_v25  ;;  %v1178_v15 = vld [vmem:[%s1458_s1 + $0x1b8] sm:$0xff]   ;;  %v24_v17 = vld [vmem:[%s1459_s0 + $0x30] sm:$0xff] }
  0x1b   :  { %v21_v18 = vld [vmem:[%s1459_s0 + $0x18] sm:$0xff]  ;;  %v907_v20 = vcombine.low %v20_v16, %v24_v17  ;;  %v908_v21 = vcombine.high %v20_v16, %v24_v17  ;;  %v28_v24 = vld [vmem:[%s1459_s0 + $0x50] sm:$0xff] }
  0x1c   :  { %1016 = vmatpush3.bf16.msra.mxu0 %v1141_v26  ;;  %v25_v19 = vld [vmem:[%s1459_s0 + $0x38] sm:$0xff]  ;;  %v32_v25 = vld [vmem:[%s1459_s0 + $0x70] sm:$0xff] }
  0x1d   :  { %1044 = vmatpush3.bf16.msra.mxu1 %v1142_v27  ;;  %1017 = vmatprep.subr.bf16.mxu0 %v1143_v28  ;;  %v909_v22 = vcombine.low %v21_v18, %v25_v19  ;;  %v910_v23 = vcombine.high %v21_v18, %v25_v19  ;;  %v29_v26 = vld [vmem:[%s1459_s0 + $0x58] sm:$0xff]  ;;  %v916_v27 = vcombine.high %v28_v24, %v32_v25 }
  0x1e   :  { %1045 = vmatprep.subr.bf16.mxu1 %v1144_v29  ;;  %v33_v28 = vld [vmem:[%s1459_s0 + $0x78] sm:$0xff] }
  0x1f   :  { %v918_v29 = vcombine.high %v29_v26, %v33_v28 }
  0x20   :  { %1018 = vmatpush3.bf16.msra.mxu0 %v1145_v30  ;;  %v915_v30 = vcombine.low %v28_v24, %v32_v25 }
  0x21   :  { %1046 = vmatpush3.bf16.msra.mxu1 %v1146_v31  ;;  %1059 = vmatprep.subr.bf16.mxu0 %v1147_v40  ;;  %v917_v31 = vcombine.low %v29_v26, %v33_v28 }
  0x22   :  { %1087 = vmatprep.subr.bf16.mxu1 %v1148_v41 }
  0x23   :  { %659 = vmatmul.mubr.bf16.vlgmr.msra.gmra.mrb[0].mxu0 %v903_v35 }
  0x24   :  { %708 = vmatmul.mubr.bf16.vlgmr.msra.gmra.mrb[0].mxu1 %v905_v38  ;;  %1060 = vmatpush3.bf16.msra.mxu0 %v1149_v42 }
  0x25   :  { %1088 = vmatpush3.bf16.msra.mxu1 %v1150_v43  ;;  %1061 = vmatprep.subr.bf16.mxu0 %v1151_v44 }
  0x26   :  { %1089 = vmatprep.subr.bf16.mxu1 %v1152_v45  ;;  %666 = vmatprep.mubr.bf16.mxu0 %v912_v62 }
  0x27   :  { %715 = vmatprep.mubr.bf16.mxu1 %v914_v2 }
  0x28   :  { %1062 = vmatpush3.bf16.msra.mxu0 %v1153_v46 }
  0x29   :  { %1090 = vmatpush3.bf16.msra.mxu1 %v1154_v47  ;;  %1063 = vmatprep.subr.bf16.mxu0 %v1155_v48 }
  0x2a   :  { %1091 = vmatprep.subr.bf16.mxu1 %v1156_v49 }
  0x2b   :  { %667 = vmatmul.mubr.bf16.gmra.mrb[4].mxu0 %v911_v1 }
  0x2c   :  { %1064 = vmatpush3.bf16.msra.mxu0 %v1157_v50  ;;  %716 = vmatmul.mubr.bf16.gmra.mrb[4].mxu1 %v913_v4 }
  0x2d   :  { %1092 = vmatpush3.bf16.msra.mxu1 %v1158_v51  ;;  %1065 = vmatprep.subr.bf16.mxu0 %v1159_v52 }
  0x2e   :  { %1093 = vmatprep.subr.bf16.mxu1 %v1160_v53  ;;  %756 = vmatprep.mubr.bf16.mxu0 %v908_v21 }
  0x2f   :  { %805 = vmatprep.mubr.bf16.mxu1 %v910_v23 }
  0x30   :  { %1066 = vmatpush3.bf16.msra.mxu0 %v1161_v54 }
  0x31   :  { %1094 = vmatpush3.bf16.msra.mxu1 %v1162_v55  ;;  %1067 = vmatprep.subr.bf16.mxu0 %v1163_v56 }
  0x32   :  { %1095 = vmatprep.subr.bf16.mxu1 %v1164_v57 }
  0x34   :  { %1068 = vmatpush3.bf16.msra.mxu0 %v1165_v58 }
  0x35   :  { %1096 = vmatpush3.bf16.msra.mxu1 %v1166_v59  ;;  %1069 = vmatprep.subr.bf16.mxu0 %v1167_v3 }
  0x36   :  { %1097 = vmatprep.subr.bf16.mxu1 %v1168_v5 }
  0x38   :  { %1070 = vmatpush3.bf16.msra.mxu0 %v1169_v6 }
  0x39   :  { %1098 = vmatpush3.bf16.msra.mxu1 %v1170_v7  ;;  %1071 = vmatprep.subr.bf16.mxu0 %v1171_v8 }
  0x3a   :  { %1099 = vmatprep.subr.bf16.mxu1 %v1172_v9 }
  0x3c   :  { %1072 = vmatpush3.bf16.msra.mxu0 %v1173_v10 }
  0x3d   :  { %1100 = vmatpush3.bf16.msra.mxu1 %v1174_v11  ;;  %1073 = vmatprep.subr.bf16.mxu0 %v1175_v12 }
  0x3e   :  { %1101 = vmatprep.subr.bf16.mxu1 %v1176_v13 }
  0x40   :  { %1074 = vmatpush3.bf16.msra.mxu0 %v1177_v14 }
  0x41   :  { %1102 = vmatpush3.bf16.msra.mxu1 %v1178_v15 }
  0x43   :  { %757 = vmatmul.mubr.bf16.vlgmr.msra.gmra.mrb[8].mxu0 %v907_v20 }
  0x44   :  { %806 = vmatmul.mubr.bf16.vlgmr.msra.gmra.mrb[8].mxu1 %v909_v22  ;;  %764 = vmatprep.mubr.bf16.mxu0 %v916_v27 }
  0x45   :  { %813 = vmatprep.mubr.bf16.mxu1 %v918_v29 }
  0x4b   :  { %765 = vmatmul.mubr.bf16.gmra.mrb[12].mxu0 %v915_v30 }
  0x4c   :  { %814 = vmatmul.mubr.bf16.gmra.mrb[12].mxu1 %v917_v31 }
  0xf6   :  { %v1019_v32 = vpop.f32.mrb[0].mxu0 }
  0xf7   :  { %v1047_v33 = vpop.f32.mrb[0].mxu1  ;;  %v1020_v34 = vpop.f32.mrb[1].mxu0 }
  0xf8   :  { %v1021_v35 = vadd.f32 %v1020_v34, %v1019_v32  ;;  %v1048_v36 = vpop.f32.mrb[1].mxu1  ;;  %v1022_v37 = vpop.f32.mrb[2].mxu0 }
  0xf9   :  { %v1049_v38 = vadd.f32 %v1048_v36, %v1047_v33  ;;  %v1050_v39 = vpop.f32.mrb[2].mxu1  ;;  %v1023_v40 = vpop.f32.mrb[3].mxu0 }
  0xfa   :  { %v1024_v41 = vadd.f32 %v1023_v40, %v1022_v37  ;;  %v1051_v42 = vpop.f32.mrb[3].mxu1 }
  0xfb   :  { %v710_v43 = vadd.f32 %v1049_v38, %v1021_v35  ;;  %v1052_v44 = vadd.f32 %v1051_v42, %v1050_v39 }
  0xfd   :  { %v713_v45 = vadd.f32 %v1052_v44, %v1024_v41 }
  0xfe   :  { %v1025_v46 = vpop.f32.mrb[4].mxu0 }
  0xff   :  { %v1053_v47 = vpop.f32.mrb[4].mxu1  ;;  %v1026_v48 = vpop.f32.mrb[5].mxu0 }
 0x100   :  { %v1027_v49 = vadd.f32 %v1026_v48, %v1025_v46  ;;  %v1054_v50 = vpop.f32.mrb[5].mxu1  ;;  %v1028_v51 = vpop.f32.mrb[6].mxu0 }
 0x101   :  { %v1055_v52 = vadd.f32 %v1054_v50, %v1053_v47  ;;  %v1056_v53 = vpop.f32.mrb[6].mxu1  ;;  %v1029_v54 = vpop.f32.mrb[7].mxu0 }
 0x102   :  { %v1030_v55 = vadd.f32 %v1029_v54, %v1028_v51  ;;  %v1057_v56 = vpop.f32.mrb[7].mxu1 }
 0x103   :  { %v718_v57 = vadd.f32 %v1055_v52, %v1027_v49  ;;  %v1058_v58 = vadd.f32 %v1057_v56, %v1056_v53 }
 0x105   :  { %v721_v59 = vadd.f32 %v1058_v58, %v1030_v55 }
 0x116   :  { %v1075_v60 = vpop.f32.mrb[8].mxu0 }
 0x117   :  { %v1103_v61 = vpop.f32.mrb[8].mxu1  ;;  %v1076_v62 = vpop.f32.mrb[9].mxu0 }
 0x118   :  { %v1104_v63 = vpop.f32.mrb[9].mxu1  ;;  %v1077_v0 = vadd.f32 %v1076_v62, %v1075_v60  ;;  %v1078_v2 = vpop.f32.mrb[10].mxu0 }
 0x119   :  { %v1105_v1 = vadd.f32 %v1104_v63, %v1103_v61  ;;  %v1106_v3 = vpop.f32.mrb[10].mxu1  ;;  %v1079_v4 = vpop.f32.mrb[11].mxu0 }
 0x11a   :  { %v1107_v5 = vpop.f32.mrb[11].mxu1  ;;  %v759_v6 = vadd.f32 %v1077_v0, %v710_v43  ;;  %v1080_v7 = vadd.f32 %v1079_v4, %v1078_v2  ;;  %v983_v0 = vld [vmem:[%s1461_s3] ss:$0 sm:$0xff] }
 0x11b   :  { %v1108_v8 = vadd.f32 %v1107_v5, %v1106_v3 }
 0x11c   :  { %v808_v9 = vadd.f32 %v1105_v1, %v759_v6  ;;  %v762_v10 = vadd.f32 %v1080_v7, %v713_v45 }
 0x11e   :  { %v811_v11 = vadd.f32 %v1108_v8, %v762_v10  ;;  %v1081_v12 = vpop.f32.mrb[12].mxu0 }
 0x11f   :  { %v1109_v13 = vpop.f32.mrb[12].mxu1  ;;  %v1082_v14 = vpop.f32.mrb[13].mxu0 }
 0x120   :  { %v1110_v15 = vpop.f32.mrb[13].mxu1  ;;  %v822_v16 = vadd.f32 %v811_v11, %v808_v9  ;;  %v1083_v17 = vadd.f32 %v1082_v14, %v1081_v12  ;;  %v1084_v19 = vpop.f32.mrb[14].mxu0 }
 0x121   :  { %v1111_v18 = vadd.f32 %v1110_v15, %v1109_v13  ;;  %v1112_v20 = vpop.f32.mrb[14].mxu1  ;;  %v1085_v21 = vpop.f32.mrb[15].mxu0 }
 0x122   :  { %v1113_v22 = vpop.f32.mrb[15].mxu1  ;;  %v767_v23 = vadd.f32 %v1083_v17, %v718_v57  ;;  %v1086_v24 = vadd.f32 %v1085_v21, %v1084_v19  ;;  %v855_v57 = vlaneseq }
 0x123   :  { %v1114_v25 = vadd.f32 %v1113_v22, %v1112_v20 }
 0x124   :  { %v816_v26 = vadd.f32 %v1111_v18, %v767_v23  ;;  %v770_v27 = vadd.f32 %v1086_v24, %v721_v59  ;;  %v856_v58 = vshrl.u32 %v855_v57, 7  ;;  %v850_v59 = vld [vmem:[%s1460_s2] sm:$0x1] }
 0x126   :  { %v823_v28 = vadd.f32 %v822_v16, %v816_v26  ;;  %v819_v29 = vadd.f32 %v1114_v25, %v770_v27  ;;  %v857_v60 = vsub.s32 0, %v856_v58 }
 0x128   :  { %v824_v30 = vadd.f32 %v823_v28, %v819_v29 }
 0x12a   :  { %v825_v31 = vrot.slane %v824_v30, 4 }
 0x12c   :  { %v826_v32 = vadd.f32 %v825_v31, %v824_v30 }
 0x12e   :  { %v827_v33 = vrot.slane %v826_v32, 2 }
 0x130   :  { %v828_v34 = vadd.f32 %v827_v33, %v826_v32 }
 0x132   :  { %v829_v35 = vrot.slane %v828_v34, 1 }
 0x134   :  { %v830_v36 = vadd.f32 %v829_v35, %v828_v34 }
 0x136   :  { %v831_v37 = vmul.f32 0.03125, %v830_v36 }
 0x138   :  { %v832_v38 = vsub.f32 %v808_v9, %v831_v37  ;;  %v833_v39 = vsub.f32 %v811_v11, %v831_v37  ;;  %v834_v40 = vsub.f32 %v816_v26, %v831_v37  ;;  %v835_v41 = vsub.f32 %v819_v29, %v831_v37 }
 0x13a   :  { %v836_v42 = vmul.f32 %v832_v38, %v832_v38  ;;  %v837_v43 = vmul.f32 %v833_v39, %v833_v39  ;;  %v838_v44 = vmul.f32 %v834_v40, %v834_v40  ;;  %v839_v46 = vmul.f32 %v835_v41, %v835_v41 }
 0x13c   :  { %v840_v45 = vadd.f32 %v837_v43, %v836_v42 }
 0x13e   :  { %v841_v47 = vadd.f32 %v840_v45, %v838_v44 }
 0x140   :  { %v842_v48 = vadd.f32 %v841_v47, %v839_v46 }
 0x142   :  { %v843_v49 = vrot.slane %v842_v48, 4 }
 0x144   :  { %v844_v50 = vadd.f32 %v843_v49, %v842_v48 }
 0x146   :  { %v845_v51 = vrot.slane %v844_v50, 2 }
 0x148   :  { %v846_v52 = vadd.f32 %v845_v51, %v844_v50 }
 0x14a   :  { %v847_v53 = vrot.slane %v846_v52, 1 }
 0x14c   :  { %v848_v54 = vadd.f32 %v847_v53, %v846_v52 }
 0x14e   :  { %v849_v55 = vmul.f32 0.03125, %v848_v54 }
 0x150   :  { %v851_v56 = vadd.f32 1e-05, %v849_v55 }
 0x152   :  { %1179 = vrsqrt.f32 %v851_v56 }
 0x15c   :  { %v1180_v61 = vpop.eup %1179 }
 0x15d   :  { %v853_v62 = vmul.f32 %v1180_v61, %v850_v59 }
 0x15f   :  { %v858_v63 = vrot.slane %v853_v62, %v857_v60 }
 0x161   :  { %v860_v1 = vmul.f32 %v858_v63, %v832_v38  ;;  %v861_v2 = vmul.f32 %v858_v63, %v833_v39  ;;  %v862_v3 = vmul.f32 %v858_v63, %v834_v40  ;;  %v863_v4 = vmul.f32 %v858_v63, %v835_v41 }
 0x163   :  { %v871_v5 = vadd.f32 %v983_v0, %v860_v1  ;;  %v872_v6 = vadd.f32 %v983_v0, %v861_v2  ;;  %v873_v7 = vadd.f32 %v983_v0, %v862_v3  ;;  %v874_v8 = vadd.f32 %v983_v0, %v863_v4 }
 0x165   :  { %v875_v9 = vmax.f32 %v871_v5, 0.0  ;;  %v876_v10 = vmax.f32 %v872_v6, 0.0  ;;  %v877_v11 = vmax.f32 %v873_v7, 0.0  ;;  %v878_v12 = vmax.f32 %v874_v8, 0.0 }
 0x167   :  { %v995_v13 = vpack.c.bf16 %v876_v10, %v875_v9  ;;  %v1000_v14 = vpack.c.bf16 %v878_v12, %v877_v11 }
 0x169   :  { %996 = vst [vmem:[%s1462_s4] sm:$0xff] %v995_v13   ;;  %1002 = vst [vmem:[%s1462_s4 + $0x8] sm:$0xff] %v1000_v14  }

// kernel: patch_discriminator_t2s.9
= control target key start
LH: loop header
LB: loop body
LE: loop exit
PB: predicated region body
PF: predicated region fallthrough
CT: control target
= control target key end

     0   :  { %vm3006_vm0 = vmmov 0   ;;  %s3672_s1 = inlined_call_operand.vmem [shape: bf16[3200,128], index: 1, kind: input, shape index: {}]   ;;  %s3673_s0 = inlined_call_operand.vmem [shape: bf16[8,3200], index: 0, kind: input, shape index: {}]   ;;  %s3674_s2 = inlined_call_operand.vmem [shape: f32[1,128], index: 2, kind: input, shape index: {}]   ;;  %s3675_s3 = inlined_call_operand.vmem [shape: f32[8,128], index: 3, kind: output, shape index: {}]  }
   0x1   :  { %v2776_v0 = vld [vmem:[%s3672_s1 + $0x40] sm:$0xff]   ;;  %v2780_v4 = vld [vmem:[%s3672_s1 + $0x48] sm:$0xff]   ;;  %v2784_v8 = vld [vmem:[%s3672_s1 + $0x50] sm:$0xff]  }
   0x2   :  { %v2777_v1 = vld [vmem:[%s3672_s1] sm:$0xff]   ;;  %2481 = vmatprep.subr.bf16.mxu0 %v2776_v0  ;;  %v2781_v5 = vld [vmem:[%s3672_s1 + $0x8] sm:$0xff]   ;;  %v2785_v9 = vld [vmem:[%s3672_s1 + $0x10] sm:$0xff]  }
   0x3   :  { %v2778_v2 = vld [vmem:[%s3672_s1 + $0xc0] sm:$0xff]   ;;  %2482 = vmatpush3.bf16.msra.mxu0 %v2777_v1  ;;  %v2782_v6 = vld [vmem:[%s3672_s1 + $0xc8] sm:$0xff]   ;;  %v2786_v10 = vld [vmem:[%s3672_s1 + $0xd0] sm:$0xff]  }
   0x4   :  { %v2779_v3 = vld [vmem:[%s3672_s1 + $0x80] sm:$0xff]   ;;  %2503 = vmatprep.subr.bf16.mxu1 %v2778_v2  ;;  %2483 = vmatprep.subr.bf16.mxu0 %v2780_v4  ;;  %v2783_v7 = vld [vmem:[%s3672_s1 + $0x88] sm:$0xff]   ;;  %v2787_v11 = vld [vmem:[%s3672_s1 + $0x90] sm:$0xff]  }
   0x5   :  { %2504 = vmatpush3.bf16.msra.mxu1 %v2779_v3  ;;  %v2788_v12 = vld [vmem:[%s3672_s1 + $0x58] sm:$0xff]   ;;  %v2792_v16 = vld [vmem:[%s3672_s1 + $0x60] sm:$0xff]   ;;  %v2796_v20 = vld [vmem:[%s3672_s1 + $0x68] sm:$0xff]  }
   0x6   :  { %2505 = vmatprep.subr.bf16.mxu1 %v2782_v6  ;;  %v2789_v13 = vld [vmem:[%s3672_s1 + $0x18] sm:$0xff]   ;;  %v2793_v17 = vld [vmem:[%s3672_s1 + $0x20] sm:$0xff]   ;;  %v2797_v21 = vld [vmem:[%s3672_s1 + $0x28] sm:$0xff]  }
   0x7   :  { %2484 = vmatpush3.bf16.msra.mxu0 %v2781_v5  ;;  %v2790_v14 = vld [vmem:[%s3672_s1 + $0xd8] sm:$0xff]   ;;  %v2794_v18 = vld [vmem:[%s3672_s1 + $0xe0] sm:$0xff]   ;;  %v2798_v22 = vld [vmem:[%s3672_s1 + $0xe8] sm:$0xff]  }
   0x8   :  { %2485 = vmatprep.subr.bf16.mxu0 %v2784_v8  ;;  %v2791_v15 = vld [vmem:[%s3672_s1 + $0x98] sm:$0xff]   ;;  %v2795_v19 = vld [vmem:[%s3672_s1 + $0xa0] sm:$0xff]   ;;  %v2799_v23 = vld [vmem:[%s3672_s1 + $0xa8] sm:$0xff]  }
   0x9   :  { %2506 = vmatpush3.bf16.msra.mxu1 %v2783_v7  ;;  %v2800_v24 = vld [vmem:[%s3672_s1 + $0x70] sm:$0xff]   ;;  %v2804_v28 = vld [vmem:[%s3672_s1 + $0x78] sm:$0xff]   ;;  %v15_v31 = vld [vmem:[%s3673_s0] sm:$0xff] }
   0xa   :  { %2507 = vmatprep.subr.bf16.mxu1 %v2786_v10  ;;  %v2801_v25 = vld [vmem:[%s3672_s1 + $0x30] sm:$0xff]   ;;  %v2805_v29 = vld [vmem:[%s3672_s1 + $0x38] sm:$0xff]   ;;  %v2255_v32 = vcombine.low %v15_v31, %v15_v31  ;;  %v2256_v33 = vcombine.high %v15_v31, %v15_v31  ;;  %v2810_v35 = vld [vmem:[%s3672_s1 + $0x140] sm:$0xff]  }
   0xb   :  { %2486 = vmatpush3.bf16.msra.mxu0 %v2785_v9  ;;  %v2802_v26 = vld [vmem:[%s3672_s1 + $0xf0] sm:$0xff]   ;;  %v2806_v30 = vld [vmem:[%s3672_s1 + $0xf8] sm:$0xff]   ;;  %v16_v36 = vld [vmem:[%s3673_s0 + $0x8] sm:$0xff] }
   0xc   :  { %2487 = vmatprep.subr.bf16.mxu0 %v2788_v12  ;;  %v2803_v27 = vld [vmem:[%s3672_s1 + $0xb0] sm:$0xff]   ;;  %v2809_v34 = vld [vmem:[%s3672_s1 + $0xb8] sm:$0xff]   ;;  %1755 = vmatprep.mubr.bf16.mxu0 %v2256_v33  ;;  %v2257_v37 = vcombine.low %v16_v36, %v16_v36  ;;  %v2258_v38 = vcombine.high %v16_v36, %v16_v36  ;;  %v2813_v39 = vld [vmem:[%s3672_s1 + $0x100] sm:$0xff]  }
   0xd   :  { %2508 = vmatpush3.bf16.msra.mxu1 %v2787_v11  ;;  %v2814_v40 = vld [vmem:[%s3672_s1 + $0x1c0] sm:$0xff]   ;;  %v2816_v42 = vld [vmem:[%s3672_s1 + $0x148] sm:$0xff]   ;;  %v2820_v46 = vld [vmem:[%s3672_s1 + $0x150] sm:$0xff]  }
   0xe   :  { %2509 = vmatprep.subr.bf16.mxu1 %v2790_v14  ;;  %1795 = vmatprep.mubr.bf16.mxu1 %v2258_v38  ;;  %v2815_v41 = vld [vmem:[%s3672_s1 + $0x180] sm:$0xff]   ;;  %v2817_v43 = vld [vmem:[%s3672_s1 + $0x108] sm:$0xff]   ;;  %v2821_v47 = vld [vmem:[%s3672_s1 + $0x110] sm:$0xff]  }
   0xf   :  { %2488 = vmatpush3.bf16.msra.mxu0 %v2789_v13  ;;  %v2818_v44 = vld [vmem:[%s3672_s1 + $0x1c8] sm:$0xff]   ;;  %v2822_v48 = vld [vmem:[%s3672_s1 + $0x1d0] sm:$0xff]   ;;  %v2824_v50 = vld [vmem:[%s3672_s1 + $0x158] sm:$0xff]  }
  0x10   :  { %2489 = vmatprep.subr.bf16.mxu0 %v2792_v16  ;;  %v2819_v45 = vld [vmem:[%s3672_s1 + $0x188] sm:$0xff]   ;;  %v2823_v49 = vld [vmem:[%s3672_s1 + $0x190] sm:$0xff]   ;;  %v2825_v51 = vld [vmem:[%s3672_s1 + $0x118] sm:$0xff]  }
  0x11   :  { %2510 = vmatpush3.bf16.msra.mxu1 %v2791_v15  ;;  %v2826_v52 = vld [vmem:[%s3672_s1 + $0x1d8] sm:$0xff]   ;;  %v2828_v54 = vld [vmem:[%s3672_s1 + $0x160] sm:$0xff]   ;;  %v2832_v58 = vld [vmem:[%s3672_s1 + $0x168] sm:$0xff]  }
  0x12   :  { %2511 = vmatprep.subr.bf16.mxu1 %v2794_v18  ;;  %v2827_v53 = vld [vmem:[%s3672_s1 + $0x198] sm:$0xff]   ;;  %v2829_v55 = vld [vmem:[%s3672_s1 + $0x120] sm:$0xff]   ;;  %v2833_v59 = vld [vmem:[%s3672_s1 + $0x128] sm:$0xff]  }
  0x13   :  { %2490 = vmatpush3.bf16.msra.mxu0 %v2793_v17  ;;  %v2830_v56 = vld [vmem:[%s3672_s1 + $0x1e0] sm:$0xff]   ;;  %v2834_v60 = vld [vmem:[%s3672_s1 + $0x1e8] sm:$0xff]   ;;  %v2836_v62 = vld [vmem:[%s3672_s1 + $0x170] sm:$0xff]  }
  0x14   :  { %2491 = vmatprep.subr.bf16.mxu0 %v2796_v20  ;;  %v2831_v57 = vld [vmem:[%s3672_s1 + $0x1a0] sm:$0xff]   ;;  %v2835_v61 = vld [vmem:[%s3672_s1 + $0x1a8] sm:$0xff]   ;;  %v2837_v63 = vld [vmem:[%s3672_s1 + $0x130] sm:$0xff]  }
  0x15   :  { %2512 = vmatpush3.bf16.msra.mxu1 %v2795_v19  ;;  %v2838_v0 = vld [vmem:[%s3672_s1 + $0x1f0] sm:$0xff]   ;;  %v2840_v2 = vld [vmem:[%s3672_s1 + $0x178] sm:$0xff]   ;;  %v2846_v9 = vld [vmem:[%s3672_s1 + $0x240] sm:$0xff]  }
  0x16   :  { %2513 = vmatprep.subr.bf16.mxu1 %v2798_v22  ;;  %v2839_v1 = vld [vmem:[%s3672_s1 + $0x1b0] sm:$0xff]   ;;  %v2841_v3 = vld [vmem:[%s3672_s1 + $0x138] sm:$0xff]   ;;  %v2849_v13 = vld [vmem:[%s3672_s1 + $0x200] sm:$0xff]  }
  0x17   :  { %2492 = vmatpush3.bf16.msra.mxu0 %v2797_v21  ;;  %v2842_v4 = vld [vmem:[%s3672_s1 + $0x1f8] sm:$0xff]   ;;  %v17_v5 = vld [vmem:[%s3673_s0 + $0x10] sm:$0xff]  ;;  %v2850_v14 = vld [vmem:[%s3672_s1 + $0x2c0] sm:$0xff]  }
  0x18   :  { %2493 = vmatprep.subr.bf16.mxu0 %v2800_v24  ;;  %v2259_v6 = vcombine.low %v17_v5, %v17_v5  ;;  %v2260_v7 = vcombine.high %v17_v5, %v17_v5  ;;  %v2845_v8 = vld [vmem:[%s3672_s1 + $0x1b8] sm:$0xff]   ;;  %v2851_v15 = vld [vmem:[%s3672_s1 + $0x280] sm:$0xff]   ;;  %v2852_v16 = vld [vmem:[%s3672_s1 + $0x248] sm:$0xff]  }
  0x19   :  { %2514 = vmatpush3.bf16.msra.mxu1 %v2799_v23  ;;  %v18_v10 = vld [vmem:[%s3673_s0 + $0x18] sm:$0xff]  ;;  %v2853_v17 = vld [vmem:[%s3672_s1 + $0x208] sm:$0xff]   ;;  %v2856_v20 = vld [vmem:[%s3672_s1 + $0x250] sm:$0xff]  }
  0x1a   :  { %2515 = vmatprep.subr.bf16.mxu1 %v2802_v26  ;;  %v2261_v11 = vcombine.low %v18_v10, %v18_v10  ;;  %v2262_v12 = vcombine.high %v18_v10, %v18_v10  ;;  %v2854_v18 = vld [vmem:[%s3672_s1 + $0x2c8] sm:$0xff]   ;;  %v2857_v21 = vld [vmem:[%s3672_s1 + $0x210] sm:$0xff]   ;;  %v2860_v24 = vld [vmem:[%s3672_s1 + $0x258] sm:$0xff]  }
  0x1b   :  { %2494 = vmatpush3.bf16.msra.mxu0 %v2801_v25  ;;  %v2855_v19 = vld [vmem:[%s3672_s1 + $0x288] sm:$0xff]   ;;  %v2858_v22 = vld [vmem:[%s3672_s1 + $0x2d0] sm:$0xff]   ;;  %v2861_v25 = vld [vmem:[%s3672_s1 + $0x218] sm:$0xff]  }
  0x1c   :  { %2495 = vmatprep.subr.bf16.mxu0 %v2804_v28  ;;  %v2859_v23 = vld [vmem:[%s3672_s1 + $0x290] sm:$0xff]   ;;  %v2862_v26 = vld [vmem:[%s3672_s1 + $0x2d8] sm:$0xff]   ;;  %v2864_v28 = vld [vmem:[%s3672_s1 + $0x260] sm:$0xff]  }
  0x1d   :  { %2516 = vmatpush3.bf16.msra.mxu1 %v2803_v27  ;;  %v2863_v27 = vld [vmem:[%s3672_s1 + $0x298] sm:$0xff]   ;;  %v2867_v31 = vld [vmem:[%s3672_s1 + $0x2a0] sm:$0xff]   ;;  %v2869_v33 = vld [vmem:[%s3672_s1 + $0x228] sm:$0xff]  }
  0x1e   :  { %2517 = vmatprep.subr.bf16.mxu1 %v2806_v30  ;;  %v2866_v30 = vld [vmem:[%s3672_s1 + $0x2e0] sm:$0xff]   ;;  %v2872_v36 = vld [vmem:[%s3672_s1 + $0x270] sm:$0xff]  }
  0x1f   :  { %2496 = vmatpush3.bf16.msra.mxu0 %v2805_v29  ;;  %v2865_v29 = vld [vmem:[%s3672_s1 + $0x220] sm:$0xff]   ;;  %v2874_v38 = vld [vmem:[%s3672_s1 + $0x2f0] sm:$0xff]  }
  0x20   :  { %2525 = vmatprep.subr.bf16.mxu0 %v2810_v35  ;;  %v2871_v35 = vld [vmem:[%s3672_s1 + $0x2a8] sm:$0xff]   ;;  %v2903_v5 = vld [vmem:[%s3672_s1 + $0x3a0] sm:$0xff]   ;;  %v2908_v10 = vld [vmem:[%s3672_s1 + $0x370] sm:$0xff]  }
  0x21   :  { %2518 = vmatpush3.bf16.msra.mxu1 %v2809_v34  ;;  %v2870_v34 = vld [vmem:[%s3672_s1 + $0x2e8] sm:$0xff]  }
  0x22   :  { %1756 = vmatmul.mubr.bf16.vlgmr.msra.gmra.mrb[0].mxu0 %v2255_v32  ;;  %2547 = vmatprep.subr.bf16.mxu1 %v2814_v40  ;;  %v2868_v32 = vld [vmem:[%s3672_s1 + $0x268] sm:$0xff]   ;;  %v2876_v40 = vld [vmem:[%s3672_s1 + $0x278] sm:$0xff]  }
  0x23   :  { %2526 = vmatpush3.bf16.msra.mxu0 %v2813_v39  ;;  %1835 = vmatprep.mubr.bf16.mxu0 %v2260_v7  ;;  %v2875_v39 = vld [vmem:[%s3672_s1 + $0x2b0] sm:$0xff]   ;;  %v2905_v7 = vld [vmem:[%s3672_s1 + $0x328] sm:$0xff]  }
  0x24   :  { %1796 = vmatmul.mubr.bf16.vlgmr.msra.gmra.mrb[0].mxu1 %v2257_v37  ;;  %2527 = vmatprep.subr.bf16.mxu0 %v2816_v42  ;;  %v2873_v37 = vld [vmem:[%s3672_s1 + $0x230] sm:$0xff]   ;;  %v2878_v42 = vld [vmem:[%s3672_s1 + $0x2f8] sm:$0xff]  }
  0x25   :  { %2548 = vmatpush3.bf16.msra.mxu1 %v2815_v41  ;;  %1875 = vmatprep.mubr.bf16.mxu1 %v2262_v12  ;;  %v2877_v41 = vld [vmem:[%s3672_s1 + $0x238] sm:$0xff]   ;;  %v2910_v12 = vld [vmem:[%s3672_s1 + $0x3f0] sm:$0xff]  }
  0x26   :  { %2549 = vmatprep.subr.bf16.mxu1 %v2818_v44 }
  0x27   :  { %2528 = vmatpush3.bf16.msra.mxu0 %v2817_v43  ;;  %v19_v43 = vld [vmem:[%s3673_s0 + $0x20] sm:$0xff] }
  0x28   :  { %2529 = vmatprep.subr.bf16.mxu0 %v2820_v46  ;;  %v2263_v44 = vcombine.low %v19_v43, %v19_v43  ;;  %v2881_v46 = vld [vmem:[%s3672_s1 + $0x2b8] sm:$0xff]  }
  0x29   :  { %2550 = vmatpush3.bf16.msra.mxu1 %v2819_v45  ;;  %v2264_v45 = vcombine.high %v19_v43, %v19_v43  ;;  %v2939_v43 = vld [vmem:[%s3672_s1 + $0x4a0] sm:$0xff]  }
  0x2a   :  { %2551 = vmatprep.subr.bf16.mxu1 %v2822_v48  ;;  %v20_v48 = vld [vmem:[%s3673_s0 + $0x28] sm:$0xff] }
  0x2b   :  { %2530 = vmatpush3.bf16.msra.mxu0 %v2821_v47  ;;  %v2882_v47 = vld [vmem:[%s3672_s1 + $0x340] sm:$0xff]  }
  0x2c   :  { %2531 = vmatprep.subr.bf16.mxu0 %v2824_v50  ;;  %v2266_v50 = vcombine.high %v20_v48, %v20_v48 }
  0x2d   :  { %2552 = vmatpush3.bf16.msra.mxu1 %v2823_v49  ;;  %v2265_v49 = vcombine.low %v20_v48, %v20_v48  ;;  %v2944_v48 = vld [vmem:[%s3672_s1 + $0x470] sm:$0xff]  }
  0x2e   :  { %2553 = vmatprep.subr.bf16.mxu1 %v2826_v52  ;;  %v2886_v52 = vld [vmem:[%s3672_s1 + $0x3c0] sm:$0xff]  }
  0x2f   :  { %2532 = vmatpush3.bf16.msra.mxu0 %v2825_v51  ;;  %v2885_v51 = vld [vmem:[%s3672_s1 + $0x300] sm:$0xff]  }
  0x30   :  { %2533 = vmatprep.subr.bf16.mxu0 %v2828_v54  ;;  %v2888_v54 = vld [vmem:[%s3672_s1 + $0x348] sm:$0xff]  }
  0x31   :  { %2554 = vmatpush3.bf16.msra.mxu1 %v2827_v53  ;;  %v2887_v53 = vld [vmem:[%s3672_s1 + $0x380] sm:$0xff]  }
  0x32   :  { %2555 = vmatprep.subr.bf16.mxu1 %v2830_v56  ;;  %v2890_v56 = vld [vmem:[%s3672_s1 + $0x3c8] sm:$0xff]  }
  0x33   :  { %2534 = vmatpush3.bf16.msra.mxu0 %v2829_v55  ;;  %v2889_v55 = vld [vmem:[%s3672_s1 + $0x308] sm:$0xff]  }
  0x34   :  { %2535 = vmatprep.subr.bf16.mxu0 %v2832_v58  ;;  %v2892_v58 = vld [vmem:[%s3672_s1 + $0x350] sm:$0xff]  }
  0x35   :  { %2556 = vmatpush3.bf16.msra.mxu1 %v2831_v57  ;;  %v2891_v57 = vld [vmem:[%s3672_s1 + $0x388] sm:$0xff]  }
  0x36   :  { %2557 = vmatprep.subr.bf16.mxu1 %v2834_v60  ;;  %v2894_v60 = vld [vmem:[%s3672_s1 + $0x3d0] sm:$0xff]  }
  0x37   :  { %2536 = vmatpush3.bf16.msra.mxu0 %v2833_v59  ;;  %v2893_v59 = vld [vmem:[%s3672_s1 + $0x310] sm:$0xff]  }
  0x38   :  { %2537 = vmatprep.subr.bf16.mxu0 %v2836_v62  ;;  %v2896_v62 = vld [vmem:[%s3672_s1 + $0x358] sm:$0xff]  }
  0x39   :  { %2558 = vmatpush3.bf16.msra.mxu1 %v2835_v61  ;;  %v2895_v61 = vld [vmem:[%s3672_s1 + $0x390] sm:$0xff]  }
  0x3a   :  { %2559 = vmatprep.subr.bf16.mxu1 %v2838_v0  ;;  %v2898_v0 = vld [vmem:[%s3672_s1 + $0x3d8] sm:$0xff]  }
  0x3b   :  { %2538 = vmatpush3.bf16.msra.mxu0 %v2837_v63  ;;  %v2897_v63 = vld [vmem:[%s3672_s1 + $0x318] sm:$0xff]  }
  0x3c   :  { %2539 = vmatprep.subr.bf16.mxu0 %v2840_v2  ;;  %v2900_v2 = vld [vmem:[%s3672_s1 + $0x360] sm:$0xff]  }
  0x3d   :  { %2560 = vmatpush3.bf16.msra.mxu1 %v2839_v1  ;;  %v2899_v1 = vld [vmem:[%s3672_s1 + $0x398] sm:$0xff]  }
  0x3e   :  { %2561 = vmatprep.subr.bf16.mxu1 %v2842_v4  ;;  %v2902_v4 = vld [vmem:[%s3672_s1 + $0x3e0] sm:$0xff]  }
  0x3f   :  { %2540 = vmatpush3.bf16.msra.mxu0 %v2841_v3  ;;  %v2901_v3 = vld [vmem:[%s3672_s1 + $0x320] sm:$0xff]  }
  0x40   :  { %2569 = vmatprep.subr.bf16.mxu0 %v2846_v9  ;;  %v2907_v9 = vld [vmem:[%s3672_s1 + $0x3a8] sm:$0xff]  }
  0x41   :  { %2562 = vmatpush3.bf16.msra.mxu1 %v2845_v8  ;;  %v2906_v8 = vld [vmem:[%s3672_s1 + $0x3e8] sm:$0xff]  }
  0x42   :  { %1836 = vmatmul.mubr.bf16.vlgmr.msra.gmra.mrb[4].mxu0 %v2259_v6  ;;  %2591 = vmatprep.subr.bf16.mxu1 %v2850_v14  ;;  %v2904_v6 = vld [vmem:[%s3672_s1 + $0x368] sm:$0xff]   ;;  %v2912_v14 = vld [vmem:[%s3672_s1 + $0x378] sm:$0xff]  }
  0x43   :  { %2570 = vmatpush3.bf16.msra.mxu0 %v2849_v13  ;;  %1915 = vmatprep.mubr.bf16.mxu0 %v2264_v45  ;;  %v2911_v13 = vld [vmem:[%s3672_s1 + $0x3b0] sm:$0xff]   ;;  %v2941_v45 = vld [vmem:[%s3672_s1 + $0x428] sm:$0xff]  }
  0x44   :  { %1876 = vmatmul.mubr.bf16.vlgmr.msra.gmra.mrb[4].mxu1 %v2261_v11  ;;  %2571 = vmatprep.subr.bf16.mxu0 %v2852_v16  ;;  %v2909_v11 = vld [vmem:[%s3672_s1 + $0x330] sm:$0xff]   ;;  %v2914_v16 = vld [vmem:[%s3672_s1 + $0x3f8] sm:$0xff]  }
  0x45   :  { %2592 = vmatpush3.bf16.msra.mxu1 %v2851_v15  ;;  %1955 = vmatprep.mubr.bf16.mxu1 %v2266_v50  ;;  %v2913_v15 = vld [vmem:[%s3672_s1 + $0x338] sm:$0xff]   ;;  %v2946_v50 = vld [vmem:[%s3672_s1 + $0x4f0] sm:$0xff]  }
  0x46   :  { %2593 = vmatprep.subr.bf16.mxu1 %v2854_v18 }
  0x47   :  { %2572 = vmatpush3.bf16.msra.mxu0 %v2853_v17  ;;  %v21_v17 = vld [vmem:[%s3673_s0 + $0x30] sm:$0xff] }
  0x48   :  { %2573 = vmatprep.subr.bf16.mxu0 %v2856_v20  ;;  %v2267_v18 = vcombine.low %v21_v17, %v21_v17  ;;  %v2917_v20 = vld [vmem:[%s3672_s1 + $0x3b8] sm:$0xff]  }
  0x49   :  { %2594 = vmatpush3.bf16.msra.mxu1 %v2855_v19  ;;  %v2268_v19 = vcombine.high %v21_v17, %v21_v17  ;;  %v2975_v17 = vld [vmem:[%s3672_s1 + $0x5a0] sm:$0xff]  }
  0x4a   :  { %2595 = vmatprep.subr.bf16.mxu1 %v2858_v22  ;;  %v22_v22 = vld [vmem:[%s3673_s0 + $0x38] sm:$0xff] }
  0x4b   :  { %2574 = vmatpush3.bf16.msra.mxu0 %v2857_v21  ;;  %v2918_v21 = vld [vmem:[%s3672_s1 + $0x440] sm:$0xff]  }
  0x4c   :  { %2575 = vmatprep.subr.bf16.mxu0 %v2860_v24  ;;  %v2270_v24 = vcombine.high %v22_v22, %v22_v22 }
  0x4d   :  { %2596 = vmatpush3.bf16.msra.mxu1 %v2859_v23  ;;  %v2269_v23 = vcombine.low %v22_v22, %v22_v22  ;;  %v2980_v22 = vld [vmem:[%s3672_s1 + $0x570] sm:$0xff]  }
  0x4e   :  { %2597 = vmatprep.subr.bf16.mxu1 %v2862_v26  ;;  %v2922_v26 = vld [vmem:[%s3672_s1 + $0x4c0] sm:$0xff]  }
  0x4f   :  { %2576 = vmatpush3.bf16.msra.mxu0 %v2861_v25  ;;  %v2921_v25 = vld [vmem:[%s3672_s1 + $0x400] sm:$0xff]  }
  0x50   :  { %2577 = vmatprep.subr.bf16.mxu0 %v2864_v28  ;;  %v2924_v28 = vld [vmem:[%s3672_s1 + $0x448] sm:$0xff]  }
  0x51   :  { %2598 = vmatpush3.bf16.msra.mxu1 %v2863_v27  ;;  %v2923_v27 = vld [vmem:[%s3672_s1 + $0x480] sm:$0xff]  }
  0x52   :  { %2599 = vmatprep.subr.bf16.mxu1 %v2866_v30  ;;  %v2926_v30 = vld [vmem:[%s3672_s1 + $0x4c8] sm:$0xff]  }
  0x53   :  { %2578 = vmatpush3.bf16.msra.mxu0 %v2865_v29  ;;  %v2925_v29 = vld [vmem:[%s3672_s1 + $0x408] sm:$0xff]  }
  0x54   :  { %2579 = vmatprep.subr.bf16.mxu0 %v2868_v32  ;;  %v2928_v32 = vld [vmem:[%s3672_s1 + $0x450] sm:$0xff]  }
  0x55   :  { %2600 = vmatpush3.bf16.msra.mxu1 %v2867_v31  ;;  %v2927_v31 = vld [vmem:[%s3672_s1 + $0x488] sm:$0xff]  }
  0x56   :  { %2601 = vmatprep.subr.bf16.mxu1 %v2870_v34  ;;  %v2930_v34 = vld [vmem:[%s3672_s1 + $0x4d0] sm:$0xff]  }
  0x57   :  { %2580 = vmatpush3.bf16.msra.mxu0 %v2869_v33  ;;  %v2929_v33 = vld [vmem:[%s3672_s1 + $0x410] sm:$0xff]  }
  0x58   :  { %2581 = vmatprep.subr.bf16.mxu0 %v2872_v36  ;;  %v2932_v36 = vld [vmem:[%s3672_s1 + $0x458] sm:$0xff]  }
  0x59   :  { %2602 = vmatpush3.bf16.msra.mxu1 %v2871_v35  ;;  %v2931_v35 = vld [vmem:[%s3672_s1 + $0x490] sm:$0xff]  }
  0x5a   :  { %2603 = vmatprep.subr.bf16.mxu1 %v2874_v38  ;;  %v2934_v38 = vld [vmem:[%s3672_s1 + $0x4d8] sm:$0xff]  }
  0x5b   :  { %2582 = vmatpush3.bf16.msra.mxu0 %v2873_v37  ;;  %v2933_v37 = vld [vmem:[%s3672_s1 + $0x418] sm:$0xff]  }
  0x5c   :  { %2583 = vmatprep.subr.bf16.mxu0 %v2876_v40  ;;  %v2936_v40 = vld [vmem:[%s3672_s1 + $0x460] sm:$0xff]  }
  0x5d   :  { %2604 = vmatpush3.bf16.msra.mxu1 %v2875_v39  ;;  %v2935_v39 = vld [vmem:[%s3672_s1 + $0x498] sm:$0xff]  }
  0x5e   :  { %2605 = vmatprep.subr.bf16.mxu1 %v2878_v42  ;;  %v2938_v42 = vld [vmem:[%s3672_s1 + $0x4e0] sm:$0xff]  }
  0x5f   :  { %2584 = vmatpush3.bf16.msra.mxu0 %v2877_v41  ;;  %v2937_v41 = vld [vmem:[%s3672_s1 + $0x420] sm:$0xff]  }
  0x60   :  { %2613 = vmatprep.subr.bf16.mxu0 %v2882_v47  ;;  %v2943_v47 = vld [vmem:[%s3672_s1 + $0x4a8] sm:$0xff]  }
  0x61   :  { %2606 = vmatpush3.bf16.msra.mxu1 %v2881_v46  ;;  %v2942_v46 = vld [vmem:[%s3672_s1 + $0x4e8] sm:$0xff]  }
  0x62   :  { %1916 = vmatmul.mubr.bf16.vlgmr.msra.gmra.mrb[8].mxu0 %v2263_v44  ;;  %2635 = vmatprep.subr.bf16.mxu1 %v2886_v52  ;;  %v2940_v44 = vld [vmem:[%s3672_s1 + $0x468] sm:$0xff]   ;;  %v2948_v52 = vld [vmem:[%s3672_s1 + $0x478] sm:$0xff]  }
  0x63   :  { %2614 = vmatpush3.bf16.msra.mxu0 %v2885_v51  ;;  %1995 = vmatprep.mubr.bf16.mxu0 %v2268_v19  ;;  %v2947_v51 = vld [vmem:[%s3672_s1 + $0x4b0] sm:$0xff]   ;;  %v2977_v19 = vld [vmem:[%s3672_s1 + $0x528] sm:$0xff]  }
  0x64   :  { %1956 = vmatmul.mubr.bf16.vlgmr.msra.gmra.mrb[8].mxu1 %v2265_v49  ;;  %2615 = vmatprep.subr.bf16.mxu0 %v2888_v54  ;;  %v2945_v49 = vld [vmem:[%s3672_s1 + $0x430] sm:$0xff]   ;;  %v2950_v54 = vld [vmem:[%s3672_s1 + $0x4f8] sm:$0xff]  }
  0x65   :  { %2636 = vmatpush3.bf16.msra.mxu1 %v2887_v53  ;;  %2035 = vmatprep.mubr.bf16.mxu1 %v2270_v24  ;;  %v2949_v53 = vld [vmem:[%s3672_s1 + $0x438] sm:$0xff]   ;;  %v2982_v24 = vld [vmem:[%s3672_s1 + $0x5f0] sm:$0xff]  }
  0x66   :  { %2637 = vmatprep.subr.bf16.mxu1 %v2890_v56 }
  0x67   :  { %2616 = vmatpush3.bf16.msra.mxu0 %v2889_v55  ;;  %v23_v55 = vld [vmem:[%s3673_s0 + $0x40] sm:$0xff] }
  0x68   :  { %2617 = vmatprep.subr.bf16.mxu0 %v2892_v58  ;;  %v2271_v56 = vcombine.low %v23_v55, %v23_v55  ;;  %v2953_v58 = vld [vmem:[%s3672_s1 + $0x4b8] sm:$0xff]  }
  0x69   :  { %2638 = vmatpush3.bf16.msra.mxu1 %v2891_v57  ;;  %v2272_v57 = vcombine.high %v23_v55, %v23_v55 }
  0x6a   :  { %2639 = vmatprep.subr.bf16.mxu1 %v2894_v60  ;;  %v24_v60 = vld [vmem:[%s3673_s0 + $0x48] sm:$0xff] }
  0x6b   :  { %2618 = vmatpush3.bf16.msra.mxu0 %v2893_v59  ;;  %v2954_v59 = vld [vmem:[%s3672_s1 + $0x540] sm:$0xff]  }
  0x6c   :  { %2619 = vmatprep.subr.bf16.mxu0 %v2896_v62  ;;  %v2274_v62 = vcombine.high %v24_v60, %v24_v60 }
  0x6d   :  { %2640 = vmatpush3.bf16.msra.mxu1 %v2895_v61  ;;  %v2273_v61 = vcombine.low %v24_v60, %v24_v60 }
  0x6e   :  { %2641 = vmatprep.subr.bf16.mxu1 %v2898_v0  ;;  %v2958_v0 = vld [vmem:[%s3672_s1 + $0x5c0] sm:$0xff]  }
  0x6f   :  { %2620 = vmatpush3.bf16.msra.mxu0 %v2897_v63  ;;  %v2957_v63 = vld [vmem:[%s3672_s1 + $0x500] sm:$0xff]  }
  0x70   :  { %2621 = vmatprep.subr.bf16.mxu0 %v2900_v2  ;;  %v2960_v2 = vld [vmem:[%s3672_s1 + $0x548] sm:$0xff]  }
  0x71   :  { %2642 = vmatpush3.bf16.msra.mxu1 %v2899_v1  ;;  %v2959_v1 = vld [vmem:[%s3672_s1 + $0x580] sm:$0xff]  }
  0x72   :  { %2643 = vmatprep.subr.bf16.mxu1 %v2902_v4  ;;  %v2962_v4 = vld [vmem:[%s3672_s1 + $0x5c8] sm:$0xff]  }
  0x73   :  { %2622 = vmatpush3.bf16.msra.mxu0 %v2901_v3  ;;  %v2961_v3 = vld [vmem:[%s3672_s1 + $0x508] sm:$0xff]  }
  0x74   :  { %2623 = vmatprep.subr.bf16.mxu0 %v2904_v6  ;;  %v2964_v6 = vld [vmem:[%s3672_s1 + $0x550] sm:$0xff]  }
  0x75   :  { %2644 = vmatpush3.bf16.msra.mxu1 %v2903_v5  ;;  %v2963_v5 = vld [vmem:[%s3672_s1 + $0x588] sm:$0xff]  }
  0x76   :  { %2645 = vmatprep.subr.bf16.mxu1 %v2906_v8  ;;  %v2966_v8 = vld [vmem:[%s3672_s1 + $0x5d0] sm:$0xff]  }
  0x77   :  { %2624 = vmatpush3.bf16.msra.mxu0 %v2905_v7  ;;  %v2965_v7 = vld [vmem:[%s3672_s1 + $0x510] sm:$0xff]  }
  0x78   :  { %2625 = vmatprep.subr.bf16.mxu0 %v2908_v10  ;;  %v2968_v10 = vld [vmem:[%s3672_s1 + $0x558] sm:$0xff]  }
  0x79   :  { %2646 = vmatpush3.bf16.msra.mxu1 %v2907_v9  ;;  %v2967_v9 = vld [vmem:[%s3672_s1 + $0x590] sm:$0xff]  }
  0x7a   :  { %2647 = vmatprep.subr.bf16.mxu1 %v2910_v12  ;;  %v2970_v12 = vld [vmem:[%s3672_s1 + $0x5d8] sm:$0xff]  }
  0x7b   :  { %2626 = vmatpush3.bf16.msra.mxu0 %v2909_v11  ;;  %v2969_v11 = vld [vmem:[%s3672_s1 + $0x518] sm:$0xff]  }
  0x7c   :  { %2627 = vmatprep.subr.bf16.mxu0 %v2912_v14  ;;  %v2972_v14 = vld [vmem:[%s3672_s1 + $0x560] sm:$0xff]  }
  0x7d   :  { %2648 = vmatpush3.bf16.msra.mxu1 %v2911_v13  ;;  %v2971_v13 = vld [vmem:[%s3672_s1 + $0x598] sm:$0xff]  }
  0x7e   :  { %2649 = vmatprep.subr.bf16.mxu1 %v2914_v16  ;;  %v2974_v16 = vld [vmem:[%s3672_s1 + $0x5e0] sm:$0xff]  }
  0x7f   :  { %2628 = vmatpush3.bf16.msra.mxu0 %v2913_v15  ;;  %v2973_v15 = vld [vmem:[%s3672_s1 + $0x520] sm:$0xff]  }
  0x80   :  { %2657 = vmatprep.subr.bf16.mxu0 %v2918_v21  ;;  %v2979_v21 = vld [vmem:[%s3672_s1 + $0x5a8] sm:$0xff]  }
  0x81   :  { %2650 = vmatpush3.bf16.msra.mxu1 %v2917_v20  ;;  %v2978_v20 = vld [vmem:[%s3672_s1 + $0x5e8] sm:$0xff]  }
  0x82   :  { %1996 = vmatmul.mubr.bf16.vlgmr.msra.gmra.mrb[12].mxu0 %v2267_v18  ;;  %2679 = vmatprep.subr.bf16.mxu1 %v2922_v26  ;;  %v2976_v18 = vld [vmem:[%s3672_s1 + $0x568] sm:$0xff]   ;;  %v2984_v26 = vld [vmem:[%s3672_s1 + $0x578] sm:$0xff]  }
  0x83   :  { %2658 = vmatpush3.bf16.msra.mxu0 %v2921_v25  ;;  %2075 = vmatprep.mubr.bf16.mxu0 %v2272_v57  ;;  %v2983_v25 = vld [vmem:[%s3672_s1 + $0x5b0] sm:$0xff]  }
  0x84   :  { %2036 = vmatmul.mubr.bf16.vlgmr.msra.gmra.mrb[12].mxu1 %v2269_v23  ;;  %2659 = vmatprep.subr.bf16.mxu0 %v2924_v28  ;;  %v2981_v23 = vld [vmem:[%s3672_s1 + $0x530] sm:$0xff]   ;;  %v2986_v28 = vld [vmem:[%s3672_s1 + $0x5f8] sm:$0xff]  }
  0x85   :  { %2680 = vmatpush3.bf16.msra.mxu1 %v2923_v27  ;;  %2115 = vmatprep.mubr.bf16.mxu1 %v2274_v62  ;;  %v2985_v27 = vld [vmem:[%s3672_s1 + $0x538] sm:$0xff]  }
  0x86   :  { %2681 = vmatprep.subr.bf16.mxu1 %v2926_v30 }
  0x87   :  { %2660 = vmatpush3.bf16.msra.mxu0 %v2925_v29  ;;  %v25_v29 = vld [vmem:[%s3673_s0 + $0x50] sm:$0xff] }
  0x88   :  { %2661 = vmatprep.subr.bf16.mxu0 %v2928_v32  ;;  %v2275_v30 = vcombine.low %v25_v29, %v25_v29  ;;  %v2989_v32 = vld [vmem:[%s3672_s1 + $0x5b8] sm:$0xff]  }
  0x89   :  { %2682 = vmatpush3.bf16.msra.mxu1 %v2927_v31  ;;  %v2276_v31 = vcombine.high %v25_v29, %v25_v29 }
  0x8a   :  { %2683 = vmatprep.subr.bf16.mxu1 %v2930_v34  ;;  %v3005_v34 = vmov 0.0  }
  0x8b   :  { %2662 = vmatpush3.bf16.msra.mxu0 %v2929_v33  ;;  %v26_v33 = vld [vmem:[%s3673_s0 + $0x58] sm:$0xff] }
  0x8c   :  { %2663 = vmatprep.subr.bf16.mxu0 %v2932_v36  ;;  %v2278_v36 = vcombine.high %v26_v33, %v26_v33 }
  0x8d   :  { %2684 = vmatpush3.bf16.msra.mxu1 %v2931_v35  ;;  %v2277_v35 = vcombine.low %v26_v33, %v26_v33 }
  0x8e   :  { %2685 = vmatprep.subr.bf16.mxu1 %v2934_v38  ;;  %v2993_v38 = vld [vmem:[%s3672_s1 + $0x608] sm:$0xff]  }
  0x8f   :  { %2664 = vmatpush3.bf16.msra.mxu0 %v2933_v37  ;;  %v2992_v37 = vld [vmem:[%s3672_s1 + $0x600] sm:$0xff]  }
  0x90   :  { %2665 = vmatprep.subr.bf16.mxu0 %v2936_v40  ;;  %v2995_v40 = vld [vmem:[%s3672_s1 + $0x618] sm:$0xff]  }
  0x91   :  { %2686 = vmatpush3.bf16.msra.mxu1 %v2935_v39  ;;  %v2994_v39 = vld [vmem:[%s3672_s1 + $0x610] sm:$0xff]  }
  0x92   :  { %2687 = vmatprep.subr.bf16.mxu1 %v2938_v42  ;;  %v2997_v42 = vld [vmem:[%s3672_s1 + $0x628] sm:$0xff]  }
  0x93   :  { %2666 = vmatpush3.bf16.msra.mxu0 %v2937_v41  ;;  %v2996_v41 = vld [vmem:[%s3672_s1 + $0x620] sm:$0xff]  }
  0x94   :  { %2667 = vmatprep.subr.bf16.mxu0 %v2940_v44  ;;  %v2999_v44 = vld [vmem:[%s3672_s1 + $0x638] sm:$0xff]  }
  0x95   :  { %2688 = vmatpush3.bf16.msra.mxu1 %v2939_v43  ;;  %v2998_v43 = vld [vmem:[%s3672_s1 + $0x630] sm:$0xff]  }
  0x96   :  { %2689 = vmatprep.subr.bf16.mxu1 %v2942_v46 }
  0x97   :  { %2668 = vmatpush3.bf16.msra.mxu0 %v2941_v45  ;;  %v3000_v45 = vld [vmem:[%s3673_s0 + $0x60] ss:$0 sps:$4 sm:$0xff]  }
  0x98   :  { %2669 = vmatprep.subr.bf16.mxu0 %v2944_v48 }
  0x99   :  { %2690 = vmatpush3.bf16.msra.mxu1 %v2943_v47  ;;  %v2254_v47 = vld [vmem:[%s3674_s2] ss:$0 sm:$0xff] }
  0x9a   :  { %2691 = vmatprep.subr.bf16.mxu1 %v2946_v50 }
  0x9b   :  { %2670 = vmatpush3.bf16.msra.mxu0 %v2945_v49 }
  0x9c   :  { %2671 = vmatprep.subr.bf16.mxu0 %v2948_v52 }
  0x9d   :  { %2692 = vmatpush3.bf16.msra.mxu1 %v2947_v51 }
  0x9e   :  { %2693 = vmatprep.subr.bf16.mxu1 %v2950_v54 }
  0x9f   :  { %2672 = vmatpush3.bf16.msra.mxu0 %v2949_v53 }
  0xa0   :  { %2701 = vmatprep.subr.bf16.mxu0 %v2954_v59 }
  0xa1   :  { %2694 = vmatpush3.bf16.msra.mxu1 %v2953_v58 }
  0xa2   :  { %2076 = vmatmul.mubr.bf16.vlgmr.msra.gmra.mrb[16].mxu0 %v2271_v56  ;;  %2723 = vmatprep.subr.bf16.mxu1 %v2958_v0 }
  0xa3   :  { %2702 = vmatpush3.bf16.msra.mxu0 %v2957_v63  ;;  %2155 = vmatprep.mubr.bf16.mxu0 %v2276_v31 }
  0xa4   :  { %2116 = vmatmul.mubr.bf16.vlgmr.msra.gmra.mrb[16].mxu1 %v2273_v61  ;;  %2703 = vmatprep.subr.bf16.mxu0 %v2960_v2 }
  0xa5   :  { %2724 = vmatpush3.bf16.msra.mxu1 %v2959_v1  ;;  %2195 = vmatprep.mubr.bf16.mxu1 %v2278_v36 }
  0xa6   :  { %2725 = vmatprep.subr.bf16.mxu1 %v2962_v4 }
  0xa7   :  { %2704 = vmatpush3.bf16.msra.mxu0 %v2961_v3 }
  0xa8   :  { %2705 = vmatprep.subr.bf16.mxu0 %v2964_v6 }
  0xa9   :  { %2726 = vmatpush3.bf16.msra.mxu1 %v2963_v5 }
  0xaa   :  { %2727 = vmatprep.subr.bf16.mxu1 %v2966_v8 }
  0xab   :  { %2706 = vmatpush3.bf16.msra.mxu0 %v2965_v7 }
  0xac   :  { %2707 = vmatprep.subr.bf16.mxu0 %v2968_v10 }
  0xad   :  { %2728 = vmatpush3.bf16.msra.mxu1 %v2967_v9 }
  0xae   :  { %2729 = vmatprep.subr.bf16.mxu1 %v2970_v12 }
  0xaf   :  { %2708 = vmatpush3.bf16.msra.mxu0 %v2969_v11 }
  0xb0   :  { %2709 = vmatprep.subr.bf16.mxu0 %v2972_v14 }
  0xb1   :  { %2730 = vmatpush3.bf16.msra.mxu1 %v2971_v13 }
  0xb2   :  { %2731 = vmatprep.subr.bf16.mxu1 %v2974_v16 }
  0xb3   :  { %2710 = vmatpush3.bf16.msra.mxu0 %v2973_v15 }
  0xb4   :  { %2711 = vmatprep.subr.bf16.mxu0 %v2976_v18 }
  0xb5   :  { %2732 = vmatpush3.bf16.msra.mxu1 %v2975_v17 }
  0xb6   :  { %2733 = vmatprep.subr.bf16.mxu1 %v2978_v20 }
  0xb7   :  { %2712 = vmatpush3.bf16.msra.mxu0 %v2977_v19 }
  0xb8   :  { %2713 = vmatprep.subr.bf16.mxu0 %v2980_v22 }
  0xb9   :  { %2734 = vmatpush3.bf16.msra.mxu1 %v2979_v21 }
  0xba   :  { %2735 = vmatprep.subr.bf16.mxu1 %v2982_v24 }
  0xbb   :  { %2714 = vmatpush3.bf16.msra.mxu0 %v2981_v23 }
  0xbc   :  { %2715 = vmatprep.subr.bf16.mxu0 %v2984_v26 }
  0xbd   :  { %2736 = vmatpush3.bf16.msra.mxu1 %v2983_v25 }
  0xbe   :  { %2737 = vmatprep.subr.bf16.mxu1 %v2986_v28 }
  0xbf   :  { %2716 = vmatpush3.bf16.msra.mxu0 %v2985_v27 }
  0xc0   :  { %2754 = vmatprep.subr.bf16.mxu0 %v3005_v34 }
  0xc1   :  { %2738 = vmatpush3.bf16.msra.mxu1 %v2989_v32 }
  0xc2   :  { %2156 = vmatmul.mubr.bf16.vlgmr.msra.gmra.mrb[20].mxu0 %v2275_v30 }
  0xc3   :  { %2755 = vmatpush3.bf16.msra.mxu0 %v2992_v37  ;;  %2770 = vmatprep.mubr.msk.bf16.mxu0 %vm3006_vm0, %v3005_v34 }
  0xc4   :  { %2196 = vmatmul.mubr.bf16.vlgmr.msra.gmra.mrb[20].mxu1 %v2277_v35  ;;  %2756 = vmatprep.subr.bf16.mxu0 %v3005_v34 }
  0xc7   :  { %2757 = vmatpush3.bf16.msra.mxu0 %v2993_v38 }
  0xc8   :  { %2758 = vmatprep.subr.bf16.mxu0 %v3005_v34 }
  0xcb   :  { %2759 = vmatpush3.bf16.msra.mxu0 %v2994_v39 }
  0xcc   :  { %2760 = vmatprep.subr.bf16.mxu0 %v3005_v34 }
  0xcf   :  { %2761 = vmatpush3.bf16.msra.mxu0 %v2995_v40 }
  0xd0   :  { %2762 = vmatprep.subr.bf16.mxu0 %v3005_v34 }
  0xd3   :  { %2763 = vmatpush3.bf16.msra.mxu0 %v2996_v41 }
  0xd4   :  { %2764 = vmatprep.subr.bf16.mxu0 %v3005_v34 }
  0xd7   :  { %2765 = vmatpush3.bf16.msra.mxu0 %v2997_v42 }
  0xd8   :  { %2766 = vmatprep.subr.bf16.mxu0 %v3005_v34 }
  0xdb   :  { %2767 = vmatpush3.bf16.msra.mxu0 %v2998_v43 }
  0xdc   :  { %2768 = vmatprep.subr.bf16.mxu0 %v3005_v34 }
  0xdf   :  { %2769 = vmatpush3.bf16.msra.mxu0 %v2999_v44 }
  0xe2   :  { %2771 = vmatmul.mubr.bf16.vlgmr.msra.gmra.mrb[24].mxu0 %v3000_v45 }
  0xf5   :  { %v2497_v46 = vpop.f32.mrb[0].mxu0 }
  0xf6   :  { %v2498_v48 = vpop.f32.mrb[1].mxu0 }
  0xf7   :  { %v2499_v49 = vadd.f32 %v2498_v48, %v2497_v46  ;;  %v2500_v50 = vpop.f32.mrb[2].mxu0  ;;  %v2519_v51 = vpop.f32.mrb[0].mxu1 }
  0xf8   :  { %v2501_v52 = vpop.f32.mrb[3].mxu0  ;;  %v2520_v53 = vpop.f32.mrb[1].mxu1 }
  0xf9   :  { %v1758_v54 = vadd.f32 %v2499_v49, %v2254_v47  ;;  %v2521_v55 = vadd.f32 %v2520_v53, %v2519_v51  ;;  %v2522_v56 = vpop.f32.mrb[2].mxu1 }
  0xfa   :  { %v2523_v57 = vpop.f32.mrb[3].mxu1 }
  0xfb   :  { %v1798_v58 = vadd.f32 %v2521_v55, %v1758_v54 }
 0x115   :  { %v2541_v59 = vpop.f32.mrb[4].mxu0 }
 0x116   :  { %v2542_v60 = vpop.f32.mrb[5].mxu0 }
 0x117   :  { %v2543_v61 = vadd.f32 %v2542_v60, %v2541_v59  ;;  %v2544_v62 = vpop.f32.mrb[6].mxu0  ;;  %v2563_v63 = vpop.f32.mrb[4].mxu1 }
 0x118   :  { %v2545_v0 = vpop.f32.mrb[7].mxu0  ;;  %v2564_v2 = vpop.f32.mrb[5].mxu1 }
 0x119   :  { %v1838_v1 = vadd.f32 %v2543_v61, %v1798_v58  ;;  %v2565_v3 = vadd.f32 %v2564_v2, %v2563_v63  ;;  %v2566_v4 = vpop.f32.mrb[6].mxu1 }
 0x11a   :  { %v2567_v5 = vpop.f32.mrb[7].mxu1 }
 0x11b   :  { %v1878_v6 = vadd.f32 %v2565_v3, %v1838_v1 }
 0x135   :  { %v2585_v7 = vpop.f32.mrb[8].mxu0 }
 0x136   :  { %v2586_v8 = vpop.f32.mrb[9].mxu0 }
 0x137   :  { %v2587_v9 = vadd.f32 %v2586_v8, %v2585_v7  ;;  %v2588_v10 = vpop.f32.mrb[10].mxu0  ;;  %v2607_v11 = vpop.f32.mrb[8].mxu1 }
 0x138   :  { %v2589_v12 = vpop.f32.mrb[11].mxu0  ;;  %v2608_v13 = vpop.f32.mrb[9].mxu1 }
 0x139   :  { %v1918_v14 = vadd.f32 %v2587_v9, %v1878_v6  ;;  %v2609_v15 = vadd.f32 %v2608_v13, %v2607_v11  ;;  %v2610_v16 = vpop.f32.mrb[10].mxu1 }
 0x13a   :  { %v2611_v17 = vpop.f32.mrb[11].mxu1 }
 0x13b   :  { %v1958_v18 = vadd.f32 %v2609_v15, %v1918_v14 }
 0x155   :  { %v2629_v19 = vpop.f32.mrb[12].mxu0 }
 0x156   :  { %v2630_v20 = vpop.f32.mrb[13].mxu0 }
 0x157   :  { %v2631_v21 = vadd.f32 %v2630_v20, %v2629_v19  ;;  %v2632_v22 = vpop.f32.mrb[14].mxu0  ;;  %v2651_v23 = vpop.f32.mrb[12].mxu1 }
 0x158   :  { %v2633_v24 = vpop.f32.mrb[15].mxu0  ;;  %v2652_v25 = vpop.f32.mrb[13].mxu1 }
 0x159   :  { %v1998_v26 = vadd.f32 %v2631_v21, %v1958_v18  ;;  %v2653_v27 = vadd.f32 %v2652_v25, %v2651_v23  ;;  %v2654_v28 = vpop.f32.mrb[14].mxu1 }
 0x15a   :  { %v2655_v29 = vpop.f32.mrb[15].mxu1 }
 0x15b   :  { %v2038_v30 = vadd.f32 %v2653_v27, %v1998_v26 }
 0x175   :  { %v2673_v31 = vpop.f32.mrb[16].mxu0 }
 0x176   :  { %v2674_v32 = vpop.f32.mrb[17].mxu0 }
 0x177   :  { %v2675_v33 = vadd.f32 %v2674_v32, %v2673_v31  ;;  %v2676_v34 = vpop.f32.mrb[18].mxu0  ;;  %v2695_v35 = vpop.f32.mrb[16].mxu1 }
 0x178   :  { %v2677_v36 = vpop.f32.mrb[19].mxu0  ;;  %v2696_v38 = vpop.f32.mrb[17].mxu1 }
 0x179   :  { %v2078_v37 = vadd.f32 %v2675_v33, %v2038_v30  ;;  %v2697_v39 = vadd.f32 %v2696_v38, %v2695_v35  ;;  %v2698_v40 = vpop.f32.mrb[18].mxu1 }
 0x17a   :  { %v2699_v41 = vpop.f32.mrb[19].mxu1 }
 0x17b   :  { %v2118_v42 = vadd.f32 %v2697_v39, %v2078_v37 }
 0x195   :  { %v2717_v43 = vpop.f32.mrb[20].mxu0 }
 0x196   :  { %v2718_v44 = vpop.f32.mrb[21].mxu0 }
 0x197   :  { %v2719_v45 = vadd.f32 %v2718_v44, %v2717_v43  ;;  %v2720_v46 = vpop.f32.mrb[22].mxu0  ;;  %v2739_v47 = vpop.f32.mrb[20].mxu1 }
 0x198   :  { %v2721_v48 = vpop.f32.mrb[23].mxu0  ;;  %v2740_v49 = vpop.f32.mrb[21].mxu1 }
 0x199   :  { %v2158_v50 = vadd.f32 %v2719_v45, %v2118_v42  ;;  %v2741_v51 = vadd.f32 %v2740_v49, %v2739_v47  ;;  %v2742_v52 = vpop.f32.mrb[22].mxu1 }
 0x19a   :  { %v2743_v53 = vpop.f32.mrb[23].mxu1 }
 0x19b   :  { %v2198_v54 = vadd.f32 %v2741_v51, %v2158_v50 }
 0x1b5   :  { %v2237_v55 = vpop.f32.mrb[24].mxu0 }
 0x1b6   :  { %v2238_v56 = vadd.f32 %v2237_v55, %v2198_v54  ;;  %v2772_v57 = vpop.f32.mrb[25].mxu0 }
 0x1b7   :  { %v2240_v58 = vpop.f32.mrb[26].mxu0 }
 0x1b8   :  { %v2480_v59 = vmul.f32 -1.442695, %v2238_v56  ;;  %v2773_v60 = vpop.f32.mrb[27].mxu0 }
 0x1ba   :  { %3001 = vpow2.f32 %v2480_v59 }
 0x1c4   :  { %v3002_v61 = vpop.eup %3001 }
 0x1c5   :  { %v2246_v62 = vadd.f32 1.0, %v3002_v61 }
 0x1c7   :  { %3003 = vrcp.f32 %v2246_v62 }
 0x1d1   :  { %v3004_v63 = vpop.eup %3003 }
 0x1d2   :  { %2249 = vst [vmem:[%s3675_s3] sm:$0xff] %v3004_v63 }

</bundles_post_ra>
